<compile_context>
chip_gen: v6e
topology: v6e:2x2x1
jax: 0.10.0
libtpu: 0.0.40
codegen_flags: <defaults>
</compile_context>

<pallas_src>
import functools

import numpy as np

import jax
import jax.numpy as jnp
from jax import lax
from jax.experimental import pallas as pl
from jax.experimental.pallas import tpu as pltpu


def _attention_kernel(x_ref, t_ref, wq_ref, wkv_ref, wproj_ref, bproj_ref,
                      out_ref, q_scr, k_scr, v_scr, m_scr, l_scr, acc_scr, *,
                      num_heads, key_block, compute_dtype):
    # Block shapes (one batch element per grid step, batch dim squeezed):
    #   x_ref, t_ref, out_ref : (C, N)   channel-major
    #   wq_ref                : (C, C)   scale folded in, compute_dtype
    #   wkv_ref               : (2C, C)  compute_dtype
    #   wproj_ref             : (C, C)   compute_dtype
    #   bproj_ref             : (C, 1)   f32
    # Scratch:
    #   q_scr (nh, hd, N) cdt | k_scr, v_scr (C, N) cdt
    #   m_scr, l_scr (nh, 1, N) f32 | acc_scr (nh, hd, N) f32
    C, N = x_ref.shape
    hd = C // num_heads
    n_kb = N // key_block
    cdt = compute_dtype
    exact = np.dtype(compute_dtype) == np.dtype(jnp.float32)

    # Activations: cast to the MXU input dtype at load (HBM stays f32).
    x = x_ref[...].astype(cdt)                                       # (C, N)
    t = t_ref[...].astype(cdt)                                       # (C, N)

    # Channel-major projections: q^T = (scale*Wq) @ x , kv^T = Wkv @ t.
    qT = jnp.dot(wq_ref[...], x, preferred_element_type=jnp.float32)    # (C, N)
    kvT = jnp.dot(wkv_ref[...], t, preferred_element_type=jnp.float32)  # (2C, N)

    # Head split / k-v split are pure leading-dim ops (channel = head*hd + d).
    q_scr[...] = qT.reshape(num_heads, hd, N).astype(cdt)
    k_scr[...] = kvT[:C].astype(cdt)
    v_scr[...] = kvT[C:].astype(cdt)

    # Online-softmax running state.
    m_scr[...] = jnp.full_like(m_scr, -jnp.inf)
    l_scr[...] = jnp.zeros_like(l_scr)
    acc_scr[...] = jnp.zeros_like(acc_scr)

    def kv_block(kb, carry):
        start = pl.multiple_of(kb * key_block, key_block)
        qh = q_scr[...]                                              # (h, d, N)
        k_blk = k_scr[:, pl.ds(start, key_block)].reshape(
            num_heads, hd, key_block)                                # (h, d, Kb)
        v_blk = v_scr[:, pl.ds(start, key_block)].reshape(
            num_heads, hd, key_block)                                # (h, d, Kb)

        # Scores in (head, key, query) orientation: s = K^T Q.  Contraction
        # over d (sublane on both operands) -> transposed-LHS MXU path.
        s = lax.dot_general(k_blk, qh, (((1,), (1,)), ((0,), (0,))),
                            preferred_element_type=jnp.float32)      # (h, Kb, N)

        m_prev = m_scr[...]                                          # (h, 1, N)
        l_prev = l_scr[...]
        m_new = jnp.maximum(m_prev, jnp.max(s, axis=1, keepdims=True))
        alpha = jnp.exp(m_prev - m_new)                              # (h, 1, N)
        p = jnp.exp(s - m_new)                                       # (h, Kb, N) f32

        # Context update: V(d,k) @ P(k,q) is MXU-canonical (no NxN transpose).
        pv = lax.dot_general(v_blk, p.astype(cdt),
                             (((2,), (1,)), ((0,), (0,))),
                             preferred_element_type=jnp.float32)     # (h, d, N)

        l_scr[...] = alpha * l_prev + jnp.sum(p, axis=1, keepdims=True)
        acc_scr[...] = alpha * acc_scr[...] + pv
        m_scr[...] = m_new
        return carry

    lax.fori_loop(0, n_kb, kv_block, 0, unroll=(n_kb <= 8))

    # Normalize, merge heads (leading-dim reshape), project, add bias.
    if exact:
        inv_l = 1.0 / l_scr[...]                        # exact path (validation)
    else:
        inv_l = pl.reciprocal(l_scr[...], approx=True)  # EUP slot (production)
    ctx = (acc_scr[...] * inv_l).reshape(C, N).astype(cdt)            # (C, N)
    outT = (jnp.dot(wproj_ref[...], ctx, preferred_element_type=jnp.float32)
            + bproj_ref[...])                                          # (C, N)
    out_ref[...] = outT.astype(out_ref.dtype)


def _physical_vmem_bytes():
    try:
        return int(pltpu.get_tpu_info().vmem_capacity_bytes)
    except Exception:
        return 128 << 20


def _pick_key_block(N, cap=512):
    """Largest multiple of 128 dividing N and <= cap (falls back to N)."""
    best = None
    kb = 128
    while kb <= min(N, cap):
        if N % kb == 0:
            best = kb
        kb += 128
    return best if best is not None else N


def _vmem_limit_bytes(C, N, num_heads, key_block, compute_dtype):
    hd = C // num_heads
    cdb = np.dtype(compute_dtype).itemsize
    f32 = 4
    est = 0
    est += 3 * 2 * C * N * f32                          # x / t / out blocks, double-buffered
    est += 2 * 4 * C * C * cdb + 2 * C * f32            # resident weights (x2 buffers) + bias
    est += (num_heads * hd + 2 * C) * N * cdb           # q / k / v scratch
    est += (2 * 8 + max(hd, 8)) * num_heads * N * f32   # m, l (sublane-padded), acc scratch
    est += 2 * num_heads * key_block * N * f32          # s and p tiles
    est += 3 * C * N * f32                              # projection intermediates
    est = int(est * 1.5) + (4 << 20)                    # pipeline/compiler headroom
    cap = (3 * _physical_vmem_bytes()) // 4             # ~48 MiB v7x, ~96 MiB v5e/v6e
    return min(max(est, 32 << 20), cap)


def attention_pallas(x1, temp, wq, wkv, wproj, bproj, *, num_heads,
                     compute_dtype=jnp.bfloat16, key_block=None):
    """x1, temp: (B, C, H, W) float32.  Returns (B, C, H, W)."""
    B, C, H, W = x1.shape
    assert C % num_heads == 0
    N = H * W
    hd = C // num_heads
    scale = hd ** (-0.5)

    if key_block is None:
        key_block = _pick_key_block(N)
    key_block = min(key_block, N)
    assert N % key_block == 0, f"N={N} must be divisible by key_block={key_block}"

    # NCHW -> (B, C, N): contiguous reshape, no HBM transpose pass.
    x_cm = x1.reshape(B, C, N)
    t_cm = temp.reshape(B, C, N)

    # Fold the attention scale into Wq and cast weights to the MXU input
    # dtype once in the wrapper (amortized over the whole grid).
    wq_s = (wq * scale).astype(compute_dtype)
    wkv_c = wkv.astype(compute_dtype)
    wproj_c = wproj.astype(compute_dtype)
    bias2d = bproj.reshape(C, 1).astype(jnp.float32)

    kernel = functools.partial(_attention_kernel, num_heads=num_heads,
                               key_block=key_block, compute_dtype=compute_dtype)

    out_cm = pl.pallas_call(
        kernel,
        out_shape=jax.ShapeDtypeStruct((B, C, N), x1.dtype),
        grid_spec=pltpu.PrefetchScalarGridSpec(
            num_scalar_prefetch=0,
            grid=(B,),                                  # one batch element / step
            in_specs=[
                pl.BlockSpec((None, C, N), lambda b: (b, 0, 0)),   # x1   (channel-major)
                pl.BlockSpec((None, C, N), lambda b: (b, 0, 0)),   # temp
                pl.BlockSpec((C, C), lambda b: (0, 0)),            # Wq * scale (resident)
                pl.BlockSpec((2 * C, C), lambda b: (0, 0)),        # Wkv        (resident)
                pl.BlockSpec((C, C), lambda b: (0, 0)),            # Wproj      (resident)
                pl.BlockSpec((C, 1), lambda b: (0, 0)),            # proj bias  (resident)
            ],
            out_specs=pl.BlockSpec((None, C, N), lambda b: (b, 0, 0)),
            scratch_shapes=[
                pltpu.VMEM((num_heads, hd, N), compute_dtype),     # q
                pltpu.VMEM((C, N), compute_dtype),                 # k
                pltpu.VMEM((C, N), compute_dtype),                 # v
                pltpu.VMEM((num_heads, 1, N), jnp.float32),        # running max
                pltpu.VMEM((num_heads, 1, N), jnp.float32),        # running denom
                pltpu.VMEM((num_heads, hd, N), jnp.float32),       # running numerator
            ],
        ),
        compiler_params=pltpu.CompilerParams(
            dimension_semantics=("parallel",),
            vmem_limit_bytes=_vmem_limit_bytes(C, N, num_heads, key_block,
                                               compute_dtype),
        ),
    )(x_cm, t_cm, wq_s, wkv_c, wproj_c, bias2d)

    # (B, C, N) -> NCHW (free reshape; no transpose needed).
    return out_cm.reshape(B, C, H, W)


def attention_ref(x1, temp, wq, wkv, wproj, bproj, *, num_heads):
    """Pure-JAX reference mirroring the PyTorch forward exactly."""
    B, C, H, W = x1.shape
    N = H * W
    hd = C // num_heads
    scale = hd ** (-0.5)
    xs = jnp.transpose(x1.reshape(B, C, N), (0, 2, 1))     # (B, N, C)
    ts = jnp.transpose(temp.reshape(B, C, N), (0, 2, 1))   # (B, N, C)
    q = (xs @ wq.T).reshape(B, N, num_heads, hd).transpose(0, 2, 1, 3)
    kv = (ts @ wkv.T).reshape(B, N, 2, num_heads, hd).transpose(2, 0, 3, 1, 4)
    k, v = (kv[0], kv[1])
    attn = (q @ jnp.swapaxes(k, -2, -1)) * scale
    attn = jax.nn.softmax(attn, axis=-1)
    x = (attn @ v).transpose(0, 2, 1, 3).reshape(B, N, C)
    x = x @ wproj.T + bproj
    return jnp.transpose(x, (0, 2, 1)).reshape(B, C, H, W)


if __name__ == "__main__":
    # Small shapes consistent with the module: C divisible by num_heads and a
    # lane-dense sequence length N = H*W = 256 (multiple of 128).
    B, C, H, W = 2, 32, 16, 16
    num_heads = 4

    key = jax.random.PRNGKey(0)
    k_x1, k_tmp, k_wq, k_wkv, k_wproj = jax.random.split(key, 5)

    x1 = jax.random.normal(k_x1, (B, C, H, W), dtype=jnp.float32)
    temp = jax.random.normal(k_tmp, (B, C, H, W), dtype=jnp.float32)

    # nn.init.normal_(std=0.001) weights, zero proj bias (qkv_bias=False;
    # attn_drop / proj_drop at p=0.0 are identity).
    wq = 0.001 * jax.random.normal(k_wq, (C, C), dtype=jnp.float32)        # q.weight   (out, in)
    wkv = 0.001 * jax.random.normal(k_wkv, (2 * C, C), dtype=jnp.float32)  # kv.weight
    wproj = 0.001 * jax.random.normal(k_wproj, (C, C), dtype=jnp.float32)  # proj.weight
    bproj = jnp.zeros((C,), dtype=jnp.float32)                             # proj.bias

    ref = attention_ref(x1, temp, wq, wkv, wproj, bproj, num_heads=num_heads)
    ref_scale = float(jnp.max(jnp.abs(ref)))

    # Exact-math validation: f32 matmuls + exact softmax division, with a
    # 2-block key loop so the online-softmax rescaling path is exercised.
    out_f32 = attention_pallas(x1, temp, wq, wkv, wproj, bproj,
                               num_heads=num_heads,
                               compute_dtype=jnp.float32, key_block=128)
    out_f32 = jax.block_until_ready(out_f32)
    assert out_f32.shape == (B, C, H, W)
    err_f32 = float(jnp.max(jnp.abs(out_f32 - ref)))
    assert err_f32 <= 1e-3 * ref_scale + 1e-7, f"f32 path mismatch: {err_f32}"

    # Production path: bf16 MXU inputs, approx reciprocal, flash key loop.
    out_bf16 = attention_pallas(x1, temp, wq, wkv, wproj, bproj,
                                num_heads=num_heads,
                                compute_dtype=jnp.bfloat16, key_block=128)
    out_bf16 = jax.block_until_ready(out_bf16)
    assert out_bf16.shape == (B, C, H, W)
    err_bf16 = float(jnp.max(jnp.abs(out_bf16 - ref)))
    assert err_bf16 <= 5e-2 * ref_scale + 1e-7, f"bf16 path mismatch: {err_bf16}"

    print("KERNEL_OK")
</pallas_src>

<mosaic_0001>
module attributes {stable_mosaic.version = 11 : i64} {
  func.func @_attention_kernel(%arg0: i32, %arg1: memref<1x32x256xf32, #tpu.memory_space<vmem>>, %arg2: memref<1x32x256xf32, #tpu.memory_space<vmem>>, %arg3: memref<32x32xf32, #tpu.memory_space<vmem>>, %arg4: memref<64x32xf32, #tpu.memory_space<vmem>>, %arg5: memref<32x32xf32, #tpu.memory_space<vmem>>, %arg6: memref<32x1xf32, #tpu.memory_space<vmem>>, %arg7: memref<1x32x256xf32, #tpu.memory_space<vmem>>, %arg8: memref<4x8x256xf32, #tpu.memory_space<vmem>>, %arg9: memref<32x256xf32, #tpu.memory_space<vmem>>, %arg10: memref<32x256xf32, #tpu.memory_space<vmem>>, %arg11: memref<4x1x256xf32, #tpu.memory_space<vmem>>, %arg12: memref<4x1x256xf32, #tpu.memory_space<vmem>>, %arg13: memref<4x8x256xf32, #tpu.memory_space<vmem>>) attributes {dimension_semantics = [#tpu.dimension_semantics<parallel>], iteration_bounds = array<i64: 2>, scalar_prefetch = 0 : i64, scratch_operands = 6 : i64, tpu.core_type = #tpu.core_type<tc>, window_params = [{transform_indices = @transform_0, window_bounds = array<i64: 1, 32, 256>}, {transform_indices = @transform_1, window_bounds = array<i64: 1, 32, 256>}, {pipeline_mode = #tpu.pipeline_mode<synchronous>, transform_indices = @transform_2, window_bounds = array<i64: 32, 32>}, {pipeline_mode = #tpu.pipeline_mode<synchronous>, transform_indices = @transform_3, window_bounds = array<i64: 64, 32>}, {pipeline_mode = #tpu.pipeline_mode<synchronous>, transform_indices = @transform_4, window_bounds = array<i64: 32, 32>}, {pipeline_mode = #tpu.pipeline_mode<synchronous>, transform_indices = @transform_5, window_bounds = array<i64: 32, 1>}, {transform_indices = @transform_6, window_bounds = array<i64: 1, 32, 256>}]} {
    %c0 = arith.constant 0 : index
    %c0_0 = arith.constant 0 : index
    %c0_1 = arith.constant 0 : index
    %0 = vector.load %arg1[%c0, %c0_0, %c0_1] : memref<1x32x256xf32, #tpu.memory_space<vmem>>, vector<1x32x256xf32>
    %1 = vector.shape_cast %0 : vector<1x32x256xf32> to vector<32x256xf32>
    %c0_2 = arith.constant 0 : index
    %c0_3 = arith.constant 0 : index
    %c0_4 = arith.constant 0 : index
    %2 = vector.load %arg2[%c0_2, %c0_3, %c0_4] : memref<1x32x256xf32, #tpu.memory_space<vmem>>, vector<1x32x256xf32>
    %3 = vector.shape_cast %2 : vector<1x32x256xf32> to vector<32x256xf32>
    %c0_5 = arith.constant 0 : index
    %c0_6 = arith.constant 0 : index
    %4 = vector.load %arg3[%c0_5, %c0_6] : memref<32x32xf32, #tpu.memory_space<vmem>>, vector<32x32xf32>
    %cst = arith.constant dense<0.000000e+00> : vector<32x256xf32>
    %5 = tpu.matmul %4, %1, %cst {dimension_numbers = #tpu.dot_dimension_numbers<[1], [0], [0], [1], [0, 0, 1, 1], [], []>} : vector<32x32xf32>, vector<32x256xf32>, vector<32x256xf32> -> vector<32x256xf32>
    %c0_7 = arith.constant 0 : index
    %c0_8 = arith.constant 0 : index
    %6 = vector.load %arg4[%c0_7, %c0_8] : memref<64x32xf32, #tpu.memory_space<vmem>>, vector<64x32xf32>
    %cst_9 = arith.constant dense<0.000000e+00> : vector<64x256xf32>
    %7 = tpu.matmul %6, %3, %cst_9 {dimension_numbers = #tpu.dot_dimension_numbers<[1], [0], [0], [1], [0, 0, 1, 1], [], []>} : vector<64x32xf32>, vector<32x256xf32>, vector<64x256xf32> -> vector<64x256xf32>
    %8 = vector.shape_cast %5 : vector<32x256xf32> to vector<4x8x256xf32>
    %c0_10 = arith.constant 0 : index
    %c0_11 = arith.constant 0 : index
    %c0_12 = arith.constant 0 : index
    %9 = vector.load %arg8[%c0_10, %c0_11, %c0_12] : memref<4x8x256xf32, #tpu.memory_space<vmem>>, vector<4x8x256xf32>
    tpu.vector_store %arg8[%c0_10, %c0_11, %c0_12], %8 {strides = array<i32>} : memref<4x8x256xf32, #tpu.memory_space<vmem>>, vector<4x8x256xf32>,
    %10 = vector.extract_strided_slice %7 {offsets = [0, 0], sizes = [32, 256], strides = [1, 1]} : vector<64x256xf32> to vector<32x256xf32>
    %c0_13 = arith.constant 0 : index
    %c0_14 = arith.constant 0 : index
    %11 = vector.load %arg9[%c0_13, %c0_14] : memref<32x256xf32, #tpu.memory_space<vmem>>, vector<32x256xf32>
    tpu.vector_store %arg9[%c0_13, %c0_14], %10 {strides = array<i32>} : memref<32x256xf32, #tpu.memory_space<vmem>>, vector<32x256xf32>,
    %12 = vector.extract_strided_slice %7 {offsets = [32, 0], sizes = [32, 256], strides = [1, 1]} : vector<64x256xf32> to vector<32x256xf32>
    %c0_15 = arith.constant 0 : index
    %c0_16 = arith.constant 0 : index
    %13 = vector.load %arg10[%c0_15, %c0_16] : memref<32x256xf32, #tpu.memory_space<vmem>>, vector<32x256xf32>
    tpu.vector_store %arg10[%c0_15, %c0_16], %12 {strides = array<i32>} : memref<32x256xf32, #tpu.memory_space<vmem>>, vector<32x256xf32>,
    %cst_17 = arith.constant 0xFF800000 : f32
    %14 = vector.broadcast %cst_17 : f32 to vector<4x1x256xf32>
    %c0_18 = arith.constant 0 : index
    %c0_19 = arith.constant 0 : index
    %c0_20 = arith.constant 0 : index
    %15 = vector.load %arg11[%c0_18, %c0_19, %c0_20] : memref<4x1x256xf32, #tpu.memory_space<vmem>>, vector<4x1x256xf32>
    tpu.vector_store %arg11[%c0_18, %c0_19, %c0_20], %14 {strides = array<i32>} : memref<4x1x256xf32, #tpu.memory_space<vmem>>, vector<4x1x256xf32>,
    %cst_21 = arith.constant 0.000000e+00 : f32
    %16 = vector.broadcast %cst_21 : f32 to vector<4x1x256xf32>
    %c0_22 = arith.constant 0 : index
    %c0_23 = arith.constant 0 : index
    %c0_24 = arith.constant 0 : index
    %17 = vector.load %arg12[%c0_22, %c0_23, %c0_24] : memref<4x1x256xf32, #tpu.memory_space<vmem>>, vector<4x1x256xf32>
    tpu.vector_store %arg12[%c0_22, %c0_23, %c0_24], %16 {strides = array<i32>} : memref<4x1x256xf32, #tpu.memory_space<vmem>>, vector<4x1x256xf32>,
    %cst_25 = arith.constant 0.000000e+00 : f32
    %18 = vector.broadcast %cst_25 : f32 to vector<4x8x256xf32>
    %c0_26 = arith.constant 0 : index
    %c0_27 = arith.constant 0 : index
    %c0_28 = arith.constant 0 : index
    %19 = vector.load %arg13[%c0_26, %c0_27, %c0_28] : memref<4x8x256xf32, #tpu.memory_space<vmem>>, vector<4x8x256xf32>
    tpu.vector_store %arg13[%c0_26, %c0_27, %c0_28], %18 {strides = array<i32>} : memref<4x8x256xf32, #tpu.memory_space<vmem>>, vector<4x8x256xf32>,
    %c0_i32 = arith.constant 0 : i32
    %c128_i32 = arith.constant 128 : i32
    %20 = arith.muli %c0_i32, %c128_i32 : i32
    %21 = tpu.assume_multiple %20, 128 : i32
    %c0_29 = arith.constant 0 : index
    %c0_30 = arith.constant 0 : index
    %c0_31 = arith.constant 0 : index
    %22 = vector.load %arg8[%c0_29, %c0_30, %c0_31] : memref<4x8x256xf32, #tpu.memory_space<vmem>>, vector<4x8x256xf32>
    %c0_32 = arith.constant 0 : index
    %23 = arith.index_cast %21 : i32 to index
    %24 = vector.load %arg9[%c0_32, %23] : memref<32x256xf32, #tpu.memory_space<vmem>>, vector<32x128xf32>
    %25 = vector.shape_cast %24 : vector<32x128xf32> to vector<4x8x128xf32>
    %c0_33 = arith.constant 0 : index
    %26 = arith.index_cast %21 : i32 to index
    %27 = vector.load %arg10[%c0_33, %26] : memref<32x256xf32, #tpu.memory_space<vmem>>, vector<32x128xf32>
    %28 = vector.shape_cast %27 : vector<32x128xf32> to vector<4x8x128xf32>
    %cst_34 = arith.constant dense<0.000000e+00> : vector<4x128x256xf32>
    %29 = tpu.matmul %25, %22, %cst_34 {dimension_numbers = #tpu.dot_dimension_numbers<[1], [1], [2], [2], [0, 0, 0, 2, 1, 2], [0], [0]>} : vector<4x8x128xf32>, vector<4x8x256xf32>, vector<4x128x256xf32> -> vector<4x128x256xf32>
    %c0_35 = arith.constant 0 : index
    %c0_36 = arith.constant 0 : index
    %c0_37 = arith.constant 0 : index
    %30 = vector.load %arg11[%c0_35, %c0_36, %c0_37] : memref<4x1x256xf32, #tpu.memory_space<vmem>>, vector<4x1x256xf32>
    %c0_38 = arith.constant 0 : index
    %c0_39 = arith.constant 0 : index
    %c0_40 = arith.constant 0 : index
    %31 = vector.load %arg12[%c0_38, %c0_39, %c0_40] : memref<4x1x256xf32, #tpu.memory_space<vmem>>, vector<4x1x256xf32>
    %cst_41 = arith.constant dense<0xFF800000> : vector<4x256xf32>
    %32 = vector.multi_reduction <maximumf>, %29, %cst_41 [1] : vector<4x128x256xf32> to vector<4x256xf32>
    %33 = vector.shape_cast %32 : vector<4x256xf32> to vector<4x1x256xf32>
    %34 = arith.maximumf %30, %33 : vector<4x1x256xf32>
    %35 = arith.subf %30, %34 : vector<4x1x256xf32>
    %36 = math.exp %35 : vector<4x1x256xf32>
    %37 = vector.broadcast %34 : vector<4x1x256xf32> to vector<4x128x256xf32>
    %38 = arith.subf %29, %37 : vector<4x128x256xf32>
    %39 = math.exp %38 : vector<4x128x256xf32>
    %cst_42 = arith.constant dense<0.000000e+00> : vector<4x8x256xf32>
    %40 = tpu.matmul %28, %39, %cst_42 {dimension_numbers = #tpu.dot_dimension_numbers<[2], [1], [1], [2], [0, 0, 0, 1, 1, 2], [0], [0]>} : vector<4x8x128xf32>, vector<4x128x256xf32>, vector<4x8x256xf32> -> vector<4x8x256xf32>
    %41 = arith.mulf %36, %31 : vector<4x1x256xf32>
    %cst_43 = arith.constant dense<0.000000e+00> : vector<4x256xf32>
    %42 = vector.multi_reduction <add>, %39, %cst_43 [1] : vector<4x128x256xf32> to vector<4x256xf32>
    %43 = vector.shape_cast %42 : vector<4x256xf32> to vector<4x1x256xf32>
    %44 = arith.addf %41, %43 : vector<4x1x256xf32>
    %c0_44 = arith.constant 0 : index
    %c0_45 = arith.constant 0 : index
    %c0_46 = arith.constant 0 : index
    %45 = vector.load %arg12[%c0_44, %c0_45, %c0_46] : memref<4x1x256xf32, #tpu.memory_space<vmem>>, vector<4x1x256xf32>
    tpu.vector_store %arg12[%c0_44, %c0_45, %c0_46], %44 {strides = array<i32>} : memref<4x1x256xf32, #tpu.memory_space<vmem>>, vector<4x1x256xf32>,
    %c0_47 = arith.constant 0 : index
    %c0_48 = arith.constant 0 : index
    %c0_49 = arith.constant 0 : index
    %46 = vector.load %arg13[%c0_47, %c0_48, %c0_49] : memref<4x8x256xf32, #tpu.memory_space<vmem>>, vector<4x8x256xf32>
    %47 = vector.broadcast %36 : vector<4x1x256xf32> to vector<4x8x256xf32>
    %48 = arith.mulf %47, %46 : vector<4x8x256xf32>
    %49 = arith.addf %48, %40 : vector<4x8x256xf32>
    %c0_50 = arith.constant 0 : index
    %c0_51 = arith.constant 0 : index
    %c0_52 = arith.constant 0 : index
    %50 = vector.load %arg13[%c0_50, %c0_51, %c0_52] : memref<4x8x256xf32, #tpu.memory_space<vmem>>, vector<4x8x256xf32>
    tpu.vector_store %arg13[%c0_50, %c0_51, %c0_52], %49 {strides = array<i32>} : memref<4x8x256xf32, #tpu.memory_space<vmem>>, vector<4x8x256xf32>,
    %c0_53 = arith.constant 0 : index
    %c0_54 = arith.constant 0 : index
    %c0_55 = arith.constant 0 : index
    %51 = vector.load %arg11[%c0_53, %c0_54, %c0_55] : memref<4x1x256xf32, #tpu.memory_space<vmem>>, vector<4x1x256xf32>
    tpu.vector_store %arg11[%c0_53, %c0_54, %c0_55], %34 {strides = array<i32>} : memref<4x1x256xf32, #tpu.memory_space<vmem>>, vector<4x1x256xf32>,
    %c1_i32 = arith.constant 1 : i32
    %c128_i32_56 = arith.constant 128 : i32
    %52 = arith.muli %c1_i32, %c128_i32_56 : i32
    %53 = tpu.assume_multiple %52, 128 : i32
    %c0_57 = arith.constant 0 : index
    %c0_58 = arith.constant 0 : index
    %c0_59 = arith.constant 0 : index
    %54 = vector.load %arg8[%c0_57, %c0_58, %c0_59] : memref<4x8x256xf32, #tpu.memory_space<vmem>>, vector<4x8x256xf32>
    %c0_60 = arith.constant 0 : index
    %55 = arith.index_cast %53 : i32 to index
    %56 = vector.load %arg9[%c0_60, %55] : memref<32x256xf32, #tpu.memory_space<vmem>>, vector<32x128xf32>
    %57 = vector.shape_cast %56 : vector<32x128xf32> to vector<4x8x128xf32>
    %c0_61 = arith.constant 0 : index
    %58 = arith.index_cast %53 : i32 to index
    %59 = vector.load %arg10[%c0_61, %58] : memref<32x256xf32, #tpu.memory_space<vmem>>, vector<32x128xf32>
    %60 = vector.shape_cast %59 : vector<32x128xf32> to vector<4x8x128xf32>
    %cst_62 = arith.constant dense<0.000000e+00> : vector<4x128x256xf32>
    %61 = tpu.matmul %57, %54, %cst_62 {dimension_numbers = #tpu.dot_dimension_numbers<[1], [1], [2], [2], [0, 0, 0, 2, 1, 2], [0], [0]>} : vector<4x8x128xf32>, vector<4x8x256xf32>, vector<4x128x256xf32> -> vector<4x128x256xf32>
    %c0_63 = arith.constant 0 : index
    %c0_64 = arith.constant 0 : index
    %c0_65 = arith.constant 0 : index
    %62 = vector.load %arg11[%c0_63, %c0_64, %c0_65] : memref<4x1x256xf32, #tpu.memory_space<vmem>>, vector<4x1x256xf32>
    %c0_66 = arith.constant 0 : index
    %c0_67 = arith.constant 0 : index
    %c0_68 = arith.constant 0 : index
    %63 = vector.load %arg12[%c0_66, %c0_67, %c0_68] : memref<4x1x256xf32, #tpu.memory_space<vmem>>, vector<4x1x256xf32>
    %cst_69 = arith.constant dense<0xFF800000> : vector<4x256xf32>
    %64 = vector.multi_reduction <maximumf>, %61, %cst_69 [1] : vector<4x128x256xf32> to vector<4x256xf32>
    %65 = vector.shape_cast %64 : vector<4x256xf32> to vector<4x1x256xf32>
    %66 = arith.maximumf %62, %65 : vector<4x1x256xf32>
    %67 = arith.subf %62, %66 : vector<4x1x256xf32>
    %68 = math.exp %67 : vector<4x1x256xf32>
    %69 = vector.broadcast %66 : vector<4x1x256xf32> to vector<4x128x256xf32>
    %70 = arith.subf %61, %69 : vector<4x128x256xf32>
    %71 = math.exp %70 : vector<4x128x256xf32>
    %cst_70 = arith.constant dense<0.000000e+00> : vector<4x8x256xf32>
    %72 = tpu.matmul %60, %71, %cst_70 {dimension_numbers = #tpu.dot_dimension_numbers<[2], [1], [1], [2], [0, 0, 0, 1, 1, 2], [0], [0]>} : vector<4x8x128xf32>, vector<4x128x256xf32>, vector<4x8x256xf32> -> vector<4x8x256xf32>
    %73 = arith.mulf %68, %63 : vector<4x1x256xf32>
    %cst_71 = arith.constant dense<0.000000e+00> : vector<4x256xf32>
    %74 = vector.multi_reduction <add>, %71, %cst_71 [1] : vector<4x128x256xf32> to vector<4x256xf32>
    %75 = vector.shape_cast %74 : vector<4x256xf32> to vector<4x1x256xf32>
    %76 = arith.addf %73, %75 : vector<4x1x256xf32>
    %c0_72 = arith.constant 0 : index
    %c0_73 = arith.constant 0 : index
    %c0_74 = arith.constant 0 : index
    %77 = vector.load %arg12[%c0_72, %c0_73, %c0_74] : memref<4x1x256xf32, #tpu.memory_space<vmem>>, vector<4x1x256xf32>
    tpu.vector_store %arg12[%c0_72, %c0_73, %c0_74], %76 {strides = array<i32>} : memref<4x1x256xf32, #tpu.memory_space<vmem>>, vector<4x1x256xf32>,
    %c0_75 = arith.constant 0 : index
    %c0_76 = arith.constant 0 : index
    %c0_77 = arith.constant 0 : index
    %78 = vector.load %arg13[%c0_75, %c0_76, %c0_77] : memref<4x8x256xf32, #tpu.memory_space<vmem>>, vector<4x8x256xf32>
    %79 = vector.broadcast %68 : vector<4x1x256xf32> to vector<4x8x256xf32>
    %80 = arith.mulf %79, %78 : vector<4x8x256xf32>
    %81 = arith.addf %80, %72 : vector<4x8x256xf32>
    %c0_78 = arith.constant 0 : index
    %c0_79 = arith.constant 0 : index
    %c0_80 = arith.constant 0 : index
    %82 = vector.load %arg13[%c0_78, %c0_79, %c0_80] : memref<4x8x256xf32, #tpu.memory_space<vmem>>, vector<4x8x256xf32>
    tpu.vector_store %arg13[%c0_78, %c0_79, %c0_80], %81 {strides = array<i32>} : memref<4x8x256xf32, #tpu.memory_space<vmem>>, vector<4x8x256xf32>,
    %c0_81 = arith.constant 0 : index
    %c0_82 = arith.constant 0 : index
    %c0_83 = arith.constant 0 : index
    %83 = vector.load %arg11[%c0_81, %c0_82, %c0_83] : memref<4x1x256xf32, #tpu.memory_space<vmem>>, vector<4x1x256xf32>
    tpu.vector_store %arg11[%c0_81, %c0_82, %c0_83], %66 {strides = array<i32>} : memref<4x1x256xf32, #tpu.memory_space<vmem>>, vector<4x1x256xf32>,
    %c2_i32 = arith.constant 2 : i32
    %c0_84 = arith.constant 0 : index
    %c0_85 = arith.constant 0 : index
    %c0_86 = arith.constant 0 : index
    %84 = vector.load %arg12[%c0_84, %c0_85, %c0_86] : memref<4x1x256xf32, #tpu.memory_space<vmem>>, vector<4x1x256xf32>
    %cst_87 = arith.constant 1.000000e+00 : f32
    %85 = vector.broadcast %cst_87 : f32 to vector<4x1x256xf32>
    %86 = arith.divf %85, %84 : vector<4x1x256xf32>
    %c0_88 = arith.constant 0 : index
    %c0_89 = arith.constant 0 : index
    %c0_90 = arith.constant 0 : index
    %87 = vector.load %arg13[%c0_88, %c0_89, %c0_90] : memref<4x8x256xf32, #tpu.memory_space<vmem>>, vector<4x8x256xf32>
    %88 = vector.broadcast %86 : vector<4x1x256xf32> to vector<4x8x256xf32>
    %89 = arith.mulf %87, %88 : vector<4x8x256xf32>
    %90 = vector.shape_cast %89 : vector<4x8x256xf32> to vector<32x256xf32>
    %c0_91 = arith.constant 0 : index
    %c0_92 = arith.constant 0 : index
    %91 = vector.load %arg5[%c0_91, %c0_92] : memref<32x32xf32, #tpu.memory_space<vmem>>, vector<32x32xf32>
    %cst_93 = arith.constant dense<0.000000e+00> : vector<32x256xf32>
    %92 = tpu.matmul %91, %90, %cst_93 {dimension_numbers = #tpu.dot_dimension_numbers<[1], [0], [0], [1], [0, 0, 1, 1], [], []>} : vector<32x32xf32>, vector<32x256xf32>, vector<32x256xf32> -> vector<32x256xf32>
    %c0_94 = arith.constant 0 : index
    %c0_95 = arith.constant 0 : index
    %93 = vector.load %arg6[%c0_94, %c0_95] : memref<32x1xf32, #tpu.memory_space<vmem>>, vector<32x1xf32>
    %94 = vector.broadcast %93 : vector<32x1xf32> to vector<32x256xf32>
    %95 = arith.addf %92, %94 : vector<32x256xf32>
    %c0_96 = arith.constant 0 : index
    %c0_97 = arith.constant 0 : index
    %c0_98 = arith.constant 0 : index
    %96 = vector.load %arg7[%c0_96, %c0_97, %c0_98] : memref<1x32x256xf32, #tpu.memory_space<vmem>>, vector<1x32x256xf32>
    %97 = vector.shape_cast %96 : vector<1x32x256xf32> to vector<32x256xf32>
    %98 = vector.shape_cast %95 : vector<32x256xf32> to vector<1x32x256xf32>
    tpu.vector_store %arg7[%c0_96, %c0_97, %c0_98], %98 {strides = array<i32>} : memref<1x32x256xf32, #tpu.memory_space<vmem>>, vector<1x32x256xf32>,
    return
  }
  func.func @transform_0(%arg0: i32) -> (i32, i32, i32) {
    %c0_i32 = arith.constant 0 : i32
    %c0_i32_0 = arith.constant 0 : i32
    %c0_i32_1 = arith.constant 0 : i32
    return %arg0, %c0_i32, %c0_i32_0 : i32, i32, i32
  }
  func.func @transform_1(%arg0: i32) -> (i32, i32, i32) {
    %c0_i32 = arith.constant 0 : i32
    %c0_i32_0 = arith.constant 0 : i32
    %c0_i32_1 = arith.constant 0 : i32
    return %arg0, %c0_i32, %c0_i32_0 : i32, i32, i32
  }
  func.func @transform_2(%arg0: i32) -> (i32, i32) {
    %c0_i32 = arith.constant 0 : i32
    %c0_i32_0 = arith.constant 0 : i32
    %c0_i32_1 = arith.constant 0 : i32
    return %c0_i32, %c0_i32_0 : i32, i32
  }
  func.func @transform_3(%arg0: i32) -> (i32, i32) {
    %c0_i32 = arith.constant 0 : i32
    %c0_i32_0 = arith.constant 0 : i32
    %c0_i32_1 = arith.constant 0 : i32
    return %c0_i32, %c0_i32_0 : i32, i32
  }
  func.func @transform_4(%arg0: i32) -> (i32, i32) {
    %c0_i32 = arith.constant 0 : i32
    %c0_i32_0 = arith.constant 0 : i32
    %c0_i32_1 = arith.constant 0 : i32
    return %c0_i32, %c0_i32_0 : i32, i32
  }
  func.func @transform_5(%arg0: i32) -> (i32, i32) {
    %c0_i32 = arith.constant 0 : i32
    %c0_i32_0 = arith.constant 0 : i32
    %c0_i32_1 = arith.constant 0 : i32
    return %c0_i32, %c0_i32_0 : i32, i32
  }
  func.func @transform_6(%arg0: i32) -> (i32, i32, i32) {
    %c0_i32 = arith.constant 0 : i32
    %c0_i32_0 = arith.constant 0 : i32
    %c0_i32_1 = arith.constant 0 : i32
    return %arg0, %c0_i32, %c0_i32_0 : i32, i32, i32
  }
}

</mosaic_0001>

<bundles_post_ra>
// kernel: tpu_custom_call.1
= control target key start
LH: loop header
LB: loop body
LE: loop exit
PB: predicated region body
PF: predicated region fallthrough
CT: control target
= control target key end

     0   :  { %11 = vsyncpa [#allocation9], 0  ;;  %s10100_s0 = inlined_call_operand.vmem [shape: f32[2,32,256], index: 0, kind: input, shape index: {}]   ;;  %s10101_s1 = inlined_call_operand.hbm [shape: f32[2,32,256], index: 1, kind: input, shape index: {}]   ;;  %s10102_s2 = inlined_call_operand.hbm [shape: f32[32,32], index: 2, kind: input, shape index: {}]   ;;  %s10103_s3 = inlined_call_operand.vmem [shape: f32[64,32], index: 3, kind: input, shape index: {}]   ;;  %s10104_s4 = inlined_call_operand.hbm [shape: f32[32,32], index: 4, kind: input, shape index: {}]   ;;  %s10105_s5 = inlined_call_operand.vmem [shape: f32[32,1], index: 5, kind: input, shape index: {}]   ;;  %s10106_s6 = inlined_call_operand.hbm [shape: f32[2,32,256], index: 6, kind: output, shape index: {}]  }
   0x1   :  { %13 = vsyncpa [#allocation9 + $0x1], 0 }
   0x2   :  { %14 = vsyncpa [#allocation12], 0 }
   0x3   :  { %15 = vsyncpa [#allocation10], 0 }
   0x4   :  { %17 = vsyncpa [#allocation10 + $0x1], 0  ;;  %s6517_s21 = smov 0   ;;  %s6519_s22 = smov 0  }
   0x5   :  { %s6521_s23 = smov 0   ;;  %s6523_s24 = smov 0  }
   0x6 LB: > { %s6538_s25 = sadd.s32 4294967295, %s6466_s24   ;;  %s5536_s26 = sadd.s32 4294967294, %s6466_s24   ;;  %s6466_s24 = sphi %s6523_s24, %s11040_s24   ;;  %s6462_s23 = sphi %s6521_s23, %s11039_s23   ;;  %s6458_s22 = sphi %s6519_s22, %s11038_s22   ;;  %s6454_s21 = sphi %s6517_s21, %s11037_s21  }
   0x7   : > { %p69_p0 = scmp.ne.s32.totalorder %s6458_s22, %s6454_s21  ;;  %p10107_p1 = scmp.eq.s32.totalorder %s6538_s25, 0 }
   0x8   : > { %p183_p3 = scmp.eq.s32.totalorder %s5536_s26, 1  ;;  %p5537_p5 = scmp.ge.s32.totalorder %s6466_s24, 1 }
   0x9   : > { %p6547_p4 = por %p10107_p1, %p69_p0  ;;  %p190_p7 = scmp.lt.s32.totalorder %s6466_s24, 3 }
   0xa   : > { %p6552_p6 = por %p183_p3, %p69_p0  ;;  %s6468_s30 = smov [#allocation11]  }
   0xb   : > { %s10418_s27 = scalar_select %p6547_p4, 1, 0 }
   0xc   : > { %s10419_s28 = scalar_select %p6552_p6, 1, 0 }
   0xd   : > { %p6557_p8 = pnand %p5537_p5, %p190_p7  ;;  %s202_s7 = sshll.u32 %s6468_s30, 4  ;;  %s203_s7 = int_to_ptr.vmem [resolvable:$true] %s202_s7 }
   0xe   : > { %s6469_s9 = smov [#allocation13]   ;;  %s6329_s11 = scalar_lea.vmem %s203_s7, 512 }
   0xf   : > { %s10420_s29 = scalar_select %p6557_p8, 1, 0 }
  0x10   : > { %p5715_p9 = pneg %p6557_p8  ;;  %s218_s10 = sshll.u32 %s6469_s9, 4  ;;  %s219_s10 = int_to_ptr.vmem [resolvable:$true] %s218_s10 }
  0x11   : > { %p6330_p13 = scmp.ne.s32.totalorder %s203_s7, %s6329_s11  ;;  %p6337_p5 = scmp.lt.s32.totalorder %s203_s7, %s203_s7 }
  0x12   : > { %p6566_p11 = pnand %p5715_p9, %p10107_p1  ;;  %p6338_p7 = scmp.lt.s32.totalorder %s6329_s11, %s6329_s11 }
  0x14   : > { %p6320_p12 = pneg %p6566_p11  ;;  %p6339_p10 = por %p6338_p7, %p6337_p5 }
  0x16   : > { %p6332_p0 = pnand %p6330_p13, %p6320_p12 }
  0x18   : > { %p6333_p3 = pneg %p6332_p0 }
  0x1a   : > { %p6340_p9 = pnand %p6339_p10, %p6333_p3 }
  0x1c   : > { %6343 = shalt.err (!%p6340_p9)
}
  0x1d   : > { %s6470_s12 = smov 128   ;;  %s6471_s13 = smov 8  }
  0x1e   : > { %5718 = dma.hbm_to_vmem [thread:$0]  (!%p6566_p11), %s10102_s2, 512, %s203_s7, [#allocation12], %s6470_s12, %s6470_s12, %s6471_s13  }
  0x1f   : > { %s6355_s16 = scalar_lea.vmem %s219_s10, 512  ;;  %p6363_p2 = scmp.lt.s32.totalorder %s219_s10, %s219_s10 }
  0x20   : > { %p6356_p1 = scmp.ne.s32.totalorder %s219_s10, %s6355_s16  ;;  %p6364_p6 = scmp.lt.s32.totalorder %s6355_s16, %s6355_s16 }
  0x22   : > { %p6358_p13 = pnand %p6356_p1, %p6320_p12  ;;  %p6365_p5 = por %p6364_p6, %p6363_p2 }
  0x24   : > { %p6359_p0 = pneg %p6358_p13 }
  0x26   : > { %p6366_p10 = pnand %p6365_p5, %p6359_p0 }
  0x28   : > { %6369 = shalt.err (!%p6366_p10)
}
  0x29   : > { %5721 = dma.hbm_to_vmem [thread:$0]  (!%p6566_p11), %s10104_s4, 512, %s219_s10, [#allocation12], %s6470_s12, %s6470_s12, %s6471_s13  }
  0x2a   : > { %s6589_s19 = sadd.s32 1, %s6466_s24   ;;  %s56_s20 = sadd.s32 1, %s6462_s23 }
  0x2b   : > { %s53_s26 = ssub.s32 %s6466_s24, %s6589_s19  ;;  %p63_p1 = scmp.ne.s32.totalorder %s6462_s23, %s6458_s22 }
  0x2c   : > { %p54_p2 = scmp.eq.s32.totalorder %s53_s26, 0  ;;  %p64_p6 = scmp.eq.s32.totalorder %s6466_s24, 0 }
  0x2d   : > { %p10422_p12 = scmp.eq.s32.totalorder %s6538_s25, 1  ;;  %p5732_p7 = scmp.lt.s32.totalorder %s6466_s24, 2 }
  0x2e   : > { %s6605_s7 = scalar_select %p54_p2, %s6462_s23, %s56_s20  }
  0x2f   : > { %p6599_p3 = por %p10422_p12, %p63_p1  ;;  %p65_p9 = por %p64_p6, %p63_p1 }
  0x30   : > { %s243_s8 = sand.u32 1, %s6462_s23   ;;  %s5700_s10 = sshll.u32 %s6466_s24, 10 }
  0x31   : > { %s10423_s30 = scalar_select %p6599_p3, 1, 0 }
  0x32   : > { %s5541_s9 = sshll.u32 %s243_s8, 6  ;;  %s6612_s13 = scalar_lea.hbm %s10101_s1, %s5700_s10 }
  0x33   : > { %s247_s14 = scalar_lea.vmem [#allocation8], %s5541_s9  ;;  %p6616_p11 = pnand %p5732_p7, %p65_p9 }
  0x34   : > { %s254_s15 = sshll.u32 %s247_s14, 4  ;;  %s6620_s17 = scalar_lea.sflag [#allocation9], %s243_s8  ;;  %s6614_s15 = int_to_ptr.vmem [resolvable:$true] %s254_s15 }
  0x35   : > { %s6370_s18 = scalar_lea.hbm %s6612_s13, 1024  ;;  %p6372_p0 = pneg %p6616_p11 }
  0x36   : > { %p6371_p13 = scmp.ne.s32.totalorder %s6612_s13, %s6370_s18  ;;  %s6375_s9 = scalar_lea.hbm %s10101_s1, 2048 }
  0x37   : > { %p6376_p1 = scmp.lt.s32.totalorder %s6612_s13, %s10101_s1  ;;  %p6377_p2 = scmp.lt.s32.totalorder %s6375_s9, %s6370_s18 }
  0x38   : > { %p6373_p5 = pnand %p6372_p0, %p6371_p13 }
  0x39   : > { %p6378_p6 = por %p6377_p2, %p6376_p1 }
  0x3a   : > { %p6374_p10 = pneg %p6373_p5 }
  0x3c   : > { %p6379_p12 = pnand %p6378_p6, %p6374_p10 }
  0x3e   : > { %6382 = shalt.err (!%p6379_p12)
}
  0x3f   : > { %s6383_s8 = scalar_lea.vmem %s6614_s15, 1024  ;;  %s6472_s12 = smov [#allocation8]  }
  0x40   : > { %p6384_p7 = scmp.ne.s32.totalorder %s6614_s15, %s6383_s8  ;;  %s6388_s14 = sshll.u32 %s6472_s12, 4  ;;  %s6389_s14 = int_to_ptr.vmem [resolvable:$false] %s6388_s14 }
  0x41   : > { %s6390_s20 = scalar_lea.vmem %s6389_s14, 2048  ;;  %p6391_p5 = scmp.lt.s32.totalorder %s6614_s15, %s6389_s14 }
  0x42   : > { %p6386_p9 = pnand %p6384_p7, %p6372_p0  ;;  %p6392_p3 = scmp.lt.s32.totalorder %s6390_s20, %s6383_s8 }
  0x44   : > { %p6387_p13 = pneg %p6386_p9  ;;  %p6393_p4 = por %p6392_p3, %p6391_p5 }
  0x46   : > { %p6394_p8 = pnand %p6393_p4, %p6387_p13 }
  0x48   : > { %6397 = shalt.err (!%p6394_p8)
}
  0x49   : > { %s6473_s18 = smov 256   ;;  %s6474_s26 = smov 16  }
  0x4a   : > { %5725 = dma.hbm_to_vmem [thread:$0]  (!%p6616_p11), %s6612_s13, 1024, %s6614_s15, %s6620_s17, %s6473_s18, %s6473_s18, %s6474_s26  }
  0x4b   : > { %p10425_p0 = scmp.ne.s32.totalorder %s10420_s29, 0 }
  0x4d   : > { %266 = sbr.rel (%p10425_p0) target bundleno = 1854 (0x73e), region = 44 }
  0x52   : > { %s6644_s9 = sand.u32 1, %s6458_s22   ;;  %p10426_p4 = scmp.ne.s32.totalorder %s10418_s27, 0 }
  0x53   : > { %s5545_s10 = sshll.u32 %s6644_s9, 6  ;;  %s269_s11 = scalar_lea.sflag [#allocation9], %s6644_s9 }
  0x54   : > { %s272_s8 = scalar_lea.vmem [#allocation8], %s5545_s10 }
  0x55   : > { %6441 = dma.done.wait (%p10426_p4), %s269_s11, 1024  }
  0x56   : > { %6443 = vsyncadd (%p10426_p4), %s269_s11, 4294966272  ;;  %p10427_p8 = scmp.eq.s32.totalorder %s6538_s25, 0 }
  0x58   : > { %6445 = dma.done.wait (%p10427_p8), [#allocation12], 1024   ;;  %p10428_p3 = pmov %p10427_p8 }
  0x59   : > { %p314_p11 = scmp.lt.s32.totalorder %s6538_s25, 1  ;;  %v10111_v0 = vmov 0.0   ;;  %v334_v1 = vld [vmem:[%s272_s8 + $0x38] sm:$0xff]  ;;  %v333_v2 = vld [vmem:[%s272_s8 + $0x30] sm:$0xff]  ;;  %v332_v3 = vld [vmem:[%s272_s8 + $0x28] sm:$0xff]  ;;  %vm339_vm0 = vcmask 261120  }
  0x5a   : > { %6447 = vsyncadd (%p10428_p3), [#allocation12], 4294966272  ;;  %537 = vmatprep.mubr.f32.mxu1 %v10111_v0  ;;  %416 = vmatprep.mubr.f32.mxu0 %v10111_v0  ;;  %v331_v4 = vld [vmem:[%s272_s8 + $0x20] sm:$0xff]  ;;  %v330_v5 = vld [vmem:[%s272_s8 + $0x18] sm:$0xff]  ;;  %vm678_vm1 = vcmask 64512   ;;  %s313_s15 = scalar_lea.vmem [#allocation14], %s5545_s10 }
  0x5b   : > { %s315_s29 = scalar_select %p314_p11, %s6538_s25, 1  ;;  %497 = vmatprep.subr.mxu1 %v334_v1  ;;  %v329_v6 = vld [vmem:[%s272_s8 + $0x10] sm:$0xff]  ;;  %v328_v7 = vld [vmem:[%s272_s8 + $0x8] sm:$0xff]  ;;  %v327_v11 = vld [vmem:[%s272_s8] sm:$0xff] }
  0x5c   : > { %498 = vmatpush1.msra.mxu1 %v333_v2  ;;  %v441_v13 = vld [vmem:[%s10103_s3] sm:$0xff]  ;;  %v442_v18 = vld [vmem:[%s10103_s3 + $0x8] sm:$0xff]  ;;  %v335_v19 = vld [vmem:[#allocation11] sm:$0xff]  ;;  %s5702_s10 = sshll.u32 %s6538_s25, 10  ;;  %s5419_s20 = scalar_lea.sflag [#allocation10], %s6644_s9 }
  0x5d   : > { %s5701_s13 = sshll.u32 %s315_s29, 6  ;;  %499 = vmatprep.subr.mxu1 %v332_v3  ;;  %v443_v20 = vld [vmem:[%s10103_s3 + $0x10] sm:$0xff]  ;;  %v336_v21 = vld [vmem:[#allocation11 + $0x8] sm:$0xff]  ;;  %v337_v23 = vld [vmem:[#allocation11 + $0x10] sm:$0xff]  ;;  %s10057_s14 = scalar_lea.hbm %s10106_s6, %s5702_s10 }
  0x5e   : > { %s318_s16 = scalar_lea.vmem %s10100_s0, %s5701_s13  ;;  %500 = vmatpush1.msra.mxu1 %v331_v4  ;;  %v444_v22 = vld [vmem:[%s10103_s3 + $0x18] sm:$0xff]  ;;  %v338_v24 = vld [vmem:[#allocation11 + $0x18] sm:$0xff]  ;;  %v445_v25 = vld [vmem:[%s10103_s3 + $0x20] sm:$0xff]  ;;  %p11034_p1 = scmp.ne.s32.totalorder %s10423_s30, 0 }
  0x5f   : > { %v326_v8 = vld [vmem:[%s318_s16 + $0x38] sm:$0xff]  ;;  %v325_v9 = vld [vmem:[%s318_s16 + $0x30] sm:$0xff]  ;;  %v324_v10 = vld [vmem:[%s318_s16 + $0x28] sm:$0xff]  ;;  %501 = vmatprep.subr.mxu1 %v330_v5  ;;  %s6479_s18 = smov [#allocation14]  }
  0x60   : > { %376 = vmatprep.subr.mxu0 %v326_v8  ;;  %v323_v12 = vld [vmem:[%s318_s16 + $0x20] sm:$0xff]  ;;  %502 = vmatpush1.msra.mxu1 %v329_v6  ;;  %v322_v14 = vld [vmem:[%s318_s16 + $0x18] sm:$0xff]  ;;  %v321_v15 = vld [vmem:[%s318_s16 + $0x10] sm:$0xff]  ;;  %s6402_s26 = sshll.u32 %s6479_s18, 4  ;;  %s6403_s26 = int_to_ptr.vmem [resolvable:$false] %s6402_s26 }
  0x61   : > { %377 = vmatpush1.msra.mxu0 %v325_v9  ;;  %503 = vmatprep.subr.mxu1 %v328_v7  ;;  %v320_v16 = vld [vmem:[%s318_s16 + $0x8] sm:$0xff]  ;;  %v319_v17 = vld [vmem:[%s318_s16] sm:$0xff]  ;;  %v447_v27 = vld [vmem:[%s10103_s3 + $0x30] sm:$0xff]  ;;  %s5432_s16 = sshll.u32 %s313_s15, 4  ;;  %s6404_s11 = scalar_lea.vmem %s6403_s26, 2048  ;;  %s10052_s16 = int_to_ptr.vmem [resolvable:$true] %s5432_s16 }
  0x62   : > { %378 = vmatprep.subr.mxu0 %v324_v10  ;;  %504 = vmatpush1.msra.mxu1 %v327_v11  ;;  %v446_v26 = vld [vmem:[%s10103_s3 + $0x28] sm:$0xff]  ;;  %v448_v28 = vld [vmem:[%s10103_s3 + $0x38] sm:$0xff]  ;;  %s6398_s25 = scalar_lea.vmem %s10052_s16, 1024  ;;  %p6405_p12 = scmp.lt.s32.totalorder %s10052_s16, %s6403_s26 }
  0x63   : > { %379 = vmatpush1.msra.mxu0 %v323_v12  ;;  %5555 = vmatmul.mubr.msk.f32.vlgmr.msra.gmra.mxu1 %vm339_vm0, %v441_v13  ;;  %p6399_p10 = scmp.ne.s32.totalorder %s10052_s16, %s6398_s25  ;;  %p6406_p7 = scmp.lt.s32.totalorder %s6404_s11, %s6398_s25 }
  0x64   : > { %380 = vmatprep.subr.mxu0 %v322_v14  ;;  %543 = vmatprep.mubr.f32.mxu1 %v10111_v0 }
  0x65   : > { %381 = vmatpush1.msra.mxu0 %v321_v15  ;;  %p6400_p2 = pnand %p6399_p10, %p11034_p1  ;;  %p6407_p9 = por %p6406_p7, %p6405_p12 }
  0x66   : > { %382 = vmatprep.subr.mxu0 %v320_v16 }
  0x67   : > { %383 = vmatpush1.msra.mxu0 %v319_v17  ;;  %5556 = vmatmul.mubr.msk.f32.gmra.mxu1 %vm339_vm0, %v442_v18  ;;  %p6401_p6 = pneg %p6400_p2 }
  0x68   : > { %5551 = vmatmul.mubr.msk.f32.vlgmr.msra.gmra.mxu0 %vm339_vm0, %v335_v19  ;;  %549 = vmatprep.mubr.f32.mxu1 %v10111_v0 }
  0x69   : > { %422 = vmatprep.mubr.f32.mxu0 %v10111_v0  ;;  %p6408_p13 = pnand %p6407_p9, %p6401_p6 }
  0x6b   : > { %5557 = vmatmul.mubr.msk.f32.gmra.mxu1 %vm339_vm0, %v443_v20 }
  0x6c   : > { %5552 = vmatmul.mubr.msk.f32.gmra.mxu0 %vm339_vm0, %v336_v21  ;;  %555 = vmatprep.mubr.f32.mxu1 %v10111_v0 }
  0x6d   : > { %428 = vmatprep.mubr.f32.mxu0 %v10111_v0 }
  0x6f   : > { %5558 = vmatmul.mubr.msk.f32.gmra.mxu1 %vm339_vm0, %v444_v22 }
  0x70   : > { %5553 = vmatmul.mubr.msk.f32.gmra.mxu0 %vm339_vm0, %v337_v23  ;;  %561 = vmatprep.mubr.f32.mxu1 %v10111_v0 }
  0x71   : > { %434 = vmatprep.mubr.f32.mxu0 %v10111_v0 }
  0x73   : > { %5559 = vmatmul.mubr.msk.f32.gmra.mxu1 %vm339_vm0, %v445_v25 }
  0x74   : > { %5554 = vmatmul.mubr.msk.f32.gmra.mxu0 %vm339_vm0, %v338_v24  ;;  %567 = vmatprep.mubr.f32.mxu1 %v10111_v0 }
  0x75   : > { %791 = vmatprep.mubr.f32.mxu0 %v10111_v0 }
  0x77   : > { %5560 = vmatmul.mubr.msk.f32.gmra.mxu1 %vm339_vm0, %v446_v26 }
  0x78   : > { %573 = vmatprep.mubr.f32.mxu1 %v10111_v0 }
  0x7b   : > { %5561 = vmatmul.mubr.msk.f32.gmra.mxu1 %vm339_vm0, %v447_v27 }
  0x7c   : > { %579 = vmatprep.mubr.f32.mxu1 %v10111_v0 }
  0x7f   : > { %5562 = vmatmul.mubr.msk.f32.gmra.mxu1 %vm339_vm0, %v448_v28 }
  0x80   : > { %1032 = vmatprep.mubr.f32.mxu1 %v10111_v0 }
 0x123   : > { %v539_v29 = vpop.f32.mrf.mxu1 }
 0x125   : > { %v541_v30 = vpop.f32.mrf.mxu1 }
 0x127   : > { %v545_v31 = vpop.f32.mrf.mxu1 }
 0x128   : > { %v6713_v32 = vpop.f32.mrf.mxu0  ;;  %888 = vxpose.xlu0.b32.start.end [1/1] (short) %v545_v31, 128 }
 0x129   : > { %10429 = vst [vmem:[#allocation18_spill] sm:$0xff] %v6713_v32  ;;  %v547_v33 = vpop.f32.mrf.mxu1 }
 0x12a   : > { %v6715_v34 = vpop.f32.mrf.mxu0 }
 0x12b   : > { %10430 = vst [vmem:[#allocation19_spill] sm:$0xff] %v6715_v34  ;;  %757 = vmatprep.subr.mxu0 %v6715_v34  ;;  %v551_v35 = vpop.f32.mrf.mxu1 }
 0x12c   : > { %v6718_v36 = vpop.f32.mrf.mxu0  ;;  %758 = vmatpush1.msra.mxu0 %v6713_v32 }
 0x12d   : > { %10431 = vst [vmem:[#allocation20_spill] sm:$0xff] %v6718_v36  ;;  %v6721_v37 = vpop.f32.mrf.mxu1 }
 0x12e   : > { %v6723_v38 = vpop.f32.mrf.mxu0 }
 0x12f   : > { %10432 = vst [vmem:[#allocation21_spill] sm:$0xff] %v6723_v38  ;;  %998 = vmatprep.subr.mxu1 %v6723_v38  ;;  %v557_v39 = vpop.f32.mrf.mxu1 }
 0x130   : > { %999 = vmatpush1.msra.mxu1 %v6718_v36  ;;  %1370 = vxpose.xlu1.b32.start.end [1/1] (short) %v557_v39, 128  ;;  %v6727_v40 = vpop.f32.mrf.mxu0 }
 0x131   : > { %10433 = vst [vmem:[#allocation22_spill] sm:$0xff] %v6727_v40  ;;  %v559_v9 = vpop.f32.mrf.mxu1 }
 0x132   : > { %v6729_v41 = vpop.f32.mrf.mxu0 }
 0x133   : > { %10434 = vst [vmem:[#allocation23_spill] sm:$0xff] %v6729_v41  ;;  %1239 = vmatprep.subr.mxu0 %v6729_v41  ;;  %v10456_v41 = vlaneseq }
 0x134   : > { %v6732_v42 = vpop.f32.mrf.mxu0 }
 0x135   : > { %10435 = vst [vmem:[#allocation24_spill] sm:$0xff] %v6732_v42  ;;  %v1800_v32 = vshrl.u32 %v10456_v41, 7 }
 0x136   : > { %v6734_v43 = vpop.f32.mrf.mxu0 }
 0x137   : > { %10436 = vst [vmem:[#allocation25_spill] sm:$0xff] %v6734_v43  ;;  %1480 = vmatprep.subr.mxu1 %v6734_v43 }
 0x165   : > { %646 = vxpose.xlu0.b32.start.end [1/1] (short) %v539_v29, 128 }
 0x16d   : > { %1129 = vxpose.xlu1.b32.start.end [1/1] (short) %v551_v35, 128 }
 0x1a2   : > { %3178 = vxpose.xlu0.b32.start.end [1/1] (short) %v547_v33, 128 }
 0x1a4   : > { %v904_v44 = vpop.trf.xlu0 }
 0x1a5   : > { %5579 = vmatmul.mubr.msk.f32.vlgmr.msra.gmra.mxu1 %vm678_vm1, %v904_v44 }
 0x1a6   : > { %1038 = vmatprep.mubr.f32.mxu1 %v10111_v0  ;;  %1481 = vmatpush1.msra.mxu1 %v6732_v42 }
 0x1a8   : > { %v905_v45 = vpop.trf.xlu0 }
 0x1a9   : > { %5580 = vmatmul.mubr.msk.f32.gmra.mxu1 %vm678_vm1, %v905_v45  ;;  %v10113_v45 = vlaneseq }
 0x1aa   : > { %2937 = vxpose.xlu1.b32.start.end [1/1] (short) %v541_v30, 128  ;;  %1044 = vmatprep.mubr.f32.mxu1 %v10111_v0 }
 0x1ab   : > { %vm6885_vm2 = vcmp.lt.s32.totalorder %v10113_v45, 256 }
 0x1ac   : > { %v906_v46 = vpop.trf.xlu0  ;;  %v1386_v47 = vpop.trf.xlu1  ;;  %619 = vst.msk [vmem:[#allocation6 + $0x2] sm:$0x3] %vm6885_vm2, %v10111_v0  ;;  %618 = vst.msk [vmem:[#allocation6] sm:$0x3] %vm6885_vm2, %v10111_v0 }
 0x1ad   : > { %5581 = vmatmul.mubr.msk.f32.gmra.mxu1 %vm678_vm1, %v906_v46  ;;  %620 = vst.msk [vmem:[#allocation6 + $0x4] sm:$0x3] %vm6885_vm2, %v10111_v0  ;;  %621 = vst.msk [vmem:[#allocation6 + $0x6] sm:$0x3] %vm6885_vm2, %v10111_v0 }
 0x1ae   : > { %1050 = vmatprep.mubr.f32.mxu1 %v10111_v0 }
 0x1b0   : > { %v907_v48 = vpop.trf.xlu0  ;;  %v6744_v49 = vpop.trf.xlu1 }
 0x1b1   : > { %5582 = vmatmul.mubr.msk.f32.gmra.mxu1 %vm678_vm1, %v907_v48  ;;  %v6476_v48 = vmov -inf  }
 0x1b2   : > { %1056 = vmatprep.mubr.f32.mxu1 %v10111_v0  ;;  %615 = vst.msk [vmem:[#allocation5 + $0x2] sm:$0x3] %vm6885_vm2, %v6476_v48  ;;  %614 = vst.msk [vmem:[#allocation5] sm:$0x3] %vm6885_vm2, %v6476_v48 }
 0x1b3   : > { %616 = vst.msk [vmem:[#allocation5 + $0x4] sm:$0x3] %vm6885_vm2, %v6476_v48  ;;  %617 = vst.msk [vmem:[#allocation5 + $0x6] sm:$0x3] %vm6885_vm2, %v6476_v48 }
 0x1b4   : > { %v908_v50 = vpop.trf.xlu0  ;;  %v6748_v51 = vpop.trf.xlu1 }
 0x1b5   : > { %5583 = vmatmul.mubr.msk.f32.gmra.mxu1 %vm678_vm1, %v908_v50 }
 0x1b6   : > { %1062 = vmatprep.mubr.f32.mxu1 %v10111_v0 }
 0x1b8   : > { %v909_v52 = vpop.trf.xlu0  ;;  %v6752_v53 = vpop.trf.xlu1 }
 0x1b9   : > { %5584 = vmatmul.mubr.msk.f32.gmra.mxu1 %vm678_vm1, %v909_v52  ;;  %v6920_v52 = vpop.f32.mrf.mxu1  ;;  %v7083_v38 = vld [vmem:[#allocation5 + $0x2] sm:$0x3] }
 0x1ba   : > { %1068 = vmatprep.mubr.f32.mxu1 %v10111_v0  ;;  %10440 = vst [vmem:[#allocation27_spill] sm:$0xff] %v6920_v52  ;;  %10466 = vst [vmem:[#allocation52_spill] sm:$0xff] %v7083_v38 }
 0x1bc   : > { %v910_v54 = vpop.trf.xlu0  ;;  %v6756_v55 = vpop.trf.xlu1 }
 0x1bd   : > { %5585 = vmatmul.mubr.msk.f32.gmra.mxu1 %vm678_vm1, %v910_v54  ;;  %v6924_v54 = vpop.f32.mrf.mxu1 }
 0x1be   : > { %1074 = vmatprep.mubr.f32.mxu1 %v10111_v0  ;;  %10441 = vst [vmem:[#allocation28_spill] sm:$0xff] %v6924_v54 }
 0x1c0   : > { %v911_v56 = vpop.trf.xlu0  ;;  %v6760_v57 = vpop.trf.xlu1 }
 0x1c1   : > { %5586 = vmatmul.mubr.msk.f32.gmra.mxu1 %vm678_vm1, %v911_v56  ;;  %v6928_v56 = vpop.f32.mrf.mxu1 }
 0x1c2   : > { %1080 = vmatprep.mubr.f32.mxu1 %v10111_v0  ;;  %10442 = vst [vmem:[#allocation29_spill] sm:$0xff] %v6928_v56 }
 0x1c4   : > { %v912_v58 = vpop.trf.xlu0  ;;  %v6764_v59 = vpop.trf.xlu1 }
 0x1c5   : > { %5587 = vmatmul.mubr.msk.f32.gmra.mxu1 %vm678_vm1, %v912_v58 }
 0x1c6   : > { %1086 = vmatprep.mubr.f32.mxu1 %v10111_v0 }
 0x1c8   : > { %v913_v60 = vpop.trf.xlu0  ;;  %v6768_v61 = vpop.trf.xlu1 }
 0x1c9   : > { %5588 = vmatmul.mubr.msk.f32.gmra.mxu1 %vm678_vm1, %v913_v60 }
 0x1ca   : > { %1092 = vmatprep.mubr.f32.mxu1 %v10111_v0 }
 0x1cc   : > { %v914_v62 = vpop.trf.xlu0  ;;  %v6772_v63 = vpop.trf.xlu1 }
 0x1cd   : > { %5589 = vmatmul.mubr.msk.f32.gmra.mxu1 %vm678_vm1, %v914_v62 }
 0x1ce   : > { %1098 = vmatprep.mubr.f32.mxu1 %v10111_v0 }
 0x1d0   : > { %v915_v1 = vpop.trf.xlu0  ;;  %v6776_v2 = vpop.trf.xlu1 }
 0x1d1   : > { %5590 = vmatmul.mubr.msk.f32.gmra.mxu1 %vm678_vm1, %v915_v1 }
 0x1d2   : > { %1104 = vmatprep.mubr.f32.mxu1 %v10111_v0 }
 0x1d4   : > { %v916_v3 = vpop.trf.xlu0  ;;  %v6780_v4 = vpop.trf.xlu1 }
 0x1d5   : > { %5591 = vmatmul.mubr.msk.f32.gmra.mxu1 %vm678_vm1, %v916_v3 }
 0x1d6   : > { %1110 = vmatprep.mubr.f32.mxu1 %v10111_v0 }
 0x1d8   : > { %v917_v5 = vpop.trf.xlu0  ;;  %v6784_v6 = vpop.trf.xlu1 }
 0x1d9   : > { %5592 = vmatmul.mubr.msk.f32.gmra.mxu1 %vm678_vm1, %v917_v5 }
 0x1da   : > { %1116 = vmatprep.mubr.f32.mxu1 %v10111_v0 }
 0x1dc   : > { %v918_v7 = vpop.trf.xlu0  ;;  %v6788_v8 = vpop.trf.xlu1 }
 0x1dd   : > { %5593 = vmatmul.mubr.msk.f32.gmra.mxu1 %vm678_vm1, %v918_v7 }
 0x1de   : > { %1122 = vmatprep.mubr.f32.mxu1 %v10111_v0 }
 0x1df   : > { %3660 = vxpose.xlu0.b32.start.end [1/1] (short) %v559_v9, 128 }
 0x1e0   : > { %v919_v10 = vpop.trf.xlu0  ;;  %v6792_v11 = vpop.trf.xlu1 }
 0x1e1   : > { %5594 = vmatmul.mubr.msk.f32.gmra.mxu1 %vm678_vm1, %v919_v10 }
 0x1e2   : > { %1514 = vmatprep.mubr.f32.mxu1 %v10111_v0 }
 0x1e4   : > { %v662_v12 = vpop.trf.xlu0  ;;  %v6798_v13 = vpop.trf.xlu1 }
 0x1e5   : > { %5563 = vmatmul.mubr.msk.f32.vlgmr.msra.gmra.mxu0 %vm678_vm1, %v662_v12  ;;  %5611 = vmatmul.mubr.msk.f32.vlgmr.msra.gmra.mxu1 %vm678_vm1, %v1386_v47  ;;  %v10437_v47 = vmov 0 }
 0x1e6   : > { %1240 = vmatpush1.msra.mxu0 %v6727_v40  ;;  %797 = vmatprep.mubr.f32.mxu0 %v10111_v0  ;;  %v10438_v47 = vsel %vm6885_vm2, 4294967295, %v10437_v47 }
 0x1e7   : > { %3419 = vxpose.xlu1.b32.start.end [1/1] (short) %v6721_v37, 128  ;;  %1520 = vmatprep.mubr.f32.mxu1 %v10111_v0  ;;  %10439 = vst [vmem:[#allocation26_spill] sm:$0xff] %v10438_v47 }
 0x1e8   : > { %v663_v14 = vpop.trf.xlu0  ;;  %v1401_v20 = vpop.trf.xlu1 }
 0x1e9   : > { %5564 = vmatmul.mubr.msk.f32.gmra.mxu0 %vm678_vm1, %v663_v14  ;;  %5612 = vmatmul.mubr.msk.f32.gmra.mxu1 %vm678_vm1, %v6744_v49 }
 0x1ea   : > { %803 = vmatprep.mubr.f32.mxu0 %v10111_v0  ;;  %1526 = vmatprep.mubr.f32.mxu1 %v10111_v0 }
 0x1ec   : > { %v664_v15 = vpop.trf.xlu0  ;;  %v1145_v23 = vpop.trf.xlu1 }
 0x1ed   : > { %5565 = vmatmul.mubr.msk.f32.gmra.mxu0 %vm678_vm1, %v664_v15  ;;  %5613 = vmatmul.mubr.msk.f32.gmra.mxu1 %vm678_vm1, %v6748_v51 }
 0x1ee   : > { %809 = vmatprep.mubr.f32.mxu0 %v10111_v0  ;;  %1532 = vmatprep.mubr.f32.mxu1 %v10111_v0 }
 0x1f0   : > { %v665_v16 = vpop.trf.xlu0  ;;  %v1146_v25 = vpop.trf.xlu1 }
 0x1f1   : > { %5566 = vmatmul.mubr.msk.f32.gmra.mxu0 %vm678_vm1, %v665_v16  ;;  %5614 = vmatmul.mubr.msk.f32.gmra.mxu1 %vm678_vm1, %v6752_v53 }
 0x1f2   : > { %815 = vmatprep.mubr.f32.mxu0 %v10111_v0  ;;  %1538 = vmatprep.mubr.f32.mxu1 %v10111_v0 }
 0x1f4   : > { %v666_v17 = vpop.trf.xlu0  ;;  %v1147_v28 = vpop.trf.xlu1 }
 0x1f5   : > { %5567 = vmatmul.mubr.msk.f32.gmra.mxu0 %vm678_vm1, %v666_v17  ;;  %5615 = vmatmul.mubr.msk.f32.gmra.mxu1 %vm678_vm1, %v6756_v55 }
 0x1f6   : > { %821 = vmatprep.mubr.f32.mxu0 %v10111_v0  ;;  %1544 = vmatprep.mubr.f32.mxu1 %v10111_v0 }
 0x1f8   : > { %v667_v18 = vpop.trf.xlu0  ;;  %v1148_v30 = vpop.trf.xlu1 }
 0x1f9   : > { %5568 = vmatmul.mubr.msk.f32.gmra.mxu0 %vm678_vm1, %v667_v18  ;;  %5616 = vmatmul.mubr.msk.f32.gmra.mxu1 %vm678_vm1, %v6760_v57  ;;  %v6932_v57 = vpop.f32.mrf.mxu1 }
 0x1fa   : > { %827 = vmatprep.mubr.f32.mxu0 %v10111_v0  ;;  %1550 = vmatprep.mubr.f32.mxu1 %v10111_v0  ;;  %10443 = vst [vmem:[#allocation30_spill] sm:$0xff] %v6932_v57 }
 0x1fc   : > { %v668_v19 = vpop.trf.xlu0  ;;  %v1149_v35 = vpop.trf.xlu1 }
 0x1fd   : > { %5569 = vmatmul.mubr.msk.f32.gmra.mxu0 %vm678_vm1, %v668_v19  ;;  %5617 = vmatmul.mubr.msk.f32.gmra.mxu1 %vm678_vm1, %v6764_v59  ;;  %v6936_v59 = vpop.f32.mrf.mxu1 }
 0x1fe   : > { %833 = vmatprep.mubr.f32.mxu0 %v10111_v0  ;;  %1556 = vmatprep.mubr.f32.mxu1 %v10111_v0  ;;  %10444 = vst [vmem:[#allocation31_spill] sm:$0xff] %v6936_v59 }
 0x200   : > { %v669_v21 = vpop.trf.xlu0  ;;  %v1150_v39 = vpop.trf.xlu1 }
 0x201   : > { %5570 = vmatmul.mubr.msk.f32.gmra.mxu0 %vm678_vm1, %v669_v21  ;;  %5618 = vmatmul.mubr.msk.f32.gmra.mxu1 %vm678_vm1, %v6768_v61  ;;  %v6940_v61 = vpop.f32.mrf.mxu1 }
 0x202   : > { %839 = vmatprep.mubr.f32.mxu0 %v10111_v0  ;;  %1562 = vmatprep.mubr.f32.mxu1 %v10111_v0  ;;  %10445 = vst [vmem:[#allocation32_spill] sm:$0xff] %v6940_v61 }
 0x203   : > { %v6944_v62 = vpop.f32.mrf.mxu1 }
 0x204   : > { %v670_v22 = vpop.trf.xlu0  ;;  %v1151_v44 = vpop.trf.xlu1  ;;  %10446 = vst [vmem:[#allocation33_spill] sm:$0xff] %v6944_v62 }
 0x205   : > { %5571 = vmatmul.mubr.msk.f32.gmra.mxu0 %vm678_vm1, %v670_v22  ;;  %5619 = vmatmul.mubr.msk.f32.gmra.mxu1 %vm678_vm1, %v6772_v63  ;;  %v6948_v1 = vpop.f32.mrf.mxu1 }
 0x206   : > { %845 = vmatprep.mubr.f32.mxu0 %v10111_v0  ;;  %1568 = vmatprep.mubr.f32.mxu1 %v10111_v0  ;;  %10447 = vst [vmem:[#allocation34_spill] sm:$0xff] %v6948_v1 }
 0x208   : > { %v671_v24 = vpop.trf.xlu0  ;;  %v1152_v46 = vpop.trf.xlu1 }
 0x209   : > { %5572 = vmatmul.mubr.msk.f32.gmra.mxu0 %vm678_vm1, %v671_v24  ;;  %5620 = vmatmul.mubr.msk.f32.gmra.mxu1 %vm678_vm1, %v6776_v2 }
 0x20a   : > { %851 = vmatprep.mubr.f32.mxu0 %v10111_v0  ;;  %1574 = vmatprep.mubr.f32.mxu1 %v10111_v0 }
 0x20c   : > { %v672_v26 = vpop.trf.xlu0  ;;  %v1153_v49 = vpop.trf.xlu1 }
 0x20d   : > { %5573 = vmatmul.mubr.msk.f32.gmra.mxu0 %vm678_vm1, %v672_v26  ;;  %5621 = vmatmul.mubr.msk.f32.gmra.mxu1 %vm678_vm1, %v6780_v4 }
 0x20e   : > { %857 = vmatprep.mubr.f32.mxu0 %v10111_v0  ;;  %1580 = vmatprep.mubr.f32.mxu1 %v10111_v0 }
 0x210   : > { %v673_v27 = vpop.trf.xlu0  ;;  %v1154_v50 = vpop.trf.xlu1 }
 0x211   : > { %5574 = vmatmul.mubr.msk.f32.gmra.mxu0 %vm678_vm1, %v673_v27  ;;  %5622 = vmatmul.mubr.msk.f32.gmra.mxu1 %vm678_vm1, %v6784_v6 }
 0x212   : > { %863 = vmatprep.mubr.f32.mxu0 %v10111_v0  ;;  %1586 = vmatprep.mubr.f32.mxu1 %v10111_v0 }
 0x214   : > { %v674_v29 = vpop.trf.xlu0  ;;  %v1155_v51 = vpop.trf.xlu1 }
 0x215   : > { %5575 = vmatmul.mubr.msk.f32.gmra.mxu0 %vm678_vm1, %v674_v29  ;;  %5623 = vmatmul.mubr.msk.f32.gmra.mxu1 %vm678_vm1, %v6788_v8 }
 0x216   : > { %869 = vmatprep.mubr.f32.mxu0 %v10111_v0  ;;  %1592 = vmatprep.mubr.f32.mxu1 %v10111_v0 }
 0x218   : > { %v675_v31 = vpop.trf.xlu0  ;;  %v1156_v53 = vpop.trf.xlu1 }
 0x219   : > { %5576 = vmatmul.mubr.msk.f32.gmra.mxu0 %vm678_vm1, %v675_v31  ;;  %5624 = vmatmul.mubr.msk.f32.gmra.mxu1 %vm678_vm1, %v6792_v11 }
 0x21a   : > { %875 = vmatprep.mubr.f32.mxu0 %v10111_v0  ;;  %1598 = vmatprep.mubr.f32.mxu1 %v10111_v0 }
 0x21c   : > { %v676_v33 = vpop.trf.xlu0  ;;  %v1157_v55 = vpop.trf.xlu1 }
 0x21d   : > { %5577 = vmatmul.mubr.msk.f32.gmra.mxu0 %vm678_vm1, %v676_v33  ;;  %5625 = vmatmul.mubr.msk.f32.gmra.mxu1 %vm678_vm1, %v6798_v13 }
 0x21e   : > { %881 = vmatprep.mubr.f32.mxu0 %v10111_v0  ;;  %1604 = vmatprep.mubr.f32.mxu1 %v10111_v0 }
 0x220   : > { %v677_v37 = vpop.trf.xlu0  ;;  %v1158_v58 = vpop.trf.xlu1 }
 0x221   : > { %5578 = vmatmul.mubr.msk.f32.gmra.mxu0 %vm678_vm1, %v677_v37  ;;  %5626 = vmatmul.mubr.msk.f32.gmra.mxu1 %vm678_vm1, %v1401_v20 }
 0x222   : > { %1273 = vmatprep.mubr.f32.mxu0 %v10111_v0  ;;  %2438 = vmatprep.mubr.f32.mxu1 %v10111_v0 }
 0x224   : > { %v1159_v60 = vpop.trf.xlu1 }
 0x225   : > { %5595 = vmatmul.mubr.msk.f32.vlgmr.msra.gmra.mxu0 %vm678_vm1, %v1145_v23 }
 0x226   : > { %1279 = vmatprep.mubr.f32.mxu0 %v10111_v0 }
 0x228   : > { %v1160_v63 = vpop.trf.xlu1 }
 0x229   : > { %5596 = vmatmul.mubr.msk.f32.gmra.mxu0 %vm678_vm1, %v1146_v25 }
 0x22a   : > { %1285 = vmatprep.mubr.f32.mxu0 %v10111_v0 }
 0x22d   : > { %5597 = vmatmul.mubr.msk.f32.gmra.mxu0 %vm678_vm1, %v1147_v28 }
 0x22e   : > { %1291 = vmatprep.mubr.f32.mxu0 %v10111_v0 }
 0x231   : > { %5598 = vmatmul.mubr.msk.f32.gmra.mxu0 %vm678_vm1, %v1148_v30 }
 0x232   : > { %1297 = vmatprep.mubr.f32.mxu0 %v10111_v0 }
 0x235   : > { %5599 = vmatmul.mubr.msk.f32.gmra.mxu0 %vm678_vm1, %v1149_v35 }
 0x236   : > { %1303 = vmatprep.mubr.f32.mxu0 %v10111_v0 }
 0x239   : > { %5600 = vmatmul.mubr.msk.f32.gmra.mxu0 %vm678_vm1, %v1150_v39 }
 0x23a   : > { %1309 = vmatprep.mubr.f32.mxu0 %v10111_v0 }
 0x23d   : > { %5601 = vmatmul.mubr.msk.f32.gmra.mxu0 %vm678_vm1, %v1151_v44 }
 0x23e   : > { %1315 = vmatprep.mubr.f32.mxu0 %v10111_v0 }
 0x241   : > { %5602 = vmatmul.mubr.msk.f32.gmra.mxu0 %vm678_vm1, %v1152_v46 }
 0x242   : > { %1321 = vmatprep.mubr.f32.mxu0 %v10111_v0 }
 0x245   : > { %5603 = vmatmul.mubr.msk.f32.gmra.mxu0 %vm678_vm1, %v1153_v49 }
 0x246   : > { %1327 = vmatprep.mubr.f32.mxu0 %v10111_v0 }
 0x249   : > { %5604 = vmatmul.mubr.msk.f32.gmra.mxu0 %vm678_vm1, %v1154_v50 }
 0x24a   : > { %1333 = vmatprep.mubr.f32.mxu0 %v10111_v0 }
 0x24d   : > { %5605 = vmatmul.mubr.msk.f32.gmra.mxu0 %vm678_vm1, %v1155_v51 }
 0x24e   : > { %1339 = vmatprep.mubr.f32.mxu0 %v10111_v0 }
 0x251   : > { %5606 = vmatmul.mubr.msk.f32.gmra.mxu0 %vm678_vm1, %v1156_v53 }
 0x252   : > { %1345 = vmatprep.mubr.f32.mxu0 %v10111_v0 }
 0x255   : > { %5607 = vmatmul.mubr.msk.f32.gmra.mxu0 %vm678_vm1, %v1157_v55 }
 0x256   : > { %1351 = vmatprep.mubr.f32.mxu0 %v10111_v0 }
 0x259   : > { %5608 = vmatmul.mubr.msk.f32.gmra.mxu0 %vm678_vm1, %v1158_v58 }
 0x25a   : > { %1357 = vmatprep.mubr.f32.mxu0 %v10111_v0 }
 0x25d   : > { %5609 = vmatmul.mubr.msk.f32.gmra.mxu0 %vm678_vm1, %v1159_v60 }
 0x25e   : > { %1363 = vmatprep.mubr.f32.mxu0 %v10111_v0 }
 0x261   : > { %5610 = vmatmul.mubr.msk.f32.gmra.mxu0 %vm678_vm1, %v1160_v63 }
 0x262   : > { %2367 = vmatprep.mubr.f32.mxu0 %v10111_v0 }
 0x265   : > { %v6951_v2 = vpop.f32.mrf.mxu1 }
 0x267   : > { %v6953_v3 = vpop.f32.mrf.mxu1 }
 0x269   : > { %v6955_v4 = vpop.f32.mrf.mxu1 }
 0x26a   : > { %v1661_v19 = vmax.f32 %v6951_v2, %v6955_v4 }
 0x26b   : > { %v6957_v5 = vpop.f32.mrf.mxu1 }
 0x26c   : > { %v1682_v21 = vmax.f32 %v6953_v3, %v6957_v5 }
 0x26d   : > { %v6959_v6 = vpop.f32.mrf.mxu1 }
 0x26e   : > { %v1662_v22 = vmax.f32 %v1661_v19, %v6959_v6 }
 0x26f   : > { %v6961_v7 = vpop.f32.mrf.mxu1 }
 0x270   : > { %v1683_v24 = vmax.f32 %v1682_v21, %v6961_v7 }
 0x271   : > { %v6963_v8 = vpop.f32.mrf.mxu1 }
 0x272   : > { %v1663_v25 = vmax.f32 %v1662_v22, %v6963_v8 }
 0x273   : > { %v6965_v9 = vpop.f32.mrf.mxu1 }
 0x274   : > { %v1684_v27 = vmax.f32 %v1683_v24, %v6965_v9 }
 0x275   : > { %v6967_v10 = vpop.f32.mrf.mxu1 }
 0x276   : > { %v1664_v28 = vmax.f32 %v1663_v25, %v6967_v10 }
 0x277   : > { %v6969_v11 = vpop.f32.mrf.mxu1 }
 0x278   : > { %v1685_v30 = vmax.f32 %v1684_v27, %v6969_v11 }
 0x279   : > { %v6971_v12 = vpop.f32.mrf.mxu1 }
 0x27a   : > { %v1665_v31 = vmax.f32 %v1664_v28, %v6971_v12 }
 0x27b   : > { %v6973_v13 = vpop.f32.mrf.mxu1 }
 0x27c   : > { %v1686_v35 = vmax.f32 %v1685_v30, %v6973_v13 }
 0x27d   : > { %v6975_v14 = vpop.f32.mrf.mxu1 }
 0x27e   : > { %v1666_v37 = vmax.f32 %v1665_v31, %v6975_v14 }
 0x27f   : > { %v6977_v15 = vpop.f32.mrf.mxu1 }
 0x280   : > { %v1687_v44 = vmax.f32 %v1686_v35, %v6977_v15 }
 0x281   : > { %v6979_v16 = vpop.f32.mrf.mxu1 }
 0x282   : > { %v1667_v46 = vmax.f32 %v1666_v37, %v6979_v16 }
 0x283   : > { %v6981_v17 = vpop.f32.mrf.mxu1 }
 0x284   : > { %v1688_v49 = vmax.f32 %v1687_v44, %v6981_v17 }
 0x285   : > { %v6983_v18 = vpop.f32.mrf.mxu1 }
 0x286   : > { %v1668_v50 = vmax.f32 %v1667_v46, %v6983_v18 }
 0x287   : > { %v6987_v20 = vpop.f32.mrf.mxu1 }
 0x288   : > { %v1689_v53 = vmax.f32 %v1688_v49, %v6987_v20 }
 0x289   : > { %v6992_v23 = vpop.f32.mrf.mxu1 }
 0x28a   : > { %v1669_v55 = vmax.f32 %v1668_v50, %v6992_v23 }
 0x28b   : > { %v6996_v26 = vpop.f32.mrf.mxu1 }
 0x28c   : > { %v1690_v60 = vmax.f32 %v1689_v53, %v6996_v26 }
 0x28d   : > { %v7000_v29 = vpop.f32.mrf.mxu1 }
 0x28e   : > { %v1670_v63 = vmax.f32 %v1669_v55, %v7000_v29 }
 0x28f   : > { %v7004_v33 = vpop.f32.mrf.mxu1 }
 0x290   : > { %v1691_v21 = vmax.f32 %v1690_v60, %v7004_v33 }
 0x291   : > { %v7008_v39 = vpop.f32.mrf.mxu1 }
 0x292   : > { %v1671_v22 = vmax.f32 %v1670_v63, %v7008_v39 }
 0x293   : > { %v7012_v48 = vpop.f32.mrf.mxu1 }
 0x294   : > { %v1692_v25 = vmax.f32 %v1691_v21, %v7012_v48 }
 0x295   : > { %v7016_v51 = vpop.f32.mrf.mxu1 }
 0x296   : > { %v1672_v27 = vmax.f32 %v1671_v22, %v7016_v51 }
 0x297   : > { %v7020_v58 = vpop.f32.mrf.mxu1 }
 0x298   : > { %v1693_v30 = vmax.f32 %v1692_v25, %v7020_v58 }
 0x299   : > { %v7024_v19 = vpop.f32.mrf.mxu1 }
 0x29a   : > { %v1673_v31 = vmax.f32 %v1672_v27, %v7024_v19 }
 0x29b   : > { %v7028_v24 = vpop.f32.mrf.mxu1 }
 0x29c   : > { %v1694_v37 = vmax.f32 %v1693_v30, %v7028_v24 }
 0x29d   : > { %v7032_v28 = vpop.f32.mrf.mxu1 }
 0x29e   : > { %v1674_v44 = vmax.f32 %v1673_v31, %v7032_v28 }
 0x29f   : > { %v7036_v35 = vpop.f32.mrf.mxu1 }
 0x2a0   : > { %v1695_v49 = vmax.f32 %v1694_v37, %v7036_v35  ;;  %v6477_v37 = vmov 1966171168  }
 0x2a1   : > { %v7040_v46 = vpop.f32.mrf.mxu1  ;;  %v1797_v45 = vunpack.c.l.s4 %v6477_v37 }
 0x2a2   : > { %v1675_v50 = vmax.f32 %v1674_v44, %v7040_v46 }
 0x2a3   : > { %v7044_v53 = vpop.f32.mrf.mxu1  ;;  %v1798_v40 = vunpack.c.0.s8 %v1797_v45 }
 0x2a4   : > { %v1676_v55 = vrot.slane %v1675_v50, 4  ;;  %v1696_v60 = vmax.f32 %v1695_v49, %v7044_v53 }
 0x2a5   : > { %v7047_v63 = vpop.f32.mrf.mxu0  ;;  %v7049_v21 = vpop.f32.mrf.mxu1  ;;  %v7072_v42 = vsub.s32 %v1798_v40, %v1800_v32 }
 0x2a6   : > { %10448 = vst [vmem:[#allocation35_spill] sm:$0xff] %v7047_v63  ;;  %10449 = vst [vmem:[#allocation36_spill] sm:$0xff] %v7049_v21  ;;  %v1677_v22 = vmax.f32 %v1675_v50, %v1676_v55  ;;  %v1697_v25 = vrot.slane %v1696_v60, 4 }
 0x2a7   : > { %v7051_v27 = vpop.f32.mrf.mxu0  ;;  %v7053_v30 = vpop.f32.mrf.mxu1  ;;  %10461 = vst [vmem:[#allocation47_spill] sm:$0xff] %v7072_v42 }
 0x2a8   : > { %10450 = vst [vmem:[#allocation37_spill] sm:$0xff] %v7051_v27  ;;  %10451 = vst [vmem:[#allocation38_spill] sm:$0xff] %v7053_v30  ;;  %v1678_v31 = vrot.slane %v1677_v22, 2  ;;  %v1698_v0 = vmax.f32 %v1696_v60, %v1697_v25 }
 0x2a9   : > { %v7055_v44 = vpop.f32.mrf.mxu0  ;;  %v7057_v61 = vpop.f32.mrf.mxu1 }
 0x2aa   : > { %10452 = vst [vmem:[#allocation39_spill] sm:$0xff] %v7055_v44  ;;  %10453 = vst [vmem:[#allocation40_spill] sm:$0xff] %v7057_v61  ;;  %v1679_v1 = vmax.f32 %v1677_v22, %v1678_v31  ;;  %v1699_v49 = vrot.slane %v1698_v0, 2 }
 0x2ab   : > { %v7059_v54 = vpop.f32.mrf.mxu0  ;;  %v7061_v57 = vpop.f32.mrf.mxu1 }
 0x2ac   : > { %10454 = vst [vmem:[#allocation41_spill] sm:$0xff] %v7059_v54  ;;  %10455 = vst [vmem:[#allocation42_spill] sm:$0xff] %v7061_v57  ;;  %v1680_v50 = vrot.slane %v1679_v1, 1  ;;  %v1700_v55 = vmax.f32 %v1698_v0, %v1699_v49 }
 0x2ad   : > { %v7064_v34 = vpop.f32.mrf.mxu0  ;;  %v7066_v60 = vpop.f32.mrf.mxu1 }
 0x2ae   : > { %10457 = vst [vmem:[#allocation43_spill] sm:$0xff] %v7064_v34  ;;  %10458 = vst [vmem:[#allocation44_spill] sm:$0xff] %v7066_v60  ;;  %v1701_v25 = vrot.slane %v1700_v55, 1  ;;  %v1681_v22 = vmax.f32 %v1679_v1, %v1680_v50  ;;  %v1619_v1 = vmax.f32 %v7047_v63, %v7055_v44  ;;  %v1745_v50 = vmax.f32 %v7049_v21, %v7057_v61 }
 0x2af   : > { %v7068_v37 = vpop.f32.mrf.mxu0  ;;  %v7070_v59 = vpop.f32.mrf.mxu1 }
 0x2b0   : > { %10459 = vst [vmem:[#allocation45_spill] sm:$0xff] %v7068_v37  ;;  %10460 = vst [vmem:[#allocation46_spill] sm:$0xff] %v7070_v59  ;;  %v1702_v31 = vmax.f32 %v1700_v55, %v1701_v25  ;;  %v7094_v55 = vsub.s32 0, %v1800_v32  ;;  %v7096_v25 = vsub.s32 1, %v1800_v32  ;;  %v1620_v44 = vmax.f32 %v1619_v1, %v7064_v34 }
 0x2b1   : > { %v7074_v43 = vpop.f32.mrf.mxu0  ;;  %v7076_v36 = vpop.f32.mrf.mxu1  ;;  %v1746_v61 = vmax.f32 %v1745_v50, %v7066_v60 }
 0x2b2   : > { %10462 = vst [vmem:[#allocation48_spill] sm:$0xff] %v7074_v43  ;;  %10463 = vst [vmem:[#allocation49_spill] sm:$0xff] %v7076_v36  ;;  %v1810_v0 = vcombine.low %v1681_v22, %v1702_v31  ;;  %v1640_v22 = vmax.f32 %v7051_v27, %v7059_v54  ;;  %v1621_v27 = vmax.f32 %v1620_v44, %v7074_v43 }
 0x2b3   : > { %v7078_v45 = vpop.f32.mrf.mxu0  ;;  %v7080_v41 = vpop.f32.mrf.mxu1  ;;  %10469 = vst [vmem:[#allocation55_spill] sm:$0xff] %v7094_v55  ;;  %10470 = vst [vmem:[#allocation56_spill] sm:$0xff] %v7096_v25 }
 0x2b4   : > { %10464 = vst [vmem:[#allocation50_spill] sm:$0xff] %v7078_v45  ;;  %10465 = vst [vmem:[#allocation51_spill] sm:$0xff] %v7080_v41  ;;  %v1817_v49 = vrot.slane %v1810_v0, %v7072_v42  ;;  %v1641_v54 = vmax.f32 %v1640_v22, %v7068_v37 }
 0x2b5   : > { %v7085_v62 = vpop.f32.mrf.mxu0  ;;  %v7087_v52 = vpop.f32.mrf.mxu1 }
 0x2b6   : > { %10467 = vst [vmem:[#allocation53_spill] sm:$0xff] %v7085_v62  ;;  %10468 = vst [vmem:[#allocation54_spill] sm:$0xff] %v7087_v52  ;;  %v1824_v40 = vrot.slane %v1817_v49, %v7072_v42  ;;  %v1766_v49 = vmax.f32 %v7053_v30, %v7061_v57  ;;  %v1747_v57 = vmax.f32 %v1746_v61, %v7076_v36 }
 0x2b7   : > { %v7100_v31 = vpop.f32.mrf.mxu0  ;;  %v7102_v0 = vpop.f32.mrf.mxu1  ;;  %v1642_v22 = vmax.f32 %v1641_v54, %v7078_v45  ;;  %v7137_v44 = vmax.f32 %v1621_v27, %v7085_v62 }
 0x2b8   : > { %10471 = vst [vmem:[#allocation57_spill] sm:$0xff] %v7100_v31  ;;  %10472 = vst [vmem:[#allocation58_spill] sm:$0xff] %v7102_v0  ;;  %v7105_v56 = vmax.f32 %v7083_v38, %v1824_v40  ;;  %v1767_v40 = vmax.f32 %v1766_v49, %v7070_v59  ;;  %v7140_v61 = vmax.f32 %v1747_v57, %v7087_v52 }
 0x2b9   : > { %v7111_v21 = vpop.f32.mrf.mxu0  ;;  %v7113_v32 = vpop.f32.mrf.mxu1  ;;  %v7147_v43 = vmax.f32 %v1642_v22, %v7100_v31 }
 0x2ba   : > { %10473 = vst [vmem:[#allocation59_spill] sm:$0xff] %v7113_v32  ;;  %2916 = vst.msk [vmem:[#allocation5 + $0x2] sm:$0x3] %vm6885_vm2, %v7105_v56  ;;  %v7124_v1 = vrot.slane %v7105_v56, %v7094_v55  ;;  %v7128_v50 = vrot.slane %v7105_v56, %v7096_v25  ;;  %v1768_v49 = vmax.f32 %v1767_v40, %v7080_v41 }
 0x2bb   : > { %v7130_v60 = vpop.f32.mrf.mxu0  ;;  %v7132_v30 = vpop.f32.mrf.mxu1 }
 0x2bc   : > { %10474 = vst [vmem:[#allocation60_spill] sm:$0xff] %v7132_v30  ;;  %v7150_v37 = vmax.f32 %v1768_v49, %v7102_v0  ;;  %v1951_v57 = vsub.f32 %v6951_v2, %v7124_v1  ;;  %v1952_v40 = vsub.f32 %v6953_v3, %v7128_v50  ;;  %v1953_v52 = vsub.f32 %v6955_v4, %v7124_v1 }
 0x2bd   : > { %v7142_v36 = vpop.f32.mrf.mxu0  ;;  %v7144_v59 = vpop.f32.mrf.mxu1  ;;  %v1954_v22 = vsub.f32 %v6957_v5, %v7128_v50  ;;  %v1955_v54 = vsub.f32 %v6959_v6, %v7124_v1  ;;  %v1956_v27 = vsub.f32 %v6961_v7, %v7128_v50  ;;  %v1957_v2 = vsub.f32 %v6963_v8, %v7124_v1 }
 0x2be   : > { %10475 = vst [vmem:[#allocation61_spill] sm:$0xff] %v7144_v59  ;;  %v1958_v3 = vsub.f32 %v6965_v9, %v7128_v50  ;;  %v1959_v4 = vsub.f32 %v6967_v10, %v7124_v1  ;;  %v1960_v5 = vsub.f32 %v6969_v11, %v7128_v50  ;;  %v1961_v41 = vsub.f32 %v6971_v12, %v7124_v1 }
 0x2bf   : > { %v7164_v49 = vpop.f32.mrf.mxu0  ;;  %v7166_v0 = vpop.f32.mrf.mxu1  ;;  %v1962_v6 = vsub.f32 %v6973_v13, %v7128_v50  ;;  %v1963_v8 = vsub.f32 %v6975_v14, %v7124_v1  ;;  %v1964_v9 = vsub.f32 %v6977_v15, %v7128_v50  ;;  %v1965_v10 = vsub.f32 %v6979_v16, %v7124_v1 }
 0x2c0   : > { %10476 = vst [vmem:[#allocation62_spill] sm:$0xff] %v7166_v0  ;;  %v1966_v11 = vsub.f32 %v6981_v17, %v7128_v50  ;;  %v1967_v12 = vsub.f32 %v6983_v18, %v7124_v1  ;;  %v1968_v13 = vsub.f32 %v6987_v20, %v7128_v50  ;;  %v1969_v62 = vsub.f32 %v6992_v23, %v7124_v1 }
 0x2c1   : > { %v7184_v31 = vpop.f32.mrf.mxu0  ;;  %v7186_v7 = vpop.f32.mrf.mxu1  ;;  %v1970_v14 = vsub.f32 %v6996_v26, %v7128_v50  ;;  %v1971_v16 = vsub.f32 %v7000_v29, %v7124_v1  ;;  %v1972_v17 = vsub.f32 %v7004_v33, %v7128_v50  ;;  %v2111_v18 = vmul.f32 1.442695, %v1951_v57 }
 0x2c2   : > { %10477 = vst [vmem:[#allocation63_spill] sm:$0xff] %v7186_v7  ;;  %v2113_v34 = vmul.f32 1.442695, %v1952_v40  ;;  %v1973_v20 = vsub.f32 %v7008_v39, %v7124_v1  ;;  %v1974_v23 = vsub.f32 %v7012_v48, %v7128_v50  ;;  %v2115_v63 = vmul.f32 1.442695, %v1953_v52 }
 0x2c3   : > { %v7204_v45 = vpop.f32.mrf.mxu0  ;;  %v7206_v15 = vpop.f32.mrf.mxu1  ;;  %v2117_v26 = vmul.f32 1.442695, %v1954_v22  ;;  %v1975_v29 = vsub.f32 %v7016_v51, %v7124_v1  ;;  %v1976_v33 = vsub.f32 %v7020_v58, %v7128_v50  ;;  %5782 = vpow2.f32 %v2111_v18 }
 0x2c4   : > { %10478 = vst [vmem:[#allocation64_spill] sm:$0xff] %v7206_v15  ;;  %v2119_v57 = vmul.f32 1.442695, %v1955_v54  ;;  %v1977_v39 = vsub.f32 %v7024_v19, %v7124_v1  ;;  %v1978_v48 = vsub.f32 %v7028_v24, %v7128_v50  ;;  %5784 = vpow2.f32 %v2113_v34 }
 0x2c5   : > { %v7216_v25 = vpop.f32.mrf.mxu0  ;;  %v7218_v55 = vpop.f32.mrf.mxu1  ;;  %v2121_v52 = vmul.f32 1.442695, %v1956_v27  ;;  %v1979_v51 = vsub.f32 %v7032_v28, %v7124_v1  ;;  %v1980_v58 = vsub.f32 %v7036_v35, %v7128_v50  ;;  %5786 = vpow2.f32 %v2115_v63 }
 0x2c6   : > { %10479 = vst [vmem:[#allocation65_spill] sm:$0xff] %v7218_v55  ;;  %v2123_v54 = vmul.f32 1.442695, %v1957_v2  ;;  %v1981_v19 = vsub.f32 %v7040_v46, %v7124_v1  ;;  %v1982_v24 = vsub.f32 %v7044_v53, %v7128_v50  ;;  %5788 = vpow2.f32 %v2117_v26 }
 0x2c7   : > { %v7228_v40 = vpop.f32.mrf.mxu0  ;;  %v7230_v22 = vpop.f32.mrf.mxu1  ;;  %v2125_v34 = vmul.f32 1.442695, %v1958_v3  ;;  %5790 = vpow2.f32 %v2119_v57  ;;  %v2127_v47 = vmul.f32 1.442695, %v1959_v4  ;;  %v2129_v28 = vmul.f32 1.442695, %v1960_v5 }
 0x2c8   : > { %10480 = vst [vmem:[#allocation66_spill] sm:$0xff] %v7230_v22  ;;  %v1644_v35 = vmax.f32 %v7147_v43, %v7130_v60  ;;  %5792 = vpow2.f32 %v2121_v52  ;;  %v2131_v63 = vmul.f32 1.442695, %v1961_v41  ;;  %v2133_v2 = vmul.f32 1.442695, %v1962_v6 }
 0x2c9   : > { %v7240_v27 = vpop.f32.mrf.mxu0  ;;  %v7242_v18 = vpop.f32.mrf.mxu1  ;;  %v2135_v42 = vmul.f32 1.442695, %v1963_v8  ;;  %5794 = vpow2.f32 %v2123_v54  ;;  %v2137_v53 = vmul.f32 1.442695, %v1964_v9  ;;  %v2139_v50 = vmul.f32 1.442695, %v1965_v10 }
 0x2ca   : > { %10481 = vst [vmem:[#allocation67_spill] sm:$0xff] %v7242_v18  ;;  %v2141_v3 = vmul.f32 1.442695, %v1966_v11  ;;  %5796 = vpow2.f32 %v2125_v34  ;;  %v2143_v26 = vmul.f32 1.442695, %v1967_v12 }
 0x2cb   : > { %v7246_v46 = vpop.f32.mrf.mxu0  ;;  %v7248_v1 = vpop.f32.mrf.mxu1  ;;  %v2145_v57 = vmul.f32 1.442695, %v1968_v13  ;;  %v2147_v4 = vmul.f32 1.442695, %v1969_v62  ;;  %5798 = vpow2.f32 %v2127_v47  ;;  %v2149_v43 = vmul.f32 1.442695, %v1970_v14 }
 0x2cc   : > { %10482 = vst [vmem:[#allocation68_spill] sm:$0xff] %v7248_v1  ;;  %v7254_v41 = vmul.f32 1.442695, %v1971_v16  ;;  %v7256_v6 = vmul.f32 1.442695, %v1972_v17  ;;  %5800 = vpow2.f32 %v2129_v28  ;;  %v10486_v47 = vmax.f32 %v7137_v44, %v7111_v21 }
 0x2cd   : > { %v7250_v5 = vpop.f32.mrf.mxu0  ;;  %v7252_v38 = vpop.f32.mrf.mxu1  ;;  %v7258_v8 = vmul.f32 1.442695, %v1973_v20  ;;  %v7260_v9 = vmul.f32 1.442695, %v1974_v23  ;;  %v7262_v10 = vmul.f32 1.442695, %v1975_v29  ;;  %5802 = vpow2.f32 %v2131_v63 }
 0x2ce   : > { %10483 = vst [vmem:[#allocation69_spill] sm:$0xff] %v7252_v38  ;;  %v7268_v12 = vmul.f32 1.442695, %v1976_v33  ;;  %v1624_v13 = vmax.f32 %v10486_v47, %v7142_v36  ;;  %v10487_v14 = vmax.f32 %v7140_v61, %v7113_v32  ;;  %5804 = vpow2.f32 %v2133_v2 }
 0x2cf   : > { %v7264_v11 = vpop.f32.mrf.mxu0  ;;  %v7266_v62 = vpop.f32.mrf.mxu1  ;;  %v7278_v17 = vmul.f32 1.442695, %v1977_v39  ;;  %v7280_v20 = vmul.f32 1.442695, %v1978_v48  ;;  %v1770_v23 = vmax.f32 %v7150_v37, %v7132_v30  ;;  %5806 = vpow2.f32 %v2135_v42 }
 0x2d0   : > { %10484 = vst [vmem:[#allocation70_spill] sm:$0xff] %v7264_v11  ;;  %10485 = vst [vmem:[#allocation71_spill] sm:$0xff] %v7266_v62  ;;  %v1750_v16 = vmax.f32 %v10487_v14, %v7144_v59  ;;  %v7288_v44 = vmul.f32 1.442695, %v1979_v51  ;;  %v1625_v52 = vmax.f32 %v1624_v13, %v7184_v31  ;;  %v7292_v54 = vpop.eup %5782  ;;  %5808 = vpow2.f32 %v2137_v53 }
 0x2d1   : > { %v7284_v29 = vpop.f32.mrf.mxu0  ;;  %v7286_v33 = vpop.f32.mrf.mxu1  ;;  %10490 = vst [vmem:[#allocation74_spill] sm:$0xff] %v7292_v54  ;;  %v7294_v39 = vmul.f32 1.442695, %v1980_v58  ;;  %v1645_v48 = vmax.f32 %v1644_v35, %v7164_v49  ;;  %v1771_v37 = vmax.f32 %v1770_v23, %v7166_v0  ;;  %5810 = vpow2.f32 %v2139_v50 }
 0x2d2   : > { %10488 = vst [vmem:[#allocation72_spill] sm:$0xff] %v7284_v29  ;;  %10489 = vst [vmem:[#allocation73_spill] sm:$0xff] %v7286_v33  ;;  %v1751_v61 = vmax.f32 %v1750_v16, %v7186_v7  ;;  %v7302_v42 = vpop.eup %5784  ;;  %v7304_v51 = vmul.f32 1.442695, %v1981_v19  ;;  %v1626_v63 = vmax.f32 %v1625_v52, %v7216_v25  ;;  %5812 = vpow2.f32 %v2141_v3 }
 0x2d3   : > { %v7298_v34 = vpop.f32.mrf.mxu0  ;;  %v7300_v28 = vpop.f32.mrf.mxu1  ;;  %10493 = vst [vmem:[#allocation77_spill] sm:$0xff] %v7302_v42  ;;  %v7310_v58 = vmul.f32 1.442695, %v1982_v24  ;;  %v1646_v35 = vmax.f32 %v1645_v48, %v7204_v45  ;;  %v1772_v47 = vmax.f32 %v1771_v37, %v7206_v15  ;;  %5814 = vpow2.f32 %v2143_v26 }
 0x2d4   : > { %10491 = vst [vmem:[#allocation75_spill] sm:$0xff] %v7298_v34  ;;  %10492 = vst [vmem:[#allocation76_spill] sm:$0xff] %v7300_v28  ;;  %v1752_v2 = vmax.f32 %v1751_v61, %v7218_v55  ;;  %v7308_v53 = vpop.eup %5786  ;;  %v1627_v16 = vmax.f32 %v1626_v63, %v7240_v27  ;;  %5816 = vpow2.f32 %v2145_v57 }
 0x2d5   : > { %10494 = vst [vmem:[#allocation78_spill] sm:$0xff] %v7308_v53  ;;  %v7314_v13 = vpop.f32.mrf.mxu0  ;;  %v7316_v14 = vpop.f32.mrf.mxu1  ;;  %v2633_v19 = vadd.f32 %v7308_v53, %v7292_v54  ;;  %v1647_v52 = vmax.f32 %v1646_v35, %v7228_v40  ;;  %v1773_v61 = vmax.f32 %v1772_v47, %v7230_v22  ;;  %5818 = vpow2.f32 %v2147_v4 }
 0x2d6   : > { %10495 = vst [vmem:[#allocation79_spill] sm:$0xff] %v7314_v13  ;;  %10496 = vst [vmem:[#allocation80_spill] sm:$0xff] %v7316_v14  ;;  %v7318_v50 = vpop.eup %5788  ;;  %v1753_v3 = vmax.f32 %v1752_v2, %v7242_v18  ;;  %v1628_v2 = vmax.f32 %v1627_v16, %v7250_v5  ;;  %5820 = vpow2.f32 %v2149_v43 }
 0x2d7   : > { %10497 = vst [vmem:[#allocation81_spill] sm:$0xff] %v7318_v50  ;;  %v7324_v24 = vpop.eup %5790  ;;  %v2654_v23 = vadd.f32 %v7318_v50, %v7302_v42  ;;  %v7330_v48 = vpop.f32.mrf.mxu0  ;;  %v1648_v47 = vmax.f32 %v1647_v52, %v7246_v46  ;;  %v1774_v22 = vmax.f32 %v1773_v61, %v7248_v1  ;;  %5822 = vpow2.f32 %v7254_v41 }
 0x2d8   : > { %10498 = vst [vmem:[#allocation82_spill] sm:$0xff] %v7324_v24  ;;  %10499 = vst [vmem:[#allocation83_spill] sm:$0xff] %v7330_v48  ;;  %v7332_v26 = vpop.f32.mrf.mxu1  ;;  %v7334_v37 = vpop.eup %5792  ;;  %v2634_v63 = vadd.f32 %v7324_v24, %v2633_v19  ;;  %v1754_v57 = vmax.f32 %v1753_v3, %v7252_v38  ;;  %v1629_v16 = vmax.f32 %v1628_v2, %v7284_v29  ;;  %5824 = vpow2.f32 %v7256_v6 }
 0x2d9   : > { %10500 = vst [vmem:[#allocation84_spill] sm:$0xff] %v7332_v26  ;;  %10501 = vst [vmem:[#allocation85_spill] sm:$0xff] %v7334_v37  ;;  %v7339_v18 = vpop.eup %5794  ;;  %v2655_v35 = vadd.f32 %v7334_v37, %v2654_v23  ;;  %v7344_v55 = vpop.f32.mrf.mxu0  ;;  %v1649_v52 = vmax.f32 %v1648_v47, %v7264_v11  ;;  %v1775_v61 = vmax.f32 %v1774_v22, %v7266_v62  ;;  %5826 = vpow2.f32 %v7258_v8 }
 0x2da   : > { %10502 = vst [vmem:[#allocation86_spill] sm:$0xff] %v7339_v18  ;;  %10503 = vst [vmem:[#allocation87_spill] sm:$0xff] %v7344_v55  ;;  %v7346_v15 = vpop.f32.mrf.mxu1  ;;  %v7348_v4 = vpop.eup %5796  ;;  %v2635_v19 = vadd.f32 %v7339_v18, %v2634_v63  ;;  %v1755_v43 = vmax.f32 %v1754_v57, %v7286_v33  ;;  %v1630_v2 = vmax.f32 %v1629_v16, %v7314_v13  ;;  %5828 = vpow2.f32 %v7260_v9 }
 0x2db   : > { %10504 = vst [vmem:[#allocation88_spill] sm:$0xff] %v7346_v15  ;;  %10505 = vst [vmem:[#allocation89_spill] sm:$0xff] %v7348_v4  ;;  %v7354_v3 = vpop.eup %5798  ;;  %v2656_v23 = vadd.f32 %v7348_v4, %v2655_v35  ;;  %v7360_v38 = vpop.f32.mrf.mxu0  ;;  %v1650_v35 = vmax.f32 %v1649_v52, %v7298_v34  ;;  %v1776_v47 = vmax.f32 %v1775_v61, %v7300_v28  ;;  %5830 = vpow2.f32 %v7262_v10 }
 0x2dc   : > { %10506 = vst [vmem:[#allocation90_spill] sm:$0xff] %v7354_v3  ;;  %10507 = vst [vmem:[#allocation91_spill] sm:$0xff] %v7360_v38  ;;  %v7362_v1 = vpop.f32.mrf.mxu1  ;;  %v7364_v41 = vpop.eup %5800  ;;  %v2636_v63 = vadd.f32 %v7354_v3, %v2635_v19  ;;  %v1756_v6 = vmax.f32 %v1755_v43, %v7316_v14  ;;  %v1631_v16 = vmax.f32 %v1630_v2, %v7344_v55  ;;  %5832 = vpow2.f32 %v7268_v12 }
 0x2dd   : > { %10508 = vst [vmem:[#allocation92_spill] sm:$0xff] %v7362_v1  ;;  %v7370_v57 = vpop.eup %5802  ;;  %v2657_v22 = vadd.f32 %v7364_v41, %v2656_v23  ;;  %v7376_v33 = vpop.f32.mrf.mxu0  ;;  %v1651_v52 = vmax.f32 %v1650_v35, %v7330_v48  ;;  %v1777_v61 = vmax.f32 %v1776_v47, %v7332_v26  ;;  %5834 = vpow2.f32 %v7278_v17 }
 0x2de   : > { %10509 = vst [vmem:[#allocation93_spill] sm:$0xff] %v7376_v33  ;;  %v7378_v62 = vpop.f32.mrf.mxu1  ;;  %v7380_v8 = vpop.eup %5804  ;;  %v2637_v19 = vadd.f32 %v7370_v57, %v2636_v63  ;;  %v1757_v9 = vmax.f32 %v1756_v6, %v7346_v15  ;;  %v1632_v2 = vmax.f32 %v1631_v16, %v7376_v33  ;;  %5836 = vpow2.f32 %v7280_v20 }
 0x2df   : > { %10510 = vst [vmem:[#allocation94_spill] sm:$0xff] %v7378_v62  ;;  %v7386_v43 = vpop.eup %5806  ;;  %v2658_v23 = vadd.f32 %v7380_v8, %v2657_v22  ;;  %v7392_v14 = vpop.f32.mrf.mxu0  ;;  %v1652_v35 = vmax.f32 %v1651_v52, %v7360_v38  ;;  %v1778_v47 = vmax.f32 %v1777_v61, %v7362_v1  ;;  %5838 = vpow2.f32 %v7288_v44 }
 0x2e0   : > { %10511 = vst [vmem:[#allocation95_spill] sm:$0xff] %v7392_v14  ;;  %v7394_v28 = vpop.f32.mrf.mxu1  ;;  %v7396_v10 = vpop.eup %5808  ;;  %v2638_v63 = vadd.f32 %v7386_v43, %v2637_v19  ;;  %v1758_v12 = vmax.f32 %v1757_v9, %v7378_v62  ;;  %5840 = vpow2.f32 %v7294_v39 }
 0x2e1   : > { %10512 = vst [vmem:[#allocation96_spill] sm:$0xff] %v7394_v28  ;;  %v7402_v6 = vpop.eup %5810  ;;  %v2659_v22 = vadd.f32 %v7396_v10, %v2658_v23  ;;  %v7408_v15 = vpop.f32.mrf.mxu0  ;;  %v1653_v52 = vmax.f32 %v1652_v35, %v7392_v14  ;;  %v1779_v61 = vmax.f32 %v1778_v47, %v7394_v28  ;;  %5842 = vpow2.f32 %v7304_v51 }
 0x2e2   : > { %10513 = vst [vmem:[#allocation97_spill] sm:$0xff] %v7408_v15  ;;  %v7410_v26 = vpop.f32.mrf.mxu1  ;;  %v7412_v17 = vpop.eup %5812  ;;  %v2639_v19 = vadd.f32 %v7402_v6, %v2638_v63  ;;  %v1633_v16 = vmax.f32 %v1632_v2, %v7408_v15  ;;  %5844 = vpow2.f32 %v7310_v58 }
 0x2e3   : > { %10514 = vst [vmem:[#allocation98_spill] sm:$0xff] %v7410_v26  ;;  %v1759_v20 = vmax.f32 %v1758_v12, %v7410_v26  ;;  %v7418_v9 = vpop.eup %5814  ;;  %v2660_v23 = vadd.f32 %v7412_v17, %v2659_v22  ;;  %v7424_v62 = vpop.f32.mrf.mxu0 }
 0x2e4   : > { %10515 = vst [vmem:[#allocation99_spill] sm:$0xff] %v7424_v62  ;;  %v7426_v1 = vpop.f32.mrf.mxu1  ;;  %v7428_v44 = vpop.eup %5816  ;;  %v2640_v63 = vadd.f32 %v7418_v9, %v2639_v19  ;;  %v1634_v2 = vrot.slane %v1633_v16, 4  ;;  %v1654_v22 = vmax.f32 %v1653_v52, %v7424_v62  ;;  %v10519_v52 = vld [vmem:[#allocation52_spill] sm:$0xff] }
 0x2e5   : > { %10516 = vst [vmem:[#allocation100_spill] sm:$0xff] %v7426_v1  ;;  %v1760_v12 = vrot.slane %v1759_v20, 4  ;;  %v7432_v26 = vpop.eup %5818  ;;  %v2661_v39 = vadd.f32 %v7428_v44, %v2660_v23  ;;  %v1780_v35 = vmax.f32 %v1779_v61, %v7426_v1  ;;  %v7438_v47 = vpop.f32.mrf.mxu0  ;;  %v1864_v61 = vsub.f32 %v10519_v52, %v7105_v56 }
 0x2e6   : > { %10517 = vst [vmem:[#allocation101_spill] sm:$0xff] %v7438_v47  ;;  %v7440_v28 = vpop.eup %5820  ;;  %v2641_v51 = vadd.f32 %v7432_v26, %v2640_v63  ;;  %v1635_v7 = vmax.f32 %v1633_v16, %v1634_v2  ;;  %v1655_v30 = vrot.slane %v1654_v22, 4 }
 0x2e7   : > { %v1761_v19 = vmax.f32 %v1759_v20, %v1760_v12  ;;  %v7443_v0 = vpop.eup %5822  ;;  %v2662_v59 = vadd.f32 %v7440_v28, %v2661_v39  ;;  %v1781_v58 = vrot.slane %v1780_v35, 4  ;;  %v7446_v32 = vpop.f32.mrf.mxu0 }
 0x2e8   : > { %10518 = vst [vmem:[#allocation102_spill] sm:$0xff] %v7446_v32  ;;  %v7448_v23 = vpop.eup %5824  ;;  %v2642_v1 = vadd.f32 %v7443_v0, %v2641_v51  ;;  %v1636_v54 = vrot.slane %v1635_v7, 2  ;;  %v1656_v20 = vmax.f32 %v1654_v22, %v1655_v30 }
 0x2e9   : > { %v1762_v42 = vrot.slane %v1761_v19, 2  ;;  %v7453_v63 = vpop.eup %5826  ;;  %v2663_v16 = vadd.f32 %v7448_v23, %v2662_v59  ;;  %v1782_v2 = vmax.f32 %v1780_v35, %v1781_v58  ;;  %v7456_v12 = vpop.f32.mrf.mxu0  ;;  %v1869_v59 = vmul.f32 1.442695, %v1864_v61 }
 0x2ea   : > { %10520 = vst [vmem:[#allocation52_spill] sm:$0xff] %v7456_v12  ;;  %v7458_v39 = vpop.eup %5828  ;;  %v2643_v53 = vadd.f32 %v7453_v63, %v2642_v1  ;;  %v1637_v50 = vmax.f32 %v1635_v7, %v1636_v54  ;;  %v1657_v51 = vrot.slane %v1656_v20, 2 }
 0x2eb   : > { %v1763_v62 = vmax.f32 %v1761_v19, %v1762_v42  ;;  %v7461_v24 = vpop.eup %5830  ;;  %v2664_v56 = vadd.f32 %v7458_v39, %v2663_v16  ;;  %v1783_v52 = vrot.slane %v1782_v2, 2  ;;  %v7464_v15 = vpop.f32.mrf.mxu0  ;;  %5846 = vpow2.f32 %v1869_v59 }
 0x2ec   : > { %10521 = vst [vmem:[#allocation103_spill] sm:$0xff] %v7464_v15  ;;  %v5833_v14 = vpop.eup %5832  ;;  %v2644_v30 = vadd.f32 %v7461_v24, %v2643_v53  ;;  %v1638_v22 = vrot.slane %v1637_v50, 1  ;;  %v1658_v33 = vmax.f32 %v1656_v20, %v1657_v51 }
 0x2ed   : > { %v5835_v35 = vpop.eup %5834  ;;  %v2665_v58 = vadd.f32 %v5833_v14, %v2664_v56  ;;  %v1764_v37 = vrot.slane %v1763_v62, 1  ;;  %v1784_v1 = vmax.f32 %v1782_v2, %v1783_v52  ;;  %v7467_v7 = vpop.f32.mrf.mxu0 }
 0x2ee   : > { %10522 = vst [vmem:[#allocation104_spill] sm:$0xff] %v7467_v7  ;;  %v5837_v54 = vpop.eup %5836  ;;  %v2645_v42 = vadd.f32 %v5835_v35, %v2644_v30  ;;  %v1659_v38 = vrot.slane %v1658_v33, 1  ;;  %v1639_v53 = vmax.f32 %v1637_v50, %v1638_v22  ;;  %v10526_v50 = vld [vmem:[#allocation47_spill] sm:$0xff] }
 0x2ef   : > { %v5839_v19 = vpop.eup %5838  ;;  %v2666_v16 = vadd.f32 %v5837_v54, %v2665_v58  ;;  %v1785_v18 = vrot.slane %v1784_v1, 1  ;;  %v7469_v55 = vpop.f32.mrf.mxu0  ;;  %v1765_v56 = vmax.f32 %v1763_v62, %v1764_v37  ;;  %v7479_v37 = vld [vmem:[#allocation5 + $0x6] sm:$0x3] }
 0x2f0   : > { %10523 = vst [vmem:[#allocation105_spill] sm:$0xff] %v7469_v55  ;;  %v5841_v48 = vpop.eup %5840  ;;  %v2646_v61 = vadd.f32 %v5839_v19, %v2645_v42  ;;  %v1660_v34 = vmax.f32 %v1658_v33, %v1659_v38  ;;  %v1611_v33 = vld [vmem:[#allocation5] sm:$0x3]  ;;  %10528 = vst [vmem:[#allocation109_spill] sm:$0xff] %v7479_v37 }
 0x2f1   : > { %v5843_v4 = vpop.eup %5842  ;;  %v2667_v13 = vadd.f32 %v5841_v48, %v2666_v16  ;;  %v1786_v20 = vmax.f32 %v1784_v1, %v1785_v18  ;;  %v7471_v2 = vpop.f32.mrf.mxu0 }
 0x2f2   : > { %10524 = vst [vmem:[#allocation106_spill] sm:$0xff] %v7471_v2  ;;  %v5845_v51 = vpop.eup %5844  ;;  %v2647_v52 = vadd.f32 %v5843_v4, %v2646_v61  ;;  %v1795_v58 = vcombine.low %v1639_v53, %v1660_v34 }
 0x2f3   : > { %v2668_v30 = vadd.f32 %v5845_v51, %v2667_v13  ;;  %2374 = vmatprep.subr.mxu1 %v5845_v51  ;;  %v1840_v3 = vcombine.low %v1765_v56, %v1786_v20  ;;  %v7473_v29 = vpop.f32.mrf.mxu0  ;;  %v10609_v56 = vld [vmem:[#allocation80_spill] sm:$0xff] }
 0x2f4   : > { %10525 = vst [vmem:[#allocation107_spill] sm:$0xff] %v7473_v29  ;;  %v2648_v11 = vrot.slane %v2647_v52, 4  ;;  %2375 = vmatpush1.msra.mxu1 %v5843_v4  ;;  %v1802_v22 = vrot.slane %v1795_v58, %v10526_v50 }
 0x2f5   : > { %v2669_v59 = vrot.slane %v2668_v30, 4  ;;  %2376 = vmatprep.subr.mxu1 %v5841_v48  ;;  %v1847_v62 = vrot.slane %v1840_v3, %v10526_v50  ;;  %v7477_v38 = vpop.f32.mrf.mxu0 }
 0x2f6   : > { %10527 = vst [vmem:[#allocation108_spill] sm:$0xff] %v7477_v38  ;;  %v2649_v18 = vadd.f32 %v2648_v11, %v2647_v52  ;;  %2377 = vmatpush1.msra.mxu1 %v5839_v19  ;;  %v1809_v34 = vrot.slane %v1802_v22, %v10526_v50  ;;  %v1703_v11 = vmax.f32 %v7438_v47, %v7456_v12  ;;  %v10589_v47 = vld [vmem:[#allocation61_spill] sm:$0xff] }
 0x2f7   : > { %v2670_v13 = vadd.f32 %v2669_v59, %v2668_v30  ;;  %2378 = vmatprep.subr.mxu1 %v5837_v54  ;;  %v1854_v1 = vrot.slane %v1847_v62, %v10526_v50  ;;  %v7483_v4 = vpop.f32.mrf.mxu0  ;;  %v10534_v62 = vld [vmem:[#allocation55_spill] sm:$0xff] }
 0x2f8   : > { %10529 = vst [vmem:[#allocation110_spill] sm:$0xff] %v7483_v4  ;;  %v2650_v48 = vrot.slane %v2649_v18, 2  ;;  %2379 = vmatpush1.msra.mxu1 %v5835_v35  ;;  %v1859_v3 = vmax.f32 %v1611_v33, %v1809_v34  ;;  %v1704_v35 = vmax.f32 %v1703_v11, %v7467_v7 }
 0x2f9   : > { %v2671_v42 = vrot.slane %v2670_v13, 2  ;;  %2380 = vmatprep.subr.mxu1 %v5833_v14  ;;  %v7486_v16 = vmax.f32 %v7479_v37, %v1854_v1  ;;  %v7490_v19 = vpop.f32.mrf.mxu0  ;;  %v1724_v14 = vmax.f32 %v7446_v32, %v7464_v15  ;;  %v10588_v32 = vld [vmem:[#allocation60_spill] sm:$0xff]  ;;  %v10592_v15 = vld [vmem:[#allocation62_spill] sm:$0xff] }
 0x2fa   : > { %v2651_v54 = vadd.f32 %v2650_v48, %v2649_v18  ;;  %2381 = vmatpush1.msra.mxu1 %v7461_v24  ;;  %v1863_v53 = vsub.f32 %v1611_v33, %v1859_v3  ;;  %2915 = vst.msk [vmem:[#allocation5] sm:$0x3] %vm6885_vm2, %v1859_v3  ;;  %v7505_v24 = vpop.eup %5846  ;;  %v1705_v58 = vmax.f32 %v1704_v35, %v7471_v2  ;;  %v10535_v33 = vld [vmem:[#allocation56_spill] sm:$0xff] }
 0x2fb   : > { %10530 = vst [vmem:[#allocation111_spill] sm:$0xff] %v7486_v16  ;;  %v2672_v61 = vadd.f32 %v2671_v42, %v2670_v13  ;;  %2382 = vmatprep.subr.mxu1 %v7458_v39  ;;  %2918 = vst.msk [vmem:[#allocation5 + $0x6] sm:$0x3] %vm6885_vm2, %v7486_v16  ;;  %v7502_v20 = vpop.f32.mrf.mxu0  ;;  %v1616_v39 = vld [vmem:[#allocation6 + $0x2] sm:$0x3]  ;;  %v1725_v30 = vmax.f32 %v1724_v14, %v7469_v55  ;;  %v7514_v18 = vrot.slane %v1859_v3, %v10534_v62  ;;  %v10539_v14 = vld [vmem:[#allocation39_spill] sm:$0xff] }
 0x2fc   : > { %v2652_v51 = vrot.slane %v2651_v54, 1  ;;  %2383 = vmatpush1.msra.mxu1 %v7453_v63  ;;  %10532 = vst [vmem:[#allocation112_spill] sm:$0xff] %v7505_v24  ;;  %v7517_v63 = vrot.slane %v1859_v3, %v10535_v33  ;;  %v1867_v34 = vmul.f32 1.442695, %v1863_v53  ;;  %v7522_v1 = vmax.f32 %v1705_v58, %v7477_v38  ;;  %v10538_v53 = vld [vmem:[#allocation37_spill] sm:$0xff]  ;;  %v10560_v38 = vld [vmem:[#allocation95_spill] sm:$0xff] }
 0x2fd   : > { %v2673_v52 = vrot.slane %v2672_v61, 1  ;;  %2384 = vmatprep.subr.mxu1 %v7448_v23  ;;  %v7510_v59 = vpop.f32.mrf.mxu0  ;;  %v1726_v23 = vmax.f32 %v1725_v30, %v7473_v29  ;;  %v2588_v42 = vmul.f32 %v7505_v24, %v1616_v39  ;;  %v7531_v3 = vrot.slane %v7486_v16, %v10534_v62  ;;  %v10541_v30 = vld [vmem:[#allocation43_spill] sm:$0xff]  ;;  %v10561_v29 = vld [vmem:[#allocation97_spill] sm:$0xff]  ;;  %v10569_v55 = vld [vmem:[#allocation74_spill] sm:$0xff] }
 0x2fe   : > { %10533 = vst [vmem:[#allocation113_spill] sm:$0xff] %v7510_v59  ;;  %v2653_v22 = vadd.f32 %v2652_v51, %v2651_v54  ;;  %2385 = vmatpush1.msra.mxu1 %v7443_v0  ;;  %v1921_v35 = vsub.f32 %v10539_v14, %v7514_v18  ;;  %v7549_v51 = vrot.slane %v7486_v16, %v10535_v33  ;;  %5848 = vpow2.f32 %v1867_v34  ;;  %v10545_v34 = vld [vmem:[#allocation53_spill] sm:$0xff]  ;;  %v10608_v16 = vld [vmem:[#allocation76_spill] sm:$0xff] }
 0x2ff   : > { %v2674_v13 = vadd.f32 %v2673_v52, %v2672_v61  ;;  %2386 = vmatprep.subr.mxu1 %v7440_v28  ;;  %v7524_v48 = vpop.f32.mrf.mxu0  ;;  %v7534_v28 = vmax.f32 %v1726_v23, %v7483_v4  ;;  %v10537_v61 = vld [vmem:[#allocation35_spill] sm:$0xff]  ;;  %v1923_v58 = vsub.f32 %v10541_v30, %v7514_v18  ;;  %v1927_v14 = vsub.f32 %v10545_v34, %v7514_v18  ;;  %v10546_v30 = vld [vmem:[#allocation57_spill] sm:$0xff] }
 0x300   : > { %10536 = vst [vmem:[#allocation114_spill] sm:$0xff] %v7524_v48  ;;  %2387 = vmatpush1.msra.mxu1 %v7432_v26  ;;  %v1919_v26 = vsub.f32 %v10537_v61, %v7514_v18  ;;  %v10543_v61 = vld [vmem:[#allocation48_spill] sm:$0xff]  ;;  %v1928_v11 = vsub.f32 %v10546_v30, %v7517_v63  ;;  %v1934_v34 = vsub.f32 %v7204_v45, %v7517_v63  ;;  %v2051_v24 = vmul.f32 1.442695, %v1921_v35  ;;  %v10551_v35 = vld [vmem:[#allocation75_spill] sm:$0xff] }
 0x301   : > { %v2782_v0 = vcombine.low %v2653_v22, %v2674_v13  ;;  %2388 = vmatprep.subr.mxu1 %v7428_v44  ;;  %v7538_v54 = vpop.f32.mrf.mxu0  ;;  %v1920_v44 = vsub.f32 %v10538_v53, %v7517_v63  ;;  %v10542_v13 = vld [vmem:[#allocation45_spill] sm:$0xff]  ;;  %v1925_v53 = vsub.f32 %v10543_v61, %v7514_v18  ;;  %v1938_v45 = vsub.f32 %v7246_v46, %v7517_v63 }
 0x302   : > { %2389 = vmatpush1.msra.mxu1 %v7418_v9  ;;  %v10540_v9 = vld [vmem:[#allocation41_spill] sm:$0xff]  ;;  %v1924_v23 = vsub.f32 %v10542_v13, %v7517_v63  ;;  %v1930_v13 = vsub.f32 %v7130_v60, %v7517_v63  ;;  %v2047_v60 = vmul.f32 1.442695, %v1919_v26  ;;  %v1942_v46 = vsub.f32 %v10551_v35, %v7517_v63 }
 0x303   : > { %v2789_v39 = vrot.slane %v2782_v0, %v10526_v50  ;;  %2390 = vmatprep.subr.mxu1 %v7412_v17  ;;  %v1922_v52 = vsub.f32 %v10540_v9, %v7517_v63  ;;  %v7557_v22 = vpop.f32.mrf.mxu0  ;;  %v10544_v0 = vld [vmem:[#allocation50_spill] sm:$0xff]  ;;  %v2049_v30 = vmul.f32 1.442695, %v1920_v44 }
 0x304   : > { %2391 = vmatpush1.msra.mxu1 %v7402_v6  ;;  %v1926_v17 = vsub.f32 %v10544_v0, %v7517_v63  ;;  %v1929_v6 = vsub.f32 %v7111_v21, %v7514_v18  ;;  %v1931_v0 = vsub.f32 %v7142_v36, %v7514_v18  ;;  %v1935_v36 = vsub.f32 %v7216_v25, %v7514_v18  ;;  %v10550_v44 = vld [vmem:[#allocation90_spill] sm:$0xff] }
 0x305   : > { %v2796_v9 = vrot.slane %v2789_v39, %v10526_v50  ;;  %2392 = vmatprep.subr.mxu1 %v7396_v10  ;;  %v7576_v61 = vpop.f32.mrf.mxu0  ;;  %v1932_v39 = vsub.f32 %v7164_v49, %v7517_v63  ;;  %v1933_v10 = vsub.f32 %v7184_v31, %v7514_v18  ;;  %v1936_v49 = vsub.f32 %v7228_v40, %v7517_v63  ;;  %v10548_v40 = vld [vmem:[#allocation70_spill] sm:$0xff] }
 0x306   : > { %10547 = vst [vmem:[#allocation35_spill] sm:$0xff] %v7576_v61  ;;  %2393 = vmatpush1.msra.mxu1 %v7386_v43  ;;  %v1937_v31 = vsub.f32 %v7240_v27, %v7514_v18  ;;  %v2053_v43 = vmul.f32 1.442695, %v1922_v52  ;;  %5850 = vpow2.f32 %v2047_v60  ;;  %v2055_v25 = vmul.f32 1.442695, %v1923_v58  ;;  %v10549_v27 = vld [vmem:[#allocation72_spill] sm:$0xff] }
 0x307   : > { %v2832_v21 = vadd.f32 %v2796_v9, %v2588_v42  ;;  %2394 = vmatprep.subr.mxu1 %v7380_v8  ;;  %v7588_v4 = vpop.f32.mrf.mxu0  ;;  %v1939_v8 = vsub.f32 %v7250_v5, %v7514_v18  ;;  %v1940_v42 = vsub.f32 %v10548_v40, %v7517_v63  ;;  %v1941_v26 = vsub.f32 %v10549_v27, %v7514_v18  ;;  %v10552_v52 = vld [vmem:[#allocation79_spill] sm:$0xff]  ;;  %v10553_v9 = vld [vmem:[#allocation89_spill] sm:$0xff]  ;;  %v10556_v27 = vld [vmem:[#allocation86_spill] sm:$0xff] }
 0x308   : > { %2395 = vmatpush1.msra.mxu1 %v7370_v57  ;;  %5852 = vpow2.f32 %v2049_v30  ;;  %v2057_v57 = vmul.f32 1.442695, %v1924_v23  ;;  %v1943_v5 = vsub.f32 %v10552_v52, %v7514_v18  ;;  %v2059_v58 = vmul.f32 1.442695, %v1925_v53  ;;  %v10555_v30 = vld [vmem:[#allocation87_spill] sm:$0xff] }
 0x309   : > { %2836 = vst.msk [vmem:[#allocation6 + $0x2] sm:$0x3] %vm6885_vm2, %v2832_v21  ;;  %2396 = vmatprep.subr.mxu1 %v7364_v41  ;;  %5854 = vpow2.f32 %v2051_v24  ;;  %v7614_v41 = vpop.f32.mrf.mxu0  ;;  %v10554_v21 = vld [vmem:[#allocation83_spill] sm:$0xff]  ;;  %v1945_v23 = vsub.f32 %v10555_v30, %v7514_v18  ;;  %v2061_v40 = vmul.f32 1.442695, %v1926_v17  ;;  %v10558_v24 = vld [vmem:[#allocation93_spill] sm:$0xff]  ;;  %v1949_v30 = vsub.f32 %v10561_v29, %v7514_v18 }
 0x30a   : > { %2397 = vmatpush1.msra.mxu1 %v10550_v44  ;;  %v1944_v60 = vsub.f32 %v10554_v21, %v7517_v63  ;;  %5856 = vpow2.f32 %v2053_v43  ;;  %v10557_v44 = vld [vmem:[#allocation91_spill] sm:$0xff]  ;;  %v1947_v53 = vsub.f32 %v10558_v24, %v7514_v18  ;;  %v2063_v52 = vmul.f32 1.442695, %v1927_v14  ;;  %v10562_v43 = vld [vmem:[#allocation82_spill] sm:$0xff]  ;;  %v10565_v24 = vld [vmem:[#allocation81_spill] sm:$0xff] }
 0x30b   : > { %2398 = vmatprep.subr.mxu1 %v10553_v9  ;;  %v1946_v35 = vsub.f32 %v10557_v44, %v7517_v63  ;;  %5858 = vpow2.f32 %v2055_v25  ;;  %v10559_v9 = vld [vmem:[#allocation85_spill] sm:$0xff]  ;;  %v1948_v21 = vsub.f32 %v10560_v38, %v7517_v63  ;;  %v2065_v17 = vmul.f32 1.442695, %v1928_v11  ;;  %v10564_v25 = vld [vmem:[#allocation36_spill] sm:$0xff]  ;;  %v7638_v38 = vpop.eup %5848 }
 0x30c   : > { %2399 = vmatpush1.msra.mxu1 %v10556_v27  ;;  %5860 = vpow2.f32 %v2057_v57  ;;  %v10563_v27 = vld [vmem:[#allocation99_spill] sm:$0xff]  ;;  %v2067_v2 = vmul.f32 1.442695, %v1929_v6  ;;  %10566 = vst [vmem:[#allocation37_spill] sm:$0xff] %v7638_v38  ;;  %v2069_v29 = vmul.f32 1.442695, %v1930_v13 }
 0x30d   : > { %2400 = vmatprep.subr.mxu1 %v10559_v9  ;;  %v1950_v44 = vsub.f32 %v10563_v27, %v7517_v63  ;;  %5862 = vpow2.f32 %v2059_v58  ;;  %v7636_v9 = vpop.f32.mrf.mxu0  ;;  %v2071_v18 = vmul.f32 1.442695, %v1931_v0  ;;  %v2073_v11 = vmul.f32 1.442695, %v1932_v39  ;;  %v10567_v57 = vld [vmem:[#allocation78_spill] sm:$0xff]  ;;  %v10568_v6 = vld [vmem:[#allocation77_spill] sm:$0xff] }
 0x30e   : > { %2401 = vmatpush1.msra.mxu1 %v10562_v43  ;;  %5864 = vpow2.f32 %v2061_v40  ;;  %v2075_v43 = vmul.f32 1.442695, %v1933_v10  ;;  %v2077_v63 = vmul.f32 1.442695, %v1934_v34  ;;  %v2079_v58 = vmul.f32 1.442695, %v1935_v36 }
 0x30f   : > { %2402 = vmatprep.subr.mxu1 %v10565_v24  ;;  %5866 = vpow2.f32 %v2063_v52  ;;  %v2081_v27 = vmul.f32 1.442695, %v1936_v49  ;;  %v2083_v14 = vmul.f32 1.442695, %v1937_v31  ;;  %v2085_v24 = vmul.f32 1.442695, %v1938_v45  ;;  %v7644_v39 = vpop.f32.mrf.mxu0 }
 0x310   : > { %2403 = vmatpush1.msra.mxu1 %v10567_v57  ;;  %5868 = vpow2.f32 %v2065_v17  ;;  %v2087_v7 = vmul.f32 1.442695, %v1939_v8  ;;  %v2089_v40 = vmul.f32 1.442695, %v1940_v42  ;;  %v2091_v13 = vmul.f32 1.442695, %v1941_v26 }
 0x311   : > { %2404 = vmatprep.subr.mxu1 %v10568_v6  ;;  %5870 = vpow2.f32 %v2067_v2  ;;  %v10570_v0 = vld [vmem:[#allocation29_spill] sm:$0xff]  ;;  %v2093_v10 = vmul.f32 1.442695, %v1942_v46  ;;  %v7646_v34 = vmul.f32 1.442695, %v1943_v5  ;;  %v10571_v52 = vmov 0.0   ;;  %v7673_v17 = vpop.f32.mrf.mxu0 }
 0x312   : > { %2405 = vmatpush1.msra.mxu1 %v10569_v55  ;;  %5872 = vpow2.f32 %v2069_v29  ;;  %v7648_v36 = vmul.f32 1.442695, %v1944_v60  ;;  %v7651_v49 = vmul.f32 1.442695, %v1945_v23  ;;  %v7653_v55 = vmul.f32 1.442695, %v1946_v35 }
 0x313   : > { %2439 = vmatmul.mubr.f32.vlgmr.msra.gmra.mxu1 %v10570_v0  ;;  %5874 = vpow2.f32 %v2071_v18  ;;  %v7655_v2 = vmul.f32 1.442695, %v1947_v53  ;;  %v7657_v31 = vpop.eup %5850  ;;  %v7659_v45 = vmul.f32 1.442695, %v1948_v21  ;;  %v7661_v8 = vmul.f32 1.442695, %v1949_v30  ;;  %v7706_v33 = vpop.f32.mrf.mxu0 }
 0x314   : > { %2580 = vmatprep.mubr.f32.mxu1 %v10571_v52  ;;  %10572 = vst [vmem:[#allocation39_spill] sm:$0xff] %v7657_v31  ;;  %5876 = vpow2.f32 %v2073_v11  ;;  %v7663_v42 = vmul.f32 1.442695, %v1950_v44  ;;  %v10574_v46 = vld [vmem:[#allocation38_spill] sm:$0xff]  ;;  %v10575_v60 = vld [vmem:[#allocation40_spill] sm:$0xff]  ;;  %v10580_v11 = vld [vmem:[#allocation49_spill] sm:$0xff] }
 0x315   : > { %v7665_v26 = vpop.eup %5852  ;;  %5878 = vpow2.f32 %v2075_v43  ;;  %v10576_v35 = vld [vmem:[#allocation42_spill] sm:$0xff]  ;;  %v10578_v30 = vld [vmem:[#allocation44_spill] sm:$0xff]  ;;  %v10582_v0 = vld [vmem:[#allocation51_spill] sm:$0xff]  ;;  %10590 = vst [vmem:[#allocation53_spill] sm:$0xff] %v7706_v33 }
 0x316   : > { %10573 = vst [vmem:[#allocation41_spill] sm:$0xff] %v7665_v26  ;;  %v7675_v21 = vpop.eup %5854  ;;  %5880 = vpow2.f32 %v2077_v63  ;;  %v10579_v29 = vld [vmem:[#allocation46_spill] sm:$0xff] }
 0x317   : > { %10577 = vst [vmem:[#allocation43_spill] sm:$0xff] %v7675_v21  ;;  %v7683_v43 = vpop.eup %5856  ;;  %5882 = vpow2.f32 %v2079_v58  ;;  %v2591_v6 = vadd.f32 %v7675_v21, %v7657_v31  ;;  %v10583_v63 = vld [vmem:[#allocation54_spill] sm:$0xff]  ;;  %v10586_v58 = vld [vmem:[#allocation59_spill] sm:$0xff]  ;;  %v10596_v21 = vld [vmem:[#allocation65_spill] sm:$0xff] }
 0x318   : > { %10581 = vst [vmem:[#allocation45_spill] sm:$0xff] %v7683_v43  ;;  %v7691_v5 = vpop.eup %5858  ;;  %5884 = vpow2.f32 %v2081_v27  ;;  %v2612_v18 = vadd.f32 %v7683_v43, %v7665_v26  ;;  %v10585_v57 = vld [vmem:[#allocation58_spill] sm:$0xff]  ;;  %v10595_v27 = vld [vmem:[#allocation64_spill] sm:$0xff]  ;;  %v10599_v31 = vld [vmem:[#allocation67_spill] sm:$0xff] }
 0x319   : > { %10584 = vst [vmem:[#allocation48_spill] sm:$0xff] %v7691_v5  ;;  %v7699_v12 = vpop.eup %5860  ;;  %5886 = vpow2.f32 %v2083_v14  ;;  %v2592_v53 = vadd.f32 %v7691_v5, %v2591_v6  ;;  %v10593_v14 = vld [vmem:[#allocation63_spill] sm:$0xff]  ;;  %v10598_v52 = vld [vmem:[#allocation66_spill] sm:$0xff]  ;;  %v10601_v26 = vld [vmem:[#allocation68_spill] sm:$0xff] }
 0x31a   : > { %10587 = vst [vmem:[#allocation50_spill] sm:$0xff] %v7699_v12  ;;  %v7708_v62 = vpop.eup %5862  ;;  %5888 = vpow2.f32 %v2085_v24  ;;  %v2613_v44 = vadd.f32 %v7699_v12, %v2612_v18  ;;  %v10602_v43 = vld [vmem:[#allocation69_spill] sm:$0xff]  ;;  %v10605_v12 = vld [vmem:[#allocation71_spill] sm:$0xff] }
 0x31b   : > { %10591 = vst [vmem:[#allocation57_spill] sm:$0xff] %v7708_v62  ;;  %v7715_v6 = vpop.eup %5864  ;;  %5890 = vpow2.f32 %v2087_v7  ;;  %v2593_v23 = vadd.f32 %v7708_v62, %v2592_v53  ;;  %v10618_v62 = vld [vmem:[#allocation96_spill] sm:$0xff] }
 0x31c   : > { %10594 = vst [vmem:[#allocation70_spill] sm:$0xff] %v7715_v6  ;;  %v7722_v24 = vpop.eup %5866  ;;  %5892 = vpow2.f32 %v2089_v40  ;;  %v2614_v18 = vadd.f32 %v7715_v6, %v2613_v44  ;;  %v7736_v40 = vpop.f32.mrf.mxu0  ;;  %v10611_v6 = vld [vmem:[#allocation84_spill] sm:$0xff] }
 0x31d   : > { %10597 = vst [vmem:[#allocation72_spill] sm:$0xff] %v7722_v24  ;;  %v7729_v7 = vpop.eup %5868  ;;  %5894 = vpow2.f32 %v2091_v13  ;;  %v2594_v53 = vadd.f32 %v7722_v24, %v2593_v23  ;;  %10603 = vst [vmem:[#allocation75_spill] sm:$0xff] %v7736_v40  ;;  %v10606_v13 = vld [vmem:[#allocation73_spill] sm:$0xff] }
 0x31e   : > { %10600 = vst [vmem:[#allocation90_spill] sm:$0xff] %v7729_v7  ;;  %v7738_v44 = vpop.eup %5870  ;;  %5896 = vpow2.f32 %v2093_v10  ;;  %v2615_v5 = vadd.f32 %v7729_v7, %v2614_v18  ;;  %v10612_v7 = vld [vmem:[#allocation88_spill] sm:$0xff]  ;;  %v7769_v40 = vpop.f32.mrf.mxu0 }
 0x31f   : > { %10604 = vst [vmem:[#allocation79_spill] sm:$0xff] %v7738_v44  ;;  %v7745_v23 = vpop.eup %5872  ;;  %5898 = vpow2.f32 %v7646_v34  ;;  %v2595_v37 = vadd.f32 %v7738_v44, %v2594_v53  ;;  %v10614_v10 = vld [vmem:[#allocation92_spill] sm:$0xff]  ;;  %v10615_v44 = vld [vmem:[#allocation94_spill] sm:$0xff]  ;;  %10616 = vst [vmem:[#allocation86_spill] sm:$0xff] %v7769_v40 }
 0x320   : > { %10607 = vst [vmem:[#allocation89_spill] sm:$0xff] %v7745_v23  ;;  %v7753_v38 = vpop.eup %5874  ;;  %5900 = vpow2.f32 %v7648_v36  ;;  %v2616_v18 = vadd.f32 %v7745_v23, %v2615_v5 }
 0x321   : > { %10610 = vst [vmem:[#allocation83_spill] sm:$0xff] %v7753_v38  ;;  %v7761_v50 = vpop.eup %5876  ;;  %5902 = vpow2.f32 %v7651_v49  ;;  %v2596_v53 = vadd.f32 %v7753_v38, %v2595_v37  ;;  %v10619_v49 = vld [vmem:[#allocation98_spill] sm:$0xff]  ;;  %v10624_v37 = vsub.f32 %v10574_v46, %v7549_v51  ;;  %v7808_v46 = vpop.f32.mrf.mxu0 }
 0x322   : > { %10613 = vst [vmem:[#allocation87_spill] sm:$0xff] %v7761_v50  ;;  %v7771_v5 = vpop.eup %5878  ;;  %5904 = vpow2.f32 %v7653_v55  ;;  %v2617_v34 = vadd.f32 %v7761_v50, %v2616_v18  ;;  %v10622_v55 = vsub.f32 %v10564_v25, %v7531_v3 }
 0x323   : > { %10617 = vst [vmem:[#allocation91_spill] sm:$0xff] %v7771_v5  ;;  %v7779_v38 = vpop.eup %5880  ;;  %5906 = vpow2.f32 %v7655_v2  ;;  %v2597_v36 = vadd.f32 %v7771_v5, %v2596_v53  ;;  %v2241_v50 = vmul.f32 1.442695, %v10624_v37  ;;  %v10625_v2 = vsub.f32 %v10575_v60, %v7531_v3 }
 0x324   : > { %10620 = vst [vmem:[#allocation93_spill] sm:$0xff] %v7779_v38  ;;  %v2239_v33 = vmul.f32 1.442695, %v10622_v55  ;;  %v7788_v18 = vpop.eup %5882  ;;  %5908 = vpow2.f32 %v7659_v45  ;;  %v2618_v23 = vadd.f32 %v7779_v38, %v2617_v34  ;;  %v10626_v55 = vsub.f32 %v10576_v35, %v7549_v51 }
 0x325   : > { %10623 = vst [vmem:[#allocation85_spill] sm:$0xff] %v7788_v18  ;;  %v2243_v53 = vmul.f32 1.442695, %v10625_v2  ;;  %v7798_v5 = vpop.eup %5884  ;;  %5910 = vpow2.f32 %v7661_v8  ;;  %v2598_v25 = vadd.f32 %v7788_v18, %v2597_v36  ;;  %v10627_v34 = vsub.f32 %v10578_v30, %v7531_v3 }
 0x326   : > { %v2245_v45 = vmul.f32 1.442695, %v10626_v55  ;;  %v7810_v37 = vpop.eup %5886  ;;  %5912 = vpow2.f32 %v7663_v42  ;;  %v2619_v60 = vadd.f32 %v7798_v5, %v2618_v23  ;;  %v10628_v8 = vsub.f32 %v10579_v29, %v7549_v51 }
 0x327   : > { %v2247_v40 = vmul.f32 1.442695, %v10627_v34  ;;  %v10629_v35 = vsub.f32 %v10580_v11, %v7531_v3  ;;  %v7820_v55 = vpop.eup %5888  ;;  %v2599_v30 = vadd.f32 %v7810_v37, %v2598_v25  ;;  %v10630_v34 = vsub.f32 %v10582_v0, %v7549_v51 }
 0x328   : > { %v2249_v36 = vmul.f32 1.442695, %v10628_v8  ;;  %v10631_v42 = vsub.f32 %v10583_v63, %v7531_v3  ;;  %v10632_v29 = vsub.f32 %v10585_v57, %v7549_v51  ;;  %v7832_v18 = vpop.eup %5890  ;;  %v2620_v11 = vadd.f32 %v7820_v55, %v2619_v60 }
 0x329   : > { %v2251_v2 = vmul.f32 1.442695, %v10629_v35  ;;  %v2253_v38 = vmul.f32 1.442695, %v10630_v34  ;;  %5914 = vpow2.f32 %v2239_v33  ;;  %v10633_v25 = vsub.f32 %v10586_v58, %v7531_v3  ;;  %v7841_v24 = vpop.eup %5892 }
 0x32a   : > { %v2255_v23 = vmul.f32 1.442695, %v10631_v42  ;;  %v2257_v8 = vmul.f32 1.442695, %v10632_v29  ;;  %v10634_v0 = vsub.f32 %v10588_v32, %v7549_v51  ;;  %v2600_v63 = vadd.f32 %v7832_v18, %v2599_v30  ;;  %v7850_v29 = vpop.f32.mrf.mxu0  ;;  %v7852_v58 = vpop.eup %5894 }
 0x32b   : > { %v2259_v35 = vmul.f32 1.442695, %v10633_v25  ;;  %5916 = vpow2.f32 %v2241_v50  ;;  %v10635_v57 = vsub.f32 %v10589_v47, %v7531_v3  ;;  %v10636_v33 = vsub.f32 %v10592_v15, %v7549_v51 }
 0x32c   : > { %v2261_v34 = vmul.f32 1.442695, %v10634_v0  ;;  %v2621_v32 = vadd.f32 %v7841_v24, %v2620_v11  ;;  %5918 = vpow2.f32 %v2243_v53  ;;  %v10637_v25 = vsub.f32 %v10593_v14, %v7531_v3  ;;  %v7863_v0 = vpop.eup %5896 }
 0x32d   : > { %v2263_v42 = vmul.f32 1.442695, %v10635_v57  ;;  %v2265_v60 = vmul.f32 1.442695, %v10636_v33  ;;  %v10638_v50 = vsub.f32 %v10595_v27, %v7549_v51  ;;  %v2601_v15 = vadd.f32 %v7852_v58, %v2600_v63  ;;  %v7876_v11 = vpop.eup %5898 }
 0x32e   : > { %v2267_v30 = vmul.f32 1.442695, %v10637_v25  ;;  %5920 = vpow2.f32 %v2245_v45  ;;  %v10639_v57 = vsub.f32 %v10596_v21, %v7531_v3  ;;  %v10640_v53 = vsub.f32 %v10598_v52, %v7549_v51  ;;  %v7886_v45 = vpop.eup %5900 }
 0x32f   : > { %v7861_v47 = vmul.f32 1.442695, %v10638_v50  ;;  %v2622_v27 = vadd.f32 %v7863_v0, %v2621_v32  ;;  %5922 = vpow2.f32 %v2247_v40  ;;  %v10641_v25 = vsub.f32 %v10599_v31, %v7531_v3  ;;  %v7898_v32 = vpop.f32.mrf.mxu0 }
 0x330   : > { %v7869_v33 = vmul.f32 1.442695, %v10639_v57  ;;  %v7874_v14 = vmul.f32 1.442695, %v10640_v53  ;;  %v1728_v21 = vmax.f32 %v7534_v28, %v7502_v20  ;;  %v2602_v50 = vadd.f32 %v7876_v11, %v2601_v15  ;;  %10644 = vst [vmem:[#allocation95_spill] sm:$0xff] %v7898_v32  ;;  %v7900_v53 = vpop.eup %5902 }
 0x331   : > { %v7882_v63 = vmul.f32 1.442695, %v10641_v25  ;;  %5924 = vpow2.f32 %v2249_v36  ;;  %v10642_v52 = vsub.f32 %v10601_v26, %v7549_v51  ;;  %v10643_v40 = vmax.f32 %v7522_v1, %v7490_v19  ;;  %v5905_v25 = vpop.eup %5904 }
 0x332   : > { %v2623_v28 = vadd.f32 %v7886_v45, %v2622_v27  ;;  %5926 = vpow2.f32 %v2251_v2  ;;  %v10645_v36 = vsub.f32 %v10602_v43, %v7531_v3  ;;  %v1729_v26 = vmax.f32 %v1728_v21, %v7524_v48  ;;  %v5907_v27 = vpop.eup %5906 }
 0x333   : > { %v7892_v57 = vmul.f32 1.442695, %v10642_v52  ;;  %v1708_v31 = vmax.f32 %v10643_v40, %v7510_v59  ;;  %v2603_v52 = vadd.f32 %v7900_v53, %v2602_v50  ;;  %5928 = vpow2.f32 %v2253_v38  ;;  %v5909_v48 = vpop.eup %5908 }
 0x334   : > { %v7906_v15 = vmul.f32 1.442695, %v10645_v36  ;;  %v10646_v1 = vsub.f32 %v10605_v12, %v7549_v51  ;;  %v2624_v2 = vadd.f32 %v5905_v25, %v2623_v28  ;;  %5930 = vpow2.f32 %v2255_v23  ;;  %v5911_v23 = vpop.eup %5910 }
 0x335   : > { %v1709_v59 = vmax.f32 %v1708_v31, %v7538_v54  ;;  %v10647_v43 = vsub.f32 %v10606_v13, %v7531_v3  ;;  %v1730_v21 = vmax.f32 %v1729_v26, %v7557_v22  ;;  %v2604_v50 = vadd.f32 %v5907_v27, %v2603_v52 }
 0x336   : > { %v7913_v40 = vmul.f32 1.442695, %v10646_v1  ;;  %5932 = vpow2.f32 %v2257_v8  ;;  %v10648_v12 = vsub.f32 %v10608_v16, %v7549_v51  ;;  %v7928_v1 = vpop.f32.mrf.mxu0  ;;  %v2625_v28 = vadd.f32 %v5909_v48, %v2624_v2  ;;  %v5913_v8 = vpop.eup %5912 }
 0x337   : > { %v7919_v36 = vmul.f32 1.442695, %v10647_v43  ;;  %v1710_v31 = vmax.f32 %v1709_v59, %v7576_v61  ;;  %10649 = vst [vmem:[#allocation97_spill] sm:$0xff] %v7928_v1  ;;  %5934 = vpow2.f32 %v2259_v35  ;;  %v10650_v13 = vsub.f32 %v10609_v56, %v7531_v3  ;;  %2303 = vmatprep.subr.mxu0 %v5913_v8 }
 0x338   : > { %v7925_v38 = vmul.f32 1.442695, %v10648_v12  ;;  %v1731_v26 = vmax.f32 %v1730_v21, %v7588_v4  ;;  %v2605_v52 = vadd.f32 %v5911_v23, %v2604_v50  ;;  %5936 = vpow2.f32 %v2261_v34  ;;  %v7948_v21 = vpop.eup %5914  ;;  %2304 = vmatpush1.msra.mxu0 %v5911_v23 }
 0x339   : > { %v7933_v43 = vmul.f32 1.442695, %v10650_v13  ;;  %v10651_v16 = vsub.f32 %v10611_v6, %v7549_v51  ;;  %v1711_v59 = vmax.f32 %v1710_v31, %v7614_v41  ;;  %v2626_v61 = vadd.f32 %v5913_v8, %v2625_v28  ;;  %2305 = vmatprep.subr.mxu0 %v5909_v48 }
 0x33a   : > { %5938 = vpow2.f32 %v2263_v42  ;;  %v10652_v35 = vsub.f32 %v10612_v7, %v7531_v3  ;;  %v1732_v2 = vmax.f32 %v1731_v26, %v7636_v9  ;;  %v2606_v34 = vrot.slane %v2605_v52, 4  ;;  %v7956_v42 = vpop.f32.mrf.mxu0  ;;  %v7958_v7 = vpop.eup %5916  ;;  %2306 = vmatpush1.msra.mxu0 %v5907_v27 }
 0x33b   : > { %v7939_v12 = vmul.f32 1.442695, %v10651_v16  ;;  %5940 = vpow2.f32 %v2265_v60  ;;  %v10653_v6 = vsub.f32 %v10614_v10, %v7549_v51  ;;  %v1712_v31 = vmax.f32 %v1711_v59, %v7644_v39  ;;  %10654 = vst [vmem:[#allocation82_spill] sm:$0xff] %v7956_v42  ;;  %v7966_v10 = vpop.eup %5918  ;;  %v10657_v59 = vld [vmem:[#allocation53_spill] sm:$0xff]  ;;  %2307 = vmatprep.subr.mxu0 %v5905_v25 }
 0x33c   : > { %v7945_v56 = vmul.f32 1.442695, %v10652_v35  ;;  %v2627_v28 = vrot.slane %v2626_v61, 4  ;;  %5942 = vpow2.f32 %v2267_v30  ;;  %v10655_v13 = vsub.f32 %v10615_v44, %v7531_v3  ;;  %v7975_v35 = vpop.eup %5920  ;;  %2308 = vmatpush1.msra.mxu0 %v7900_v53 }
 0x33d   : > { %v7953_v50 = vmul.f32 1.442695, %v10653_v6  ;;  %v1733_v60 = vmax.f32 %v1732_v2, %v7673_v17  ;;  %v2607_v8 = vadd.f32 %v2606_v34, %v2605_v52  ;;  %5944 = vpow2.f32 %v7861_v47  ;;  %v10658_v52 = vld [vmem:[#allocation75_spill] sm:$0xff]  ;;  %v7981_v47 = vpop.trf.xlu0  ;;  %v7983_v34 = vpop.eup %5922  ;;  %2309 = vmatprep.subr.mxu0 %v7886_v45 }
 0x33e   : > { %v7963_v26 = vmul.f32 1.442695, %v10655_v13  ;;  %v10656_v23 = vsub.f32 %v10618_v62, %v7549_v51  ;;  %v1713_v30 = vmax.f32 %v1712_v31, %v10657_v59  ;;  %v2628_v44 = vadd.f32 %v2627_v28, %v2626_v61  ;;  %10659 = vst [vmem:[#allocation99_spill] sm:$0xff] %v7981_v47  ;;  %v10660_v61 = vld [vmem:[#allocation86_spill] sm:$0xff]  ;;  %v7990_v6 = vpop.f32.mrf.mxu0  ;;  %v7992_v31 = vpop.eup %5924  ;;  %2310 = vmatpush1.msra.mxu0 %v7876_v11 }
 0x33f   : > { %5946 = vpow2.f32 %v7869_v33  ;;  %v2717_v48 = vadd.f32 %v7966_v10, %v7948_v21  ;;  %v1734_v2 = vmax.f32 %v1733_v60, %v10658_v52  ;;  %v2608_v62 = vrot.slane %v2607_v8, 2  ;;  %10661 = vst [vmem:[#allocation36_spill] sm:$0xff] %v7990_v6  ;;  %v7998_v13 = vpop.eup %5926  ;;  %2311 = vmatprep.subr.mxu0 %v7863_v0 }
 0x340   : > { %v7972_v16 = vmul.f32 1.442695, %v10656_v23  ;;  %5948 = vpow2.f32 %v7874_v14  ;;  %v2738_v27 = vadd.f32 %v7975_v35, %v7958_v7  ;;  %v1714_v33 = vmax.f32 %v1713_v30, %v10660_v61  ;;  %v8004_v30 = vpop.eup %5928  ;;  %2312 = vmatpush1.msra.mxu0 %v7852_v58 }
 0x341   : > { %v2629_v25 = vrot.slane %v2628_v44, 2  ;;  %5950 = vpow2.f32 %v7882_v63  ;;  %v2718_v28 = vadd.f32 %v7983_v34, %v2717_v48  ;;  %v1735_v14 = vmax.f32 %v1734_v2, %v7808_v46  ;;  %2313 = vmatprep.subr.mxu0 %v7841_v24 }
 0x342   : > { %v2609_v60 = vadd.f32 %v2608_v62, %v2607_v8  ;;  %5952 = vpow2.f32 %v7892_v57  ;;  %v2739_v53 = vadd.f32 %v7992_v31, %v2738_v27  ;;  %v1715_v23 = vmax.f32 %v1714_v33, %v7850_v29  ;;  %v8010_v8 = vpop.eup %5930  ;;  %2314 = vmatpush1.msra.mxu0 %v7832_v18 }
 0x343   : > { %v2630_v63 = vadd.f32 %v2629_v25, %v2628_v44  ;;  %5954 = vpow2.f32 %v7906_v15  ;;  %v2719_v45 = vadd.f32 %v7998_v13, %v2718_v28  ;;  %v1736_v48 = vmax.f32 %v1735_v14, %v7898_v32  ;;  %v8016_v44 = vpop.f32.mrf.mxu0  ;;  %v8018_v15 = vpop.eup %5932  ;;  %2315 = vmatprep.subr.mxu0 %v7820_v55 }
 0x344   : > { %v2610_v57 = vrot.slane %v2609_v60, 1  ;;  %5956 = vpow2.f32 %v7913_v40  ;;  %v2740_v11 = vadd.f32 %v8004_v30, %v2739_v53  ;;  %v1716_v2 = vmax.f32 %v1715_v23, %v7928_v1  ;;  %10662 = vst [vmem:[#allocation81_spill] sm:$0xff] %v8016_v44  ;;  %v8024_v40 = vpop.trf.xlu0  ;;  %v8026_v33 = vpop.eup %5934  ;;  %2316 = vmatpush1.msra.mxu0 %v7810_v37  ;;  %v10686_v1 = vld [vmem:[#allocation48_spill] sm:$0xff] }
 0x345   : > { %v2631_v62 = vrot.slane %v2630_v63, 1  ;;  %5958 = vpow2.f32 %v7919_v36  ;;  %v2720_v0 = vadd.f32 %v8010_v8, %v2719_v45  ;;  %v1737_v27 = vmax.f32 %v1736_v48, %v7956_v42  ;;  %10663 = vst [vmem:[#allocation78_spill] sm:$0xff] %v8024_v40  ;;  %v8032_v36 = vpop.eup %5936  ;;  %v1615_v45 = vld [vmem:[#allocation6] sm:$0x3]  ;;  %2317 = vmatprep.subr.mxu0 %v7798_v5  ;;  %v10683_v40 = vld [vmem:[#allocation111_spill] sm:$0xff] }
 0x346   : > { %v2611_v58 = vadd.f32 %v2610_v57, %v2609_v60  ;;  %5960 = vpow2.f32 %v7925_v38  ;;  %v2741_v25 = vadd.f32 %v8018_v15, %v2740_v11  ;;  %v1717_v28 = vmax.f32 %v1716_v2, %v7990_v6  ;;  %v10667_v2 = vld [vmem:[#allocation85_spill] sm:$0xff] }
 0x347   : > { %v2632_v14 = vadd.f32 %v2631_v62, %v2630_v63  ;;  %5962 = vpow2.f32 %v7933_v43  ;;  %v2721_v24 = vadd.f32 %v8026_v33, %v2720_v0  ;;  %v1738_v53 = vmax.f32 %v1737_v27, %v8016_v44  ;;  %v8038_v60 = vpop.eup %5938  ;;  %2318 = vmatpush1.msra.mxu0 %v10667_v2 }
 0x348   : > { %5964 = vpow2.f32 %v7939_v12  ;;  %v10664_v18 = vsub.f32 %v10619_v49, %v7531_v3  ;;  %v2742_v23 = vadd.f32 %v8032_v36, %v2741_v25  ;;  %v1718_v63 = vrot.slane %v1717_v28, 4  ;;  %v8046_v43 = vpop.eup %5940  ;;  %v10665_v3 = vld [vmem:[#allocation100_spill] sm:$0xff]  ;;  %v8065_v25 = vpop.trf.xlu0 }
 0x349   : > { %v2767_v48 = vcombine.low %v2611_v58, %v2632_v14  ;;  %5966 = vpow2.f32 %v7945_v56  ;;  %v2722_v55 = vadd.f32 %v8038_v60, %v2721_v24  ;;  %v1739_v12 = vrot.slane %v1738_v53, 4  ;;  %v8051_v57 = vpop.eup %5942  ;;  %v10668_v56 = vld [vmem:[#allocation47_spill] sm:$0xff]  ;;  %v10669_v58 = vld [vmem:[#allocation93_spill] sm:$0xff]  ;;  %10670 = vst [vmem:[#allocation77_spill] sm:$0xff] %v8065_v25 }
 0x34a   : > { %v2299_v38 = vmul.f32 1.442695, %v10664_v18  ;;  %5968 = vpow2.f32 %v7953_v50  ;;  %v10666_v49 = vsub.f32 %v10665_v3, %v7549_v51  ;;  %v2743_v11 = vadd.f32 %v8046_v43, %v2742_v23  ;;  %v8059_v0 = vpop.eup %5944  ;;  %2319 = vmatprep.subr.mxu0 %v10669_v58  ;;  %v10671_v14 = vld [vmem:[#allocation37_spill] sm:$0xff]  ;;  %v10672_v18 = vld [vmem:[#allocation91_spill] sm:$0xff] }
 0x34b   : > { %v1719_v62 = vmax.f32 %v1717_v28, %v1718_v63  ;;  %v2774_v27 = vrot.slane %v2767_v48, %v10668_v56  ;;  %5970 = vpow2.f32 %v7963_v26  ;;  %v2723_v5 = vadd.f32 %v8051_v57, %v2722_v55  ;;  %2320 = vmatpush1.msra.mxu0 %v10672_v18  ;;  %v10673_v48 = vld [vmem:[#allocation87_spill] sm:$0xff]  ;;  %v10682_v25 = vld [vmem:[#allocation57_spill] sm:$0xff] }
 0x34c   : > { %v2301_v37 = vmul.f32 1.442695, %v10666_v49  ;;  %v1740_v50 = vmax.f32 %v1738_v53, %v1739_v12  ;;  %v8067_v51 = vpop.eup %5946  ;;  %v2587_v24 = vmul.f32 %v10671_v14, %v1615_v45  ;;  %5972 = vpow2.f32 %v7972_v16  ;;  %2321 = vmatprep.subr.mxu0 %v10673_v48  ;;  %v10674_v3 = vld [vmem:[#allocation83_spill] sm:$0xff]  ;;  %v10681_v14 = vld [vmem:[#allocation70_spill] sm:$0xff] }
 0x34d   : > { %v2744_v28 = vadd.f32 %v8059_v0, %v2743_v11  ;;  %v1720_v23 = vrot.slane %v1719_v62, 2  ;;  %v8073_v63 = vpop.eup %5948  ;;  %v2781_v26 = vrot.slane %v2774_v27, %v10668_v56  ;;  %5974 = vpow2.f32 %v2299_v38  ;;  %2322 = vmatpush1.msra.mxu0 %v10674_v3  ;;  %v10675_v27 = vld [vmem:[#allocation89_spill] sm:$0xff]  ;;  %v10676_v48 = vld [vmem:[#allocation79_spill] sm:$0xff] }
 0x34e   : > { %v2724_v53 = vadd.f32 %v8067_v51, %v2723_v5  ;;  %v1741_v55 = vrot.slane %v1740_v50, 2  ;;  %v8078_v12 = vpop.eup %5950  ;;  %5976 = vpow2.f32 %v2301_v37  ;;  %2323 = vmatprep.subr.mxu0 %v10675_v27 }
 0x34f   : > { %v2745_v16 = vadd.f32 %v8073_v63, %v2744_v28  ;;  %v1721_v45 = vmax.f32 %v1719_v62, %v1720_v23  ;;  %v8082_v49 = vpop.eup %5952  ;;  %v2831_v11 = vadd.f32 %v2781_v26, %v2587_v24  ;;  %2324 = vmatpush1.msra.mxu0 %v10676_v48  ;;  %v10678_v23 = vld [vmem:[#allocation90_spill] sm:$0xff]  ;;  %v8096_v26 = vpop.trf.xlu0 }
 0x350   : > { %v2725_v2 = vadd.f32 %v8078_v12, %v2724_v53  ;;  %v1742_v38 = vmax.f32 %v1740_v50, %v1741_v55  ;;  %v8086_v5 = vpop.eup %5954  ;;  %2325 = vmatprep.subr.mxu0 %v10678_v23  ;;  %10679 = vst [vmem:[#allocation74_spill] sm:$0xff] %v8096_v26  ;;  %v10680_v55 = vld [vmem:[#allocation72_spill] sm:$0xff]  ;;  %v10684_v26 = vld [vmem:[#allocation109_spill] sm:$0xff] }
 0x351   : > { %v2746_v58 = vadd.f32 %v8082_v49, %v2745_v16  ;;  %v1722_v18 = vrot.slane %v1721_v45, 1  ;;  %v8090_v37 = vpop.eup %5956  ;;  %2835 = vst.msk [vmem:[#allocation6] sm:$0x3] %vm6885_vm2, %v2831_v11  ;;  %2326 = vmatpush1.msra.mxu0 %v10680_v55  ;;  %v1866_v44 = vsub.f32 %v10684_v26, %v10683_v40  ;;  %v10689_v40 = vld [vmem:[#allocation43_spill] sm:$0xff] }
 0x352   : > { %v2726_v28 = vadd.f32 %v8086_v5, %v2725_v2  ;;  %v1743_v24 = vrot.slane %v1742_v38, 1  ;;  %v8098_v50 = vpop.eup %5958  ;;  %2327 = vmatprep.subr.mxu0 %v10681_v14 }
 0x353   : > { %v2747_v53 = vadd.f32 %v8090_v37, %v2746_v58  ;;  %v5961_v16 = vpop.eup %5960  ;;  %v1723_v27 = vmax.f32 %v1721_v45, %v1722_v18  ;;  %2328 = vmatpush1.msra.mxu0 %v10682_v25  ;;  %v10685_v58 = vld [vmem:[#allocation50_spill] sm:$0xff]  ;;  %v10687_v18 = vld [vmem:[#allocation45_spill] sm:$0xff] }
 0x354   : > { %v2727_v3 = vadd.f32 %v8098_v50, %v2726_v28  ;;  %v1744_v48 = vmax.f32 %v1742_v38, %v1743_v24  ;;  %v5963_v11 = vpop.eup %5962  ;;  %2329 = vmatprep.subr.mxu0 %v10685_v58  ;;  %v8111_v28 = vpop.trf.xlu0 }
 0x355   : > { %v2748_v2 = vadd.f32 %v5961_v16, %v2747_v53  ;;  %v5965_v23 = vpop.eup %5964  ;;  %2330 = vmatpush1.msra.mxu0 %v10686_v1  ;;  %10688 = vst [vmem:[#allocation29_spill] sm:$0xff] %v8111_v28  ;;  %v8113_v53 = vld [vmem:[#allocation5 + $0x4] sm:$0x3]  ;;  %v10690_v1 = vld [vmem:[#allocation41_spill] sm:$0xff] }
 0x356   : > { %v2728_v6 = vadd.f32 %v5963_v11, %v2727_v3  ;;  %v1825_v42 = vcombine.low %v1723_v27, %v1744_v48  ;;  %v5967_v55 = vpop.eup %5966  ;;  %2331 = vmatprep.subr.mxu0 %v10687_v18  ;;  %v1873_v3 = vmul.f32 1.442695, %v1866_v44 }
 0x357   : > { %v2749_v47 = vadd.f32 %v5965_v23, %v2748_v2  ;;  %v5969_v45 = vpop.eup %5968  ;;  %2332 = vmatpush1.msra.mxu0 %v10689_v40  ;;  %v10693_v40 = vmov 0.0  }
 0x358   : > { %v2729_v38 = vadd.f32 %v5967_v55, %v2728_v6  ;;  %v1832_v14 = vrot.slane %v1825_v42, %v10668_v56  ;;  %v5971_v25 = vpop.eup %5970  ;;  %2333 = vmatprep.subr.mxu0 %v10690_v1  ;;  %v10691_v42 = vld [vmem:[#allocation39_spill] sm:$0xff]  ;;  %5978 = vpow2.f32 %v1873_v3 }
 0x359   : > { %v2750_v24 = vadd.f32 %v5969_v45, %v2749_v47  ;;  %v5973_v26 = vpop.eup %5972  ;;  %2334 = vmatpush1.msra.mxu0 %v10691_v42  ;;  %v10692_v47 = vld [vmem:[#allocation27_spill] sm:$0xff] }
 0x35a   : > { %v2730_v27 = vadd.f32 %v5971_v25, %v2729_v38  ;;  %v1839_v48 = vrot.slane %v1832_v14, %v10668_v56  ;;  %v5975_v6 = vpop.eup %5974  ;;  %2368 = vmatmul.mubr.f32.vlgmr.msra.gmra.mxu0 %v10692_v47  ;;  %v8127_v38 = vpop.trf.xlu0 }
 0x35b   : > { %v2751_v2 = vadd.f32 %v5973_v26, %v2750_v24  ;;  %v5977_v58 = vpop.eup %5976  ;;  %2509 = vmatprep.mubr.f32.mxu0 %v10693_v40 }
 0x35c   : > { %v2731_v18 = vadd.f32 %v5975_v6, %v2730_v27  ;;  %v8120_v28 = vmax.f32 %v8113_v53, %v1839_v48  ;;  %2516 = vmatprep.subr.mxu1 %v5977_v58 }
 0x35d   : > { %v2752_v32 = vadd.f32 %v5977_v58, %v2751_v2  ;;  %2517 = vmatpush1.msra.mxu1 %v5975_v6  ;;  %v10694_v2 = vld [vmem:[#allocation55_spill] sm:$0xff]  ;;  %v10695_v6 = vld [vmem:[#allocation56_spill] sm:$0xff] }
 0x35e   : > { %v2732_v44 = vrot.slane %v2731_v18, 4  ;;  %2917 = vst.msk [vmem:[#allocation5 + $0x4] sm:$0x3] %vm6885_vm2, %v8120_v28  ;;  %2518 = vmatprep.subr.mxu1 %v5973_v26  ;;  %v8131_v3 = vrot.slane %v8120_v28, %v10694_v2  ;;  %v8135_v42 = vrot.slane %v8120_v28, %v10695_v6  ;;  %v8137_v47 = vpop.trf.xlu0 }
 0x35f   : > { %v2753_v14 = vrot.slane %v2752_v32, 4  ;;  %2519 = vmatpush1.msra.mxu1 %v5971_v25  ;;  %v10697_v25 = vld [vmem:[#allocation102_spill] sm:$0xff] }
 0x360   : > { %v2733_v24 = vadd.f32 %v2732_v44, %v2731_v18  ;;  %2520 = vmatprep.subr.mxu1 %v5969_v45  ;;  %v1984_v18 = vsub.f32 %v10697_v25, %v8135_v42  ;;  %v10698_v44 = vld [vmem:[#allocation52_spill] sm:$0xff]  ;;  %v10702_v25 = vld [vmem:[#allocation106_spill] sm:$0xff] }
 0x361   : > { %v2754_v27 = vadd.f32 %v2753_v14, %v2752_v32  ;;  %2521 = vmatpush1.msra.mxu1 %v5967_v55  ;;  %v1985_v14 = vsub.f32 %v10698_v44, %v8131_v3 }
 0x362   : > { %v2734_v48 = vrot.slane %v2733_v24, 2  ;;  %2522 = vmatprep.subr.mxu1 %v5965_v23  ;;  %v10696_v23 = vld [vmem:[#allocation101_spill] sm:$0xff] }
 0x363   : > { %v2755_v1 = vrot.slane %v2754_v27, 2  ;;  %2523 = vmatpush1.msra.mxu1 %v5963_v11  ;;  %v1983_v45 = vsub.f32 %v10696_v23, %v8131_v3 }
 0x364   : > { %v2735_v58 = vadd.f32 %v2734_v48, %v2733_v24  ;;  %2524 = vmatprep.subr.mxu1 %v5961_v16  ;;  %v10699_v16 = vld [vmem:[#allocation103_spill] sm:$0xff]  ;;  %v1618_v48 = vld [vmem:[#allocation6 + $0x6] sm:$0x3] }
 0x365   : > { %v2756_v26 = vadd.f32 %v2755_v1, %v2754_v27  ;;  %2525 = vmatpush1.msra.mxu1 %v8098_v50  ;;  %v1986_v24 = vsub.f32 %v10699_v16, %v8135_v42  ;;  %v10701_v1 = vld [vmem:[#allocation105_spill] sm:$0xff] }
 0x366   : > { %v2736_v32 = vrot.slane %v2735_v58, 1  ;;  %2526 = vmatprep.subr.mxu1 %v8090_v37  ;;  %v10700_v37 = vld [vmem:[#allocation104_spill] sm:$0xff]  ;;  %v1988_v23 = vsub.f32 %v10701_v1, %v8135_v42 }
 0x367   : > { %v2757_v55 = vrot.slane %v2756_v26, 1  ;;  %2527 = vmatpush1.msra.mxu1 %v8086_v5  ;;  %v1987_v50 = vsub.f32 %v10700_v37, %v8131_v3  ;;  %v8160_v5 = vpop.eup %5978  ;;  %v2181_v37 = vmul.f32 1.442695, %v1986_v24 }
 0x368   : > { %v2737_v11 = vadd.f32 %v2736_v32, %v2735_v58  ;;  %2528 = vmatprep.subr.mxu1 %v8082_v49  ;;  %v1989_v58 = vsub.f32 %v10702_v25, %v8131_v3  ;;  %v8158_v32 = vpop.trf.xlu0  ;;  %v2175_v49 = vmul.f32 1.442695, %v1983_v45  ;;  %v10704_v25 = vld [vmem:[#allocation108_spill] sm:$0xff]  ;;  %v10705_v45 = vld [vmem:[#allocation110_spill] sm:$0xff] }
 0x369   : > { %v2758_v27 = vadd.f32 %v2757_v55, %v2756_v26  ;;  %2529 = vmatpush1.msra.mxu1 %v8078_v12  ;;  %v2177_v26 = vmul.f32 1.442695, %v1984_v18  ;;  %v2179_v55 = vmul.f32 1.442695, %v1985_v14  ;;  %v10703_v12 = vld [vmem:[#allocation107_spill] sm:$0xff]  ;;  %v1991_v6 = vsub.f32 %v10704_v25, %v8131_v3 }
 0x36a   : > { %2530 = vmatprep.subr.mxu1 %v8073_v63  ;;  %v1990_v16 = vsub.f32 %v10703_v12, %v8135_v42  ;;  %5980 = vpow2.f32 %v2175_v49  ;;  %v2590_v63 = vmul.f32 %v8160_v5, %v1618_v48  ;;  %v2185_v18 = vmul.f32 1.442695, %v1988_v23  ;;  %v10706_v23 = vld [vmem:[#allocation113_spill] sm:$0xff] }
 0x36b   : > { %v2812_v44 = vcombine.low %v2737_v11, %v2758_v27  ;;  %2531 = vmatpush1.msra.mxu1 %v8067_v51  ;;  %v2183_v11 = vmul.f32 1.442695, %v1987_v50  ;;  %v1992_v51 = vsub.f32 %v10705_v45, %v8135_v42  ;;  %5982 = vpow2.f32 %v2177_v26  ;;  %v10708_v26 = vld [vmem:[#allocation35_spill] sm:$0xff]  ;;  %v10710_v45 = vld [vmem:[#allocation21_spill] sm:$0xff] }
 0x36c   : > { %2532 = vmatprep.subr.mxu1 %v8059_v0  ;;  %v1993_v0 = vsub.f32 %v7490_v19, %v8131_v3  ;;  %5984 = vpow2.f32 %v2179_v55  ;;  %v2187_v24 = vmul.f32 1.442695, %v1989_v58  ;;  %v1994_v27 = vsub.f32 %v7502_v20, %v8135_v42  ;;  %v8181_v50 = vpop.trf.xlu0  ;;  %v10707_v19 = vld [vmem:[#allocation114_spill] sm:$0xff] }
 0x36d   : > { %v2819_v1 = vrot.slane %v2812_v44, %v10668_v56  ;;  %2533 = vmatpush1.msra.mxu1 %v8051_v57  ;;  %5986 = vpow2.f32 %v2181_v37  ;;  %v2189_v57 = vmul.f32 1.442695, %v1990_v16  ;;  %v2191_v44 = vmul.f32 1.442695, %v1991_v6 }
 0x36e   : > { %2534 = vmatprep.subr.mxu1 %v8046_v43  ;;  %v1995_v43 = vsub.f32 %v10706_v23, %v8131_v3  ;;  %5988 = vpow2.f32 %v2183_v11  ;;  %v1996_v58 = vsub.f32 %v10707_v19, %v8135_v42  ;;  %v1997_v20 = vsub.f32 %v7538_v54, %v8131_v3  ;;  %v10713_v23 = vld [vmem:[#allocation95_spill] sm:$0xff] }
 0x36f   : > { %v2826_v14 = vrot.slane %v2819_v1, %v10668_v56  ;;  %2535 = vmatpush1.msra.mxu1 %v8038_v60  ;;  %5990 = vpow2.f32 %v2185_v18  ;;  %v2193_v60 = vmul.f32 1.442695, %v1992_v51  ;;  %v1998_v6 = vsub.f32 %v7557_v22, %v8135_v42 }
 0x370   : > { %2536 = vmatprep.subr.mxu1 %v8032_v36  ;;  %5992 = vpow2.f32 %v2187_v24  ;;  %v2195_v36 = vmul.f32 1.442695, %v1993_v0  ;;  %v2197_v49 = vmul.f32 1.442695, %v1994_v27  ;;  %v2199_v55 = vmul.f32 1.442695, %v1995_v43 }
 0x371   : > { %v2834_v48 = vadd.f32 %v2826_v14, %v2590_v63  ;;  %2537 = vmatpush1.msra.mxu1 %v8026_v33  ;;  %5994 = vpow2.f32 %v2189_v57  ;;  %v1999_v33 = vsub.f32 %v10708_v26, %v8131_v3  ;;  %v2000_v54 = vsub.f32 %v7588_v4, %v8135_v42  ;;  %v10709_v63 = vld [vmem:[#allocation33_spill] sm:$0xff]  ;;  %v10711_v14 = vld [vmem:[#allocation20_spill] sm:$0xff]  ;;  %v10716_v26 = vld [vmem:[#allocation82_spill] sm:$0xff] }
 0x372   : > { %2538 = vmatprep.subr.mxu1 %v8018_v15  ;;  %5996 = vpow2.f32 %v2191_v44  ;;  %v2201_v12 = vmul.f32 1.442695, %v1996_v58  ;;  %v8203_v15 = vpop.trf.xlu0  ;;  %v2001_v22 = vsub.f32 %v7614_v41, %v8131_v3  ;;  %v2002_v16 = vsub.f32 %v7636_v9, %v8135_v42 }
 0x373   : > { %2838 = vst.msk [vmem:[#allocation6 + $0x6] sm:$0x3] %vm6885_vm2, %v2834_v48  ;;  %2539 = vmatpush1.msra.mxu1 %v8010_v8  ;;  %5998 = vpow2.f32 %v2193_v60  ;;  %v2203_v8 = vmul.f32 1.442695, %v1997_v20  ;;  %v2003_v4 = vsub.f32 %v7644_v39, %v8131_v3  ;;  %v2004_v41 = vsub.f32 %v7673_v17, %v8135_v42  ;;  %v10712_v48 = vld [vmem:[#allocation25_spill] sm:$0xff] }
 0x374   : > { %2540 = vmatprep.subr.mxu1 %v8004_v30  ;;  %6000 = vpow2.f32 %v2195_v36  ;;  %v2205_v30 = vmul.f32 1.442695, %v1998_v6  ;;  %v2211_v39 = vmul.f32 1.442695, %v2001_v22  ;;  %v2213_v17 = vmul.f32 1.442695, %v2002_v16 }
 0x375   : > { %2541 = vmatpush1.msra.mxu1 %v7998_v13  ;;  %6002 = vpow2.f32 %v2197_v49  ;;  %v2207_v13 = vmul.f32 1.442695, %v1999_v33  ;;  %v2215_v11 = vmul.f32 1.442695, %v2003_v4  ;;  %v2217_v18 = vmul.f32 1.442695, %v2004_v41 }
 0x376   : > { %2542 = vmatprep.subr.mxu1 %v7992_v31  ;;  %6004 = vpow2.f32 %v2199_v55  ;;  %v2209_v31 = vmul.f32 1.442695, %v2000_v54  ;;  %v8229_v25 = vpop.trf.xlu0  ;;  %v2009_v24 = vsub.f32 %v7850_v29, %v8131_v3  ;;  %v2010_v43 = vsub.f32 %v10713_v23, %v8135_v42  ;;  %v10714_v60 = vld [vmem:[#allocation97_spill] sm:$0xff]  ;;  %v10715_v6 = vld [vmem:[#allocation99_spill] sm:$0xff]  ;;  %v10718_v16 = vld [vmem:[#allocation36_spill] sm:$0xff] }
 0x377   : > { %2543 = vmatpush1.msra.mxu1 %v7983_v34  ;;  %v8214_v37 = vpop.eup %5980  ;;  %6006 = vpow2.f32 %v2201_v12  ;;  %v2005_v34 = vsub.f32 %v10657_v59, %v8131_v3  ;;  %v2007_v59 = vsub.f32 %v10660_v61, %v8131_v3  ;;  %v2011_v29 = vsub.f32 %v10714_v60, %v8131_v3  ;;  %v10717_v12 = vld [vmem:[#allocation24_spill] sm:$0xff] }
 0x378   : > { %2544 = vmatprep.subr.mxu1 %v7975_v35  ;;  %v8219_v9 = vpop.eup %5982  ;;  %6008 = vpow2.f32 %v2203_v8  ;;  %v2006_v35 = vsub.f32 %v10658_v52, %v8135_v42  ;;  %v8239_v52 = vpop.trf.xlu1  ;;  %v2012_v33 = vsub.f32 %v10716_v26, %v8135_v42  ;;  %v2227_v4 = vmul.f32 1.442695, %v2009_v24 }
 0x379   : > { %2545 = vmatpush1.msra.mxu1 %v7966_v10  ;;  %v8224_v1 = vpop.eup %5984  ;;  %6010 = vpow2.f32 %v2205_v30  ;;  %v2219_v27 = vmul.f32 1.442695, %v2005_v34  ;;  %v2223_v20 = vmul.f32 1.442695, %v2007_v59  ;;  %v2013_v30 = vsub.f32 %v10718_v16, %v8131_v3  ;;  %v10719_v34 = vld [vmem:[#allocation81_spill] sm:$0xff] }
 0x37a   : > { %2546 = vmatprep.subr.mxu1 %v7958_v7  ;;  %v8231_v10 = vpop.eup %5986  ;;  %6012 = vpow2.f32 %v2207_v13  ;;  %v2675_v7 = vadd.f32 %v8224_v1, %v8214_v37  ;;  %v2221_v44 = vmul.f32 1.442695, %v2006_v35  ;;  %v8274_v22 = vpop.trf.xlu0  ;;  %v2229_v35 = vmul.f32 1.442695, %v2010_v43  ;;  %v10721_v43 = vld [vmem:[#allocation77_spill] sm:$0xff] }
 0x37b   : > { %2547 = vmatpush1.msra.mxu1 %v7948_v21  ;;  %v8241_v51 = vpop.eup %5988  ;;  %v2008_v21 = vsub.f32 %v7808_v46, %v8135_v42  ;;  %6014 = vpow2.f32 %v2209_v31  ;;  %v2696_v61 = vadd.f32 %v8231_v10, %v8219_v9 }
 0x37c   : > { %2581 = vmatmul.mubr.f32.vlgmr.msra.gmra.mxu1 %v10709_v63  ;;  %3288 = vmatprep.subr.mxu1 %v10710_v45  ;;  %v8249_v0 = vpop.eup %5990  ;;  %6016 = vpow2.f32 %v2211_v39  ;;  %v2676_v57 = vadd.f32 %v8241_v51, %v2675_v7  ;;  %v8281_v41 = vpop.trf.xlu1  ;;  %v2014_v39 = vsub.f32 %v10719_v34, %v8135_v42  ;;  %v10720_v7 = vld [vmem:[#allocation78_spill] sm:$0xff]  ;;  %v2233_v45 = vmul.f32 1.442695, %v2012_v33 }
 0x37d   : > { %3289 = vmatpush1.msra.mxu1 %v10711_v14  ;;  %3322 = vmatprep.mubr.f32.mxu1 %v10693_v40  ;;  %v8255_v46 = vpop.eup %5992  ;;  %6018 = vpow2.f32 %v2213_v17  ;;  %v2697_v19 = vadd.f32 %v8249_v0, %v2696_v61  ;;  %v2225_v55 = vmul.f32 1.442695, %v2008_v21 }
 0x37e   : > { %3770 = vmatprep.subr.mxu1 %v10712_v48  ;;  %v8260_v58 = vpop.eup %5994  ;;  %6020 = vpow2.f32 %v2215_v11  ;;  %v2677_v36 = vadd.f32 %v8255_v46, %v2676_v57  ;;  %v2231_v11 = vmul.f32 1.442695, %v2011_v29  ;;  %v2237_v24 = vmul.f32 1.442695, %v2014_v39  ;;  %v8303_v57 = vpop.trf.xlu0 }
 0x37f   : > { %v8267_v49 = vpop.eup %5996  ;;  %6022 = vpow2.f32 %v2217_v18  ;;  %v2698_v54 = vadd.f32 %v8260_v58, %v2697_v19  ;;  %v2235_v18 = vmul.f32 1.442695, %v2013_v30 }
 0x380   : > { %5643 = vmatmul.mubr.msk.f32.vlgmr.msra.gmra.mxu1 %vm678_vm1, %v10715_v6  ;;  %v8276_v8 = vpop.eup %5998  ;;  %6024 = vpow2.f32 %v2219_v27  ;;  %v2678_v13 = vadd.f32 %v8267_v49, %v2677_v36 }
 0x381   : > { %3771 = vmatpush1.msra.mxu1 %v10717_v12  ;;  %3328 = vmatprep.mubr.f32.mxu1 %v10693_v40  ;;  %v8283_v31 = vpop.eup %6000  ;;  %6026 = vpow2.f32 %v2221_v44  ;;  %v2699_v17 = vadd.f32 %v8276_v8, %v2698_v54  ;;  %v8310_v44 = vpop.trf.xlu1 }
 0x382   : > { %v8288_v59 = vpop.eup %6002  ;;  %6028 = vpow2.f32 %v2223_v20  ;;  %v2679_v3 = vadd.f32 %v8283_v31, %v2678_v13  ;;  %v8331_v16 = vpop.trf.xlu0 }
 0x383   : > { %v8293_v63 = vpop.eup %6004  ;;  %6030 = vpow2.f32 %v2225_v55  ;;  %v2700_v21 = vadd.f32 %v8288_v59, %v2699_v17  ;;  %v10722_v55 = vld [vmem:[#allocation74_spill] sm:$0xff] }
 0x384   : > { %5644 = vmatmul.mubr.msk.f32.gmra.mxu1 %vm678_vm1, %v10720_v7  ;;  %v8297_v42 = vpop.eup %6006  ;;  %6032 = vpow2.f32 %v2227_v4  ;;  %v2680_v61 = vadd.f32 %v8293_v63, %v2679_v3 }
 0x385   : > { %3334 = vmatprep.mubr.f32.mxu1 %v10693_v40  ;;  %v8300_v14 = vpop.eup %6008  ;;  %6034 = vpow2.f32 %v2229_v35  ;;  %v2701_v27 = vadd.f32 %v8297_v42, %v2700_v21  ;;  %v8334_v13 = vpop.trf.xlu1 }
 0x386   : > { %v8305_v48 = vpop.eup %6010  ;;  %6036 = vpow2.f32 %v2231_v11  ;;  %v2681_v23 = vadd.f32 %v8300_v14, %v2680_v61  ;;  %v10723_v11 = vld [vmem:[#allocation29_spill] sm:$0xff]  ;;  %v1865_v61 = vsub.f32 %v8113_v53, %v8120_v28 }
 0x387   : > { %v8312_v19 = vpop.eup %6012  ;;  %6038 = vpow2.f32 %v2233_v45  ;;  %v2702_v60 = vadd.f32 %v8305_v48, %v2701_v27  ;;  %v8341_v27 = vpop.trf.xlu0 }
 0x388   : > { %5645 = vmatmul.mubr.msk.f32.gmra.mxu1 %vm678_vm1, %v10721_v43  ;;  %v8316_v29 = vpop.eup %6014  ;;  %6040 = vpow2.f32 %v2235_v18  ;;  %v2682_v20 = vadd.f32 %v8312_v19, %v2681_v23 }
 0x389   : > { %3340 = vmatprep.mubr.f32.mxu1 %v10693_v40  ;;  %v8319_v36 = vpop.eup %6016  ;;  %6042 = vpow2.f32 %v2237_v24  ;;  %v2703_v6 = vadd.f32 %v8316_v29, %v2702_v60  ;;  %v8345_v60 = vpop.trf.xlu1 }
 0x38a   : > { %v8322_v26 = vpop.eup %6018  ;;  %v2683_v33 = vadd.f32 %v8319_v36, %v2682_v20 }
 0x38b   : > { %v8327_v54 = vpop.eup %6020  ;;  %v2704_v12 = vadd.f32 %v8322_v26, %v2703_v6 }
 0x38c   : > { %5646 = vmatmul.mubr.msk.f32.gmra.mxu1 %vm678_vm1, %v10722_v55  ;;  %v6023_v30 = vpop.eup %6022  ;;  %v2684_v4 = vadd.f32 %v8327_v54, %v2683_v33 }
 0x38d   : > { %3346 = vmatprep.mubr.f32.mxu1 %v10693_v40  ;;  %v6025_v34 = vpop.eup %6024  ;;  %v2705_v39 = vadd.f32 %v6023_v30, %v2704_v12 }
 0x38e   : > { %v6027_v35 = vpop.eup %6026  ;;  %v2685_v17 = vadd.f32 %v6025_v34, %v2684_v4  ;;  %v1871_v4 = vmul.f32 1.442695, %v1865_v61 }
 0x38f   : > { %v6029_v3 = vpop.eup %6028  ;;  %v2706_v7 = vadd.f32 %v6027_v35, %v2705_v39 }
 0x390   : > { %5647 = vmatmul.mubr.msk.f32.gmra.mxu1 %vm678_vm1, %v10723_v11  ;;  %v6031_v45 = vpop.eup %6030  ;;  %v2686_v21 = vadd.f32 %v6029_v3, %v2685_v17  ;;  %6044 = vpow2.f32 %v1871_v4 }
 0x391   : > { %3352 = vmatprep.mubr.f32.mxu1 %v10693_v40  ;;  %v6033_v18 = vpop.eup %6032  ;;  %v2707_v24 = vadd.f32 %v6031_v45, %v2706_v7  ;;  %v8353_v7 = vpop.trf.xlu1 }
 0x392   : > { %v6035_v23 = vpop.eup %6034  ;;  %v2687_v43 = vadd.f32 %v6033_v18, %v2686_v21 }
 0x393   : > { %v6037_v20 = vpop.eup %6036  ;;  %v2708_v6 = vadd.f32 %v6035_v23, %v2707_v24 }
 0x394   : > { %5648 = vmatmul.mubr.msk.f32.gmra.mxu1 %vm678_vm1, %v8127_v38  ;;  %v6039_v33 = vpop.eup %6038  ;;  %v2688_v55 = vadd.f32 %v6037_v20, %v2687_v43  ;;  %v8351_v38 = vpop.trf.xlu0 }
 0x395   : > { %3358 = vmatprep.mubr.f32.mxu1 %v10693_v40  ;;  %v6041_v12 = vpop.eup %6040  ;;  %v2709_v39 = vadd.f32 %v6039_v33, %v2708_v6 }
 0x396   : > { %v6043_v28 = vpop.eup %6042  ;;  %v2689_v53 = vadd.f32 %v6041_v12, %v2688_v55 }
 0x397   : > { %v2710_v17 = vadd.f32 %v6043_v28, %v2709_v39  ;;  %2445 = vmatprep.subr.mxu0 %v6043_v28 }
 0x398   : > { %5649 = vmatmul.mubr.msk.f32.gmra.mxu1 %vm678_vm1, %v8137_v47  ;;  %v2690_v11 = vrot.slane %v2689_v53, 4  ;;  %2446 = vmatpush1.msra.mxu0 %v6041_v12  ;;  %v8358_v6 = vpop.trf.xlu0 }
 0x399   : > { %3364 = vmatprep.mubr.f32.mxu1 %v10693_v40  ;;  %v2711_v21 = vrot.slane %v2710_v17, 4  ;;  %2447 = vmatprep.subr.mxu0 %v6039_v33  ;;  %v8362_v33 = vpop.trf.xlu1 }
 0x39a   : > { %v2691_v61 = vadd.f32 %v2690_v11, %v2689_v53  ;;  %2448 = vmatpush1.msra.mxu0 %v6037_v20 }
 0x39b   : > { %v2712_v24 = vadd.f32 %v2711_v21, %v2710_v17  ;;  %2449 = vmatprep.subr.mxu0 %v6035_v23 }
 0x39c   : > { %5650 = vmatmul.mubr.msk.f32.gmra.mxu1 %vm678_vm1, %v8158_v32  ;;  %v2692_v47 = vrot.slane %v2691_v61, 2  ;;  %2450 = vmatpush1.msra.mxu0 %v6033_v18 }
 0x39d   : > { %3370 = vmatprep.mubr.f32.mxu1 %v10693_v40  ;;  %v2713_v43 = vrot.slane %v2712_v24, 2  ;;  %2451 = vmatprep.subr.mxu0 %v6031_v45 }
 0x39e   : > { %v2693_v55 = vadd.f32 %v2692_v47, %v2691_v61  ;;  %2452 = vmatpush1.msra.mxu0 %v6029_v3  ;;  %v8371_v3 = vpop.trf.xlu1 }
 0x39f   : > { %v2714_v12 = vadd.f32 %v2713_v43, %v2712_v24  ;;  %2453 = vmatprep.subr.mxu0 %v6027_v35 }
 0x3a0   : > { %5651 = vmatmul.mubr.msk.f32.gmra.mxu1 %vm678_vm1, %v8181_v50  ;;  %v2694_v32 = vrot.slane %v2693_v55, 1  ;;  %2454 = vmatpush1.msra.mxu0 %v6025_v34  ;;  %v3677_v50 = vpop.trf.xlu0  ;;  %v1617_v34 = vld [vmem:[#allocation6 + $0x4] sm:$0x3] }
 0x3a1   : > { %3376 = vmatprep.mubr.f32.mxu1 %v10693_v40  ;;  %v2715_v23 = vrot.slane %v2714_v12, 1  ;;  %2455 = vmatprep.subr.mxu0 %v6023_v30  ;;  %v8374_v30 = vpop.eup %6044 }
 0x3a2   : > { %v2695_v18 = vadd.f32 %v2694_v32, %v2693_v55  ;;  %2456 = vmatpush1.msra.mxu0 %v8327_v54 }
 0x3a3   : > { %v2716_v45 = vadd.f32 %v2715_v23, %v2714_v12  ;;  %2457 = vmatprep.subr.mxu0 %v8322_v26 }
 0x3a4   : > { %5652 = vmatmul.mubr.msk.f32.gmra.mxu1 %vm678_vm1, %v8203_v15  ;;  %2458 = vmatpush1.msra.mxu0 %v8319_v36  ;;  %v2589_v36 = vmul.f32 %v8374_v30, %v1617_v34  ;;  %v3678_v26 = vpop.trf.xlu0  ;;  %v2878_v34 = vrot.slane %v8160_v5, %v10694_v2 }
 0x3a5   : > { %3382 = vmatprep.mubr.f32.mxu1 %v10693_v40  ;;  %v2797_v35 = vcombine.low %v2695_v18, %v2716_v45  ;;  %2459 = vmatprep.subr.mxu0 %v8316_v29 }
 0x3a6   : > { %2460 = vmatpush1.msra.mxu0 %v8312_v19 }
 0x3a7   : > { %v2804_v15 = vrot.slane %v2797_v35, %v10668_v56  ;;  %2461 = vmatprep.subr.mxu0 %v8305_v48 }
 0x3a8   : > { %5653 = vmatmul.mubr.msk.f32.gmra.mxu1 %vm678_vm1, %v8229_v25  ;;  %2462 = vmatpush1.msra.mxu0 %v8300_v14  ;;  %v8389_v25 = vpop.trf.xlu1  ;;  %v10729_v14 = vld [vmem:[#allocation112_spill] sm:$0xff] }
 0x3a9   : > { %3388 = vmatprep.mubr.f32.mxu1 %v10693_v40  ;;  %v2811_v29 = vrot.slane %v2804_v15, %v10668_v56  ;;  %2463 = vmatprep.subr.mxu0 %v8297_v42  ;;  %v10732_v15 = vld [vmem:[#allocation56_spill] sm:$0xff] }
 0x3aa   : > { %2464 = vmatpush1.msra.mxu0 %v8293_v63 }
 0x3ab   : > { %v2833_v19 = vadd.f32 %v2811_v29, %v2589_v36  ;;  %2465 = vmatprep.subr.mxu0 %v8288_v59  ;;  %v2882_v36 = vrot.slane %v8160_v5, %v10732_v15 }
 0x3ac   : > { %5654 = vmatmul.mubr.msk.f32.gmra.mxu1 %vm678_vm1, %v8274_v22  ;;  %2466 = vmatpush1.msra.mxu0 %v8283_v31  ;;  %v3679_v22 = vpop.trf.xlu0  ;;  %v8403_v59 = vpop.trf.xlu1 }
 0x3ad   : > { %3394 = vmatprep.mubr.f32.mxu1 %v10693_v40  ;;  %2837 = vst.msk [vmem:[#allocation6 + $0x4] sm:$0x3] %vm6885_vm2, %v2833_v19  ;;  %2467 = vmatprep.subr.mxu0 %v8276_v8 }
 0x3ae   : > { %2468 = vmatpush1.msra.mxu0 %v8267_v49 }
 0x3af   : > { %2469 = vmatprep.subr.mxu0 %v8260_v58 }
 0x3b0   : > { %5655 = vmatmul.mubr.msk.f32.gmra.mxu1 %vm678_vm1, %v8303_v57  ;;  %2470 = vmatpush1.msra.mxu0 %v8255_v46  ;;  %v3680_v58 = vpop.trf.xlu0  ;;  %v10724_v46 = vld [vmem:[#allocation31_spill] sm:$0xff]  ;;  %v2862_v57 = vrot.slane %v10729_v14, %v10694_v2 }
 0x3b1   : > { %3400 = vmatprep.mubr.f32.mxu1 %v10693_v40  ;;  %2471 = vmatprep.subr.mxu0 %v8249_v0  ;;  %v8416_v0 = vpop.trf.xlu1 }
 0x3b2   : > { %2472 = vmatpush1.msra.mxu0 %v8241_v51  ;;  %v10725_v51 = vld [vmem:[#allocation19_spill] sm:$0xff]  ;;  %v2893_v54 = vmul.f32 0.0, %v2862_v57 }
 0x3b3   : > { %2473 = vmatprep.subr.mxu0 %v8231_v10  ;;  %v10726_v10 = vld [vmem:[#allocation18_spill] sm:$0xff] }
 0x3b4   : > { %5656 = vmatmul.mubr.msk.f32.gmra.mxu1 %vm678_vm1, %v8331_v16  ;;  %2474 = vmatpush1.msra.mxu0 %v8224_v1  ;;  %v10728_v1 = vld [vmem:[#allocation22_spill] sm:$0xff] }
 0x3b5   : > { %3406 = vmatprep.mubr.f32.mxu1 %v10693_v40  ;;  %2475 = vmatprep.subr.mxu0 %v8219_v9  ;;  %v10727_v9 = vld [vmem:[#allocation23_spill] sm:$0xff]  ;;  %v2964_v49 = vpop.trf.xlu1 }
 0x3b6   : > { %2476 = vmatpush1.msra.mxu0 %v8214_v37  ;;  %v3681_v37 = vpop.trf.xlu0 }
 0x3b7   : > { %2510 = vmatmul.mubr.f32.vlgmr.msra.gmra.mxu0 %v10724_v46  ;;  %3047 = vmatprep.subr.mxu0 %v10725_v51 }
 0x3b8   : > { %5657 = vmatmul.mubr.msk.f32.gmra.mxu1 %vm678_vm1, %v8341_v27  ;;  %3081 = vmatprep.mubr.f32.mxu0 %v10693_v40 }
 0x3b9   : > { %3412 = vmatprep.mubr.f32.mxu1 %v10693_v40  ;;  %3048 = vmatpush1.msra.mxu0 %v10726_v10 }
 0x3ba   : > { %3529 = vmatprep.subr.mxu0 %v10727_v9  ;;  %v3682_v8 = vpop.trf.xlu0 }
 0x3bb   : > { %5627 = vmatmul.mubr.msk.f32.vlgmr.msra.gmra.mxu0 %vm678_vm1, %v8239_v52  ;;  %v2965_v52 = vpop.trf.xlu1 }
 0x3bc   : > { %5658 = vmatmul.mubr.msk.f32.gmra.mxu1 %vm678_vm1, %v8351_v38  ;;  %3530 = vmatpush1.msra.mxu0 %v10728_v1 }
 0x3bd   : > { %3804 = vmatprep.mubr.f32.mxu1 %v10693_v40  ;;  %3087 = vmatprep.mubr.f32.mxu0 %v10693_v40 }
 0x3bf   : > { %5628 = vmatmul.mubr.msk.f32.gmra.mxu0 %vm678_vm1, %v8281_v41  ;;  %v3683_v41 = vpop.trf.xlu0  ;;  %v2966_v31 = vpop.trf.xlu1 }
 0x3c0   : > { %5675 = vmatmul.mubr.msk.f32.vlgmr.msra.gmra.mxu1 %vm678_vm1, %v8358_v6  ;;  %3093 = vmatprep.mubr.f32.mxu0 %v10693_v40  ;;  %v10730_v6 = vld [vmem:[#allocation37_spill] sm:$0xff] }
 0x3c1   : > { %3810 = vmatprep.mubr.f32.mxu1 %v10693_v40  ;;  %v2854_v55 = vrot.slane %v10730_v6, %v10694_v2 }
 0x3c3   : > { %5629 = vmatmul.mubr.msk.f32.gmra.mxu0 %vm678_vm1, %v8310_v44  ;;  %v3684_v63 = vpop.trf.xlu0  ;;  %v2967_v42 = vpop.trf.xlu1  ;;  %v2891_v12 = vmul.f32 0.0, %v2854_v55 }
 0x3c4   : > { %5676 = vmatmul.mubr.msk.f32.gmra.mxu1 %vm678_vm1, %v3677_v50  ;;  %3099 = vmatprep.mubr.f32.mxu0 %v10693_v40 }
 0x3c5   : > { %3816 = vmatprep.mubr.f32.mxu1 %v10693_v40 }
 0x3c7   : > { %5630 = vmatmul.mubr.msk.f32.gmra.mxu0 %vm678_vm1, %v8334_v13  ;;  %v3685_v48 = vpop.trf.xlu0  ;;  %v2968_v44 = vpop.trf.xlu1 }
 0x3c8   : > { %5677 = vmatmul.mubr.msk.f32.gmra.mxu1 %vm678_vm1, %v3678_v26  ;;  %3105 = vmatprep.mubr.f32.mxu0 %v10693_v40  ;;  %v2897_v26 = vmul.f32 0.0, %v2878_v34 }
 0x3c9   : > { %3822 = vmatprep.mubr.f32.mxu1 %v10693_v40 }
 0x3cb   : > { %5631 = vmatmul.mubr.msk.f32.gmra.mxu0 %vm678_vm1, %v8345_v60  ;;  %v3686_v27 = vpop.trf.xlu0  ;;  %v3435_v60 = vpop.trf.xlu1 }
 0x3cc   : > { %5678 = vmatmul.mubr.msk.f32.gmra.mxu1 %vm678_vm1, %v3679_v22  ;;  %3111 = vmatprep.mubr.f32.mxu0 %v10693_v40  ;;  %v2898_v22 = vmul.f32 0.0, %v2882_v36 }
 0x3cd   : > { %3828 = vmatprep.mubr.f32.mxu1 %v10693_v40 }
 0x3cf   : > { %5632 = vmatmul.mubr.msk.f32.gmra.mxu0 %vm678_vm1, %v8353_v7  ;;  %v3687_v20 = vpop.trf.xlu0  ;;  %v3436_v4 = vpop.trf.xlu1 }
 0x3d0   : > { %5679 = vmatmul.mubr.msk.f32.gmra.mxu1 %vm678_vm1, %v3680_v58  ;;  %3117 = vmatprep.mubr.f32.mxu0 %v10693_v40 }
 0x3d1   : > { %3834 = vmatprep.mubr.f32.mxu1 %v10693_v40 }
 0x3d3   : > { %5633 = vmatmul.mubr.msk.f32.gmra.mxu0 %vm678_vm1, %v8362_v33  ;;  %v2440_v16 = vpop.f32.mrf.mxu1  ;;  %v3688_v39 = vpop.trf.xlu0 }
 0x3d4   : > { %5680 = vmatmul.mubr.msk.f32.gmra.mxu1 %vm678_vm1, %v3681_v37  ;;  %3123 = vmatprep.mubr.f32.mxu0 %v10693_v40  ;;  %v8468_v13 = vadd.f32 %v2893_v54, %v2440_v16  ;;  %v3437_v28 = vpop.trf.xlu1 }
 0x3d5   : > { %3840 = vmatprep.mubr.f32.mxu1 %v10693_v40  ;;  %v8547_v29 = vpop.f32.mrf.mxu1 }
 0x3d7   : > { %5634 = vmatmul.mubr.msk.f32.gmra.mxu0 %vm678_vm1, %v8371_v3  ;;  %v3689_v53 = vpop.trf.xlu0 }
 0x3d8   : > { %5681 = vmatmul.mubr.msk.f32.gmra.mxu1 %vm678_vm1, %v3682_v8  ;;  %3129 = vmatprep.mubr.f32.mxu0 %v10693_v40  ;;  %v3438_v17 = vpop.trf.xlu1 }
 0x3d9   : > { %3846 = vmatprep.mubr.f32.mxu1 %v10693_v40 }
 0x3db   : > { %5635 = vmatmul.mubr.msk.f32.gmra.mxu0 %vm678_vm1, %v8389_v25  ;;  %v3690_v38 = vpop.trf.xlu0 }
 0x3dc   : > { %5682 = vmatmul.mubr.msk.f32.gmra.mxu1 %vm678_vm1, %v3683_v41  ;;  %3135 = vmatprep.mubr.f32.mxu0 %v10693_v40  ;;  %v3439_v11 = vpop.trf.xlu1 }
 0x3dd   : > { %3852 = vmatprep.mubr.f32.mxu1 %v10693_v40 }
 0x3df   : > { %5636 = vmatmul.mubr.msk.f32.gmra.mxu0 %vm678_vm1, %v8403_v59  ;;  %v3691_v7 = vpop.trf.xlu0 }
 0x3e0   : > { %5683 = vmatmul.mubr.msk.f32.gmra.mxu1 %vm678_vm1, %v3684_v63  ;;  %3141 = vmatprep.mubr.f32.mxu0 %v10693_v40  ;;  %v3440_v21 = vpop.trf.xlu1 }
 0x3e1   : > { %3858 = vmatprep.mubr.f32.mxu1 %v10693_v40 }
 0x3e3   : > { %5637 = vmatmul.mubr.msk.f32.gmra.mxu0 %vm678_vm1, %v8416_v0 }
 0x3e4   : > { %5684 = vmatmul.mubr.msk.f32.gmra.mxu1 %vm678_vm1, %v3685_v48  ;;  %3147 = vmatprep.mubr.f32.mxu0 %v10693_v40  ;;  %v3441_v61 = vpop.trf.xlu1 }
 0x3e5   : > { %3864 = vmatprep.mubr.f32.mxu1 %v10693_v40 }
 0x3e7   : > { %5638 = vmatmul.mubr.msk.f32.gmra.mxu0 %vm678_vm1, %v2964_v49 }
 0x3e8   : > { %5685 = vmatmul.mubr.msk.f32.gmra.mxu1 %vm678_vm1, %v3686_v27  ;;  %3153 = vmatprep.mubr.f32.mxu0 %v10693_v40  ;;  %v3442_v24 = vpop.trf.xlu1 }
 0x3e9   : > { %3870 = vmatprep.mubr.f32.mxu1 %v10693_v40 }
 0x3eb   : > { %5639 = vmatmul.mubr.msk.f32.gmra.mxu0 %vm678_vm1, %v2965_v52 }
 0x3ec   : > { %5686 = vmatmul.mubr.msk.f32.gmra.mxu1 %vm678_vm1, %v3687_v20  ;;  %3159 = vmatprep.mubr.f32.mxu0 %v10693_v40  ;;  %v3443_v47 = vpop.trf.xlu1 }
 0x3ed   : > { %3876 = vmatprep.mubr.f32.mxu1 %v10693_v40 }
 0x3ef   : > { %5640 = vmatmul.mubr.msk.f32.gmra.mxu0 %vm678_vm1, %v2966_v31 }
 0x3f0   : > { %5687 = vmatmul.mubr.msk.f32.gmra.mxu1 %vm678_vm1, %v3688_v39  ;;  %3165 = vmatprep.mubr.f32.mxu0 %v10693_v40  ;;  %v3444_v43 = vpop.trf.xlu1 }
 0x3f1   : > { %3882 = vmatprep.mubr.f32.mxu1 %v10693_v40 }
 0x3f3   : > { %5641 = vmatmul.mubr.msk.f32.gmra.mxu0 %vm678_vm1, %v2967_v42 }
 0x3f4   : > { %5688 = vmatmul.mubr.msk.f32.gmra.mxu1 %vm678_vm1, %v3689_v53  ;;  %3171 = vmatprep.mubr.f32.mxu0 %v10693_v40  ;;  %v3445_v33 = vpop.trf.xlu1 }
 0x3f5   : > { %3888 = vmatprep.mubr.f32.mxu1 %v10693_v40 }
 0x3f7   : > { %5642 = vmatmul.mubr.msk.f32.gmra.mxu0 %vm678_vm1, %v2968_v44 }
 0x3f8   : > { %5689 = vmatmul.mubr.msk.f32.gmra.mxu1 %vm678_vm1, %v3690_v38  ;;  %3563 = vmatprep.mubr.f32.mxu0 %v10693_v40  ;;  %v3446_v18 = vpop.trf.xlu1 }
 0x3f9   : > { %3894 = vmatprep.mubr.f32.mxu1 %v10693_v40 }
 0x3fb   : > { %5659 = vmatmul.mubr.msk.f32.vlgmr.msra.gmra.mxu0 %vm678_vm1, %v3435_v60 }
 0x3fc   : > { %5690 = vmatmul.mubr.msk.f32.gmra.mxu1 %vm678_vm1, %v3691_v7  ;;  %3569 = vmatprep.mubr.f32.mxu0 %v10693_v40  ;;  %v3447_v45 = vpop.trf.xlu1 }
 0x3fd   : > { %4728 = vmatprep.mubr.f32.mxu1 %v10693_v40 }
 0x3ff   : > { %5660 = vmatmul.mubr.msk.f32.gmra.mxu0 %vm678_vm1, %v3436_v4 }
 0x400   : > { %3575 = vmatprep.mubr.f32.mxu0 %v10693_v40  ;;  %v3448_v50 = vpop.trf.xlu1 }
 0x403   : > { %5661 = vmatmul.mubr.msk.f32.gmra.mxu0 %vm678_vm1, %v3437_v28 }
 0x404   : > { %3581 = vmatprep.mubr.f32.mxu0 %v10693_v40  ;;  %v3449_v3 = vpop.trf.xlu1 }
 0x407   : > { %5662 = vmatmul.mubr.msk.f32.gmra.mxu0 %vm678_vm1, %v3438_v17 }
 0x408   : > { %3587 = vmatprep.mubr.f32.mxu0 %v10693_v40  ;;  %v3450_v35 = vpop.trf.xlu1 }
 0x40b   : > { %5663 = vmatmul.mubr.msk.f32.gmra.mxu0 %vm678_vm1, %v3439_v11 }
 0x40c   : > { %3593 = vmatprep.mubr.f32.mxu0 %v10693_v40 }
 0x40f   : > { %5664 = vmatmul.mubr.msk.f32.gmra.mxu0 %vm678_vm1, %v3440_v21 }
 0x410   : > { %3599 = vmatprep.mubr.f32.mxu0 %v10693_v40 }
 0x413   : > { %5665 = vmatmul.mubr.msk.f32.gmra.mxu0 %vm678_vm1, %v3441_v61 }
 0x414   : > { %3605 = vmatprep.mubr.f32.mxu0 %v10693_v40 }
 0x417   : > { %5666 = vmatmul.mubr.msk.f32.gmra.mxu0 %vm678_vm1, %v3442_v24 }
 0x418   : > { %3611 = vmatprep.mubr.f32.mxu0 %v10693_v40 }
 0x41a   : > { %v2369_v32 = vpop.f32.mrf.mxu0 }
 0x41b   : > { %v8526_v23 = vadd.f32 %v2891_v12, %v2369_v32  ;;  %5667 = vmatmul.mubr.msk.f32.gmra.mxu0 %vm678_vm1, %v3443_v47 }
 0x41c   : > { %3617 = vmatprep.mubr.f32.mxu0 %v10693_v40 }
 0x41d   : > { %10731 = vst [vmem:[#allocation38_spill] sm:$0xff] %v8526_v23 }
 0x41f   : > { %5668 = vmatmul.mubr.msk.f32.gmra.mxu0 %vm678_vm1, %v3444_v43 }
 0x420   : > { %3623 = vmatprep.mubr.f32.mxu0 %v10693_v40 }
 0x423   : > { %5669 = vmatmul.mubr.msk.f32.gmra.mxu0 %vm678_vm1, %v3445_v33 }
 0x424   : > { %3629 = vmatprep.mubr.f32.mxu0 %v10693_v40 }
 0x427   : > { %5670 = vmatmul.mubr.msk.f32.gmra.mxu0 %vm678_vm1, %v3446_v18 }
 0x428   : > { %3635 = vmatprep.mubr.f32.mxu0 %v10693_v40 }
 0x42b   : > { %5671 = vmatmul.mubr.msk.f32.gmra.mxu0 %vm678_vm1, %v3447_v45 }
 0x42c   : > { %3641 = vmatprep.mubr.f32.mxu0 %v10693_v40 }
 0x42f   : > { %5672 = vmatmul.mubr.msk.f32.gmra.mxu0 %vm678_vm1, %v3448_v50 }
 0x430   : > { %3647 = vmatprep.mubr.f32.mxu0 %v10693_v40 }
 0x433   : > { %5673 = vmatmul.mubr.msk.f32.gmra.mxu0 %vm678_vm1, %v3449_v3 }
 0x434   : > { %3653 = vmatprep.mubr.f32.mxu0 %v10693_v40 }
 0x437   : > { %5674 = vmatmul.mubr.msk.f32.gmra.mxu0 %vm678_vm1, %v3450_v35 }
 0x438   : > { %4657 = vmatprep.mubr.f32.mxu0 %v10693_v40 }
 0x43c   : > { %v2582_v25 = vpop.f32.mrf.mxu1 }
 0x43d   : > { %v8550_v19 = vadd.f32 %v2897_v26, %v2582_v25 }
 0x43e   : > { %v2584_v59 = vpop.f32.mrf.mxu1 }
 0x43f   : > { %10733 = vst [vmem:[#allocation40_spill] sm:$0xff] %v8550_v19  ;;  %v8552_v58 = vadd.f32 %v2898_v22, %v2584_v59 }
 0x440   : > { %v8554_v0 = vpop.f32.mrf.mxu1 }
 0x441   : > { %10734 = vst [vmem:[#allocation42_spill] sm:$0xff] %v8552_v58 }
 0x442   : > { %v8556_v46 = vpop.f32.mrf.mxu1 }
 0x444   : > { %v8558_v51 = vpop.f32.mrf.mxu1 }
 0x445   : > { %v3951_v5 = vmax.f32 %v8554_v0, %v8558_v51 }
 0x446   : > { %v8562_v10 = vpop.f32.mrf.mxu1 }
 0x447   : > { %v3972_v9 = vmax.f32 %v8556_v46, %v8562_v10 }
 0x448   : > { %v8566_v37 = vpop.f32.mrf.mxu1 }
 0x449   : > { %v3952_v1 = vmax.f32 %v3951_v5, %v8566_v37  ;;  %v2870_v5 = vrot.slane %v8374_v30, %v10694_v2 }
 0x44a   : > { %v8569_v49 = vpop.f32.mrf.mxu1 }
 0x44b   : > { %v3973_v8 = vmax.f32 %v3972_v9, %v8569_v49 }
 0x44c   : > { %v8572_v52 = vpop.f32.mrf.mxu1 }
 0x44d   : > { %v3953_v41 = vmax.f32 %v3952_v1, %v8572_v52 }
 0x44e   : > { %v8575_v31 = vpop.f32.mrf.mxu1 }
 0x44f   : > { %v3974_v63 = vmax.f32 %v3973_v8, %v8575_v31  ;;  %v2874_v8 = vrot.slane %v8374_v30, %v10732_v15 }
 0x450   : > { %v8578_v42 = vpop.f32.mrf.mxu1 }
 0x451   : > { %v3954_v57 = vmax.f32 %v3953_v41, %v8578_v42  ;;  %v8641_v41 = vpop.f32.mrf.mxu0 }
 0x452   : > { %v8581_v48 = vpop.f32.mrf.mxu1  ;;  %10735 = vst [vmem:[#allocation44_spill] sm:$0xff] %v8641_v41 }
 0x453   : > { %v3975_v44 = vmax.f32 %v3974_v63, %v8581_v48 }
 0x454   : > { %v8584_v54 = vpop.f32.mrf.mxu1 }
 0x455   : > { %v3955_v16 = vmax.f32 %v3954_v57, %v8584_v54 }
 0x456   : > { %v8587_v27 = vpop.f32.mrf.mxu1 }
 0x457   : > { %v3976_v60 = vmax.f32 %v3975_v44, %v8587_v27  ;;  %v2895_v44 = vmul.f32 0.0, %v2870_v5 }
 0x458   : > { %v8590_v20 = vpop.f32.mrf.mxu1 }
 0x459   : > { %v3956_v4 = vmax.f32 %v3955_v16, %v8590_v20 }
 0x45a   : > { %v8593_v39 = vpop.f32.mrf.mxu1 }
 0x45b   : > { %v3977_v28 = vmax.f32 %v3976_v60, %v8593_v39 }
 0x45c   : > { %v8596_v53 = vpop.f32.mrf.mxu1 }
 0x45d   : > { %v3957_v17 = vmax.f32 %v3956_v4, %v8596_v53 }
 0x45e   : > { %v8599_v38 = vpop.f32.mrf.mxu1 }
 0x45f   : > { %v3978_v11 = vmax.f32 %v3977_v28, %v8599_v38 }
 0x460   : > { %v8602_v7 = vpop.f32.mrf.mxu1 }
 0x461   : > { %v3958_v21 = vmax.f32 %v3957_v17, %v8602_v7  ;;  %v2896_v17 = vmul.f32 0.0, %v2874_v8 }
 0x462   : > { %v8605_v61 = vpop.f32.mrf.mxu1 }
 0x463   : > { %v3979_v24 = vmax.f32 %v3978_v11, %v8605_v61 }
 0x464   : > { %v8608_v47 = vpop.f32.mrf.mxu1 }
 0x465   : > { %v3959_v43 = vmax.f32 %v3958_v21, %v8608_v47 }
 0x466   : > { %v8611_v55 = vpop.f32.mrf.mxu1 }
 0x467   : > { %v3980_v33 = vmax.f32 %v3979_v24, %v8611_v55 }
 0x468   : > { %v8614_v12 = vpop.f32.mrf.mxu1 }
 0x469   : > { %v3960_v32 = vmax.f32 %v3959_v43, %v8614_v12 }
 0x46a   : > { %v8617_v18 = vpop.f32.mrf.mxu1 }
 0x46b   : > { %v3981_v45 = vmax.f32 %v3980_v33, %v8617_v18 }
 0x46c   : > { %v8620_v50 = vpop.f32.mrf.mxu1 }
 0x46d   : > { %v3961_v3 = vmax.f32 %v3960_v32, %v8620_v50 }
 0x46e   : > { %v8623_v35 = vpop.f32.mrf.mxu1 }
 0x46f   : > { %v3982_v34 = vmax.f32 %v3981_v45, %v8623_v35 }
 0x470   : > { %v8626_v36 = vpop.f32.mrf.mxu1 }
 0x471   : > { %v3962_v26 = vmax.f32 %v3961_v3, %v8626_v36 }
 0x472   : > { %v8629_v25 = vpop.f32.mrf.mxu1 }
 0x473   : > { %v3983_v22 = vmax.f32 %v3982_v34, %v8629_v25 }
 0x474   : > { %v8632_v59 = vpop.f32.mrf.mxu1 }
 0x475   : > { %v3963_v9 = vmax.f32 %v3962_v26, %v8632_v59 }
 0x476   : > { %v8637_v1 = vpop.f32.mrf.mxu1 }
 0x477   : > { %v3984_v63 = vmax.f32 %v3983_v22, %v8637_v1  ;;  %v2511_v60 = vpop.f32.mrf.mxu0 }
 0x478   : > { %v8644_v57 = vpop.f32.mrf.mxu1  ;;  %v8649_v28 = vadd.f32 %v2895_v44, %v2511_v60 }
 0x479   : > { %v3964_v16 = vmax.f32 %v3963_v9, %v8644_v57  ;;  %v2513_v21 = vpop.f32.mrf.mxu0 }
 0x47a   : > { %v8647_v4 = vpop.f32.mrf.mxu1  ;;  %10737 = vst [vmem:[#allocation49_spill] sm:$0xff] %v8649_v28  ;;  %v8654_v30 = vadd.f32 %v2896_v17, %v2513_v21 }
 0x47b   : > { %10736 = vst [vmem:[#allocation46_spill] sm:$0xff] %v8647_v4  ;;  %v3985_v11 = vmax.f32 %v3984_v63, %v8647_v4  ;;  %v8657_v33 = vpop.f32.mrf.mxu0 }
 0x47c   : > { %v8652_v24 = vpop.f32.mrf.mxu1  ;;  %10738 = vst [vmem:[#allocation51_spill] sm:$0xff] %v8654_v30  ;;  %10739 = vst [vmem:[#allocation54_spill] sm:$0xff] %v8657_v33 }
 0x47d   : > { %v3965_v43 = vmax.f32 %v3964_v16, %v8652_v24  ;;  %v8662_v34 = vpop.f32.mrf.mxu0 }
 0x47e   : > { %v8659_v32 = vpop.f32.mrf.mxu1  ;;  %10741 = vst [vmem:[#allocation59_spill] sm:$0xff] %v8662_v34 }
 0x47f   : > { %10740 = vst [vmem:[#allocation58_spill] sm:$0xff] %v8659_v32  ;;  %v3966_v45 = vrot.slane %v3965_v43, 4  ;;  %v3986_v3 = vmax.f32 %v3985_v11, %v8659_v32  ;;  %v8666_v9 = vpop.f32.mrf.mxu0 }
 0x480   : > { %v8664_v26 = vpop.f32.mrf.mxu1  ;;  %10743 = vst [vmem:[#allocation61_spill] sm:$0xff] %v8666_v9 }
 0x481   : > { %10742 = vst [vmem:[#allocation60_spill] sm:$0xff] %v8664_v26  ;;  %v3967_v22 = vmax.f32 %v3965_v43, %v3966_v45  ;;  %v3987_v5 = vrot.slane %v3986_v3, 4  ;;  %v8670_v16 = vpop.f32.mrf.mxu0 }
 0x482   : > { %v8668_v8 = vpop.f32.mrf.mxu1  ;;  %10745 = vst [vmem:[#allocation63_spill] sm:$0xff] %v8670_v16 }
 0x483   : > { %10744 = vst [vmem:[#allocation62_spill] sm:$0xff] %v8668_v8  ;;  %v3968_v63 = vrot.slane %v3967_v22, 2  ;;  %v3988_v44 = vmax.f32 %v3986_v3, %v3987_v5  ;;  %v8674_v30 = vpop.f32.mrf.mxu0 }
 0x484   : > { %v8672_v60 = vpop.f32.mrf.mxu1  ;;  %10747 = vst [vmem:[#allocation65_spill] sm:$0xff] %v8674_v30 }
 0x485   : > { %10746 = vst [vmem:[#allocation64_spill] sm:$0xff] %v8672_v60  ;;  %v3969_v17 = vmax.f32 %v3967_v22, %v3968_v63  ;;  %v3989_v21 = vrot.slane %v3988_v44, 2  ;;  %v4035_v43 = vmax.f32 %v8664_v26, %v8672_v60  ;;  %v8680_v45 = vpop.f32.mrf.mxu0 }
 0x486   : > { %v8676_v11 = vpop.f32.mrf.mxu1  ;;  %10749 = vst [vmem:[#allocation67_spill] sm:$0xff] %v8680_v45 }
 0x487   : > { %10748 = vst [vmem:[#allocation66_spill] sm:$0xff] %v8676_v11  ;;  %v3970_v28 = vrot.slane %v3969_v17, 1  ;;  %v3990_v58 = vmax.f32 %v3988_v44, %v3989_v21  ;;  %v8684_v23 = vpop.f32.mrf.mxu0  ;;  %v4056_v63 = vmax.f32 %v8668_v8, %v8676_v11 }
 0x488   : > { %v8682_v19 = vpop.f32.mrf.mxu1  ;;  %10751 = vst [vmem:[#allocation69_spill] sm:$0xff] %v8684_v23 }
 0x489   : > { %10750 = vst [vmem:[#allocation68_spill] sm:$0xff] %v8682_v19  ;;  %v3971_v3 = vmax.f32 %v3969_v17, %v3970_v28  ;;  %v3991_v5 = vrot.slane %v3990_v58, 1  ;;  %v4036_v41 = vmax.f32 %v4035_v43, %v8682_v19  ;;  %v8691_v44 = vpop.f32.mrf.mxu0  ;;  %v3909_v28 = vmax.f32 %v8657_v33, %v8666_v9 }
 0x48a   : > { %v8686_v40 = vpop.f32.mrf.mxu1  ;;  %10753 = vst [vmem:[#allocation73_spill] sm:$0xff] %v8691_v44 }
 0x48b   : > { %10752 = vst [vmem:[#allocation71_spill] sm:$0xff] %v8686_v40  ;;  %v3992_v22 = vmax.f32 %v3990_v58, %v3991_v5  ;;  %v8695_v26 = vpop.f32.mrf.mxu0  ;;  %v3930_v58 = vmax.f32 %v8662_v34, %v8670_v16  ;;  %v4057_v5 = vmax.f32 %v4056_v63, %v8686_v40  ;;  %v3902_v16 = vld [vmem:[#allocation5 + $0x2] sm:$0x3] }
 0x48c   : > { %v8693_v21 = vpop.f32.mrf.mxu1  ;;  %10755 = vst [vmem:[#allocation80_spill] sm:$0xff] %v8695_v26 }
 0x48d   : > { %10754 = vst [vmem:[#allocation76_spill] sm:$0xff] %v8693_v21  ;;  %v4100_v60 = vcombine.low %v3971_v3, %v3992_v22  ;;  %v4037_v43 = vmax.f32 %v4036_v41, %v8693_v21  ;;  %v8706_v19 = vpop.f32.mrf.mxu0  ;;  %v2866_v3 = vrot.slane %v10729_v14, %v10732_v15  ;;  %v3910_v22 = vmax.f32 %v3909_v28, %v8674_v30 }
 0x48e   : > { %v8699_v17 = vpop.f32.mrf.mxu1  ;;  %10757 = vst [vmem:[#allocation88_spill] sm:$0xff] %v8706_v19 }
 0x48f   : > { %10756 = vst [vmem:[#allocation84_spill] sm:$0xff] %v8699_v17  ;;  %v4107_v6 = vrot.slane %v4100_v60, %v10668_v56  ;;  %v3931_v60 = vmax.f32 %v3930_v58, %v8680_v45  ;;  %v8715_v9 = vpop.f32.mrf.mxu0  ;;  %v3911_v63 = vmax.f32 %v3910_v22, %v8684_v23  ;;  %v4058_v14 = vmax.f32 %v4057_v5, %v8699_v17 }
 0x490   : > { %v8711_v11 = vpop.f32.mrf.mxu1  ;;  %10759 = vst [vmem:[#allocation94_spill] sm:$0xff] %v8715_v9 }
 0x491   : > { %10758 = vst [vmem:[#allocation92_spill] sm:$0xff] %v8711_v11  ;;  %v4114_v8 = vrot.slane %v4107_v6, %v10668_v56  ;;  %v3932_v21 = vmax.f32 %v3931_v60, %v8691_v44  ;;  %v8723_v28 = vmax.f32 %v4037_v43, %v8711_v11  ;;  %v8725_v30 = vpop.f32.mrf.mxu0  ;;  %v2894_v6 = vmul.f32 0.0, %v2866_v3 }
 0x492   : > { %v8718_v40 = vpop.f32.mrf.mxu1  ;;  %v3912_v58 = vmax.f32 %v3911_v63, %v8695_v26 }
 0x493   : > { %10760 = vst [vmem:[#allocation96_spill] sm:$0xff] %v8718_v40  ;;  %v4150_v41 = vmax.f32 %v3902_v16, %v4114_v8  ;;  %v8739_v5 = vmax.f32 %v3932_v21, %v8706_v19  ;;  %v8741_v43 = vpop.f32.mrf.mxu0  ;;  %v8744_v3 = vadd.f32 %v2894_v6, %v8547_v29  ;;  %v8750_v11 = vmax.f32 %v4058_v14, %v8718_v40 }
 0x494   : > { %v8728_v45 = vpop.f32.mrf.mxu1  ;;  %10763 = vst [vmem:[#allocation75_spill] sm:$0xff] %v8741_v43  ;;  %v3913_v60 = vmax.f32 %v3912_v58, %v8715_v9 }
 0x495   : > { %10761 = vst [vmem:[#allocation98_spill] sm:$0xff] %v8728_v45  ;;  %v4154_v34 = vsub.f32 %v3902_v16, %v4150_v41  ;;  %v8731_v22 = vrot.slane %v4150_v41, %v10694_v2  ;;  %v8734_v8 = vrot.slane %v4150_v41, %v10732_v15  ;;  %5206 = vst.msk [vmem:[#allocation5 + $0x2] sm:$0x3] %vm6885_vm2, %v4150_v41  ;;  %v8756_v41 = vpop.f32.mrf.mxu0 }
 0x496   : > { %10764 = vst [vmem:[#allocation86_spill] sm:$0xff] %v8744_v3  ;;  %v8747_v16 = vpop.f32.mrf.mxu1  ;;  %v8765_v14 = vmax.f32 %v3913_v60, %v8741_v43 }
 0x497   : > { %10762 = vst [vmem:[#allocation53_spill] sm:$0xff] %v8731_v22  ;;  %10765 = vst [vmem:[#allocation100_spill] sm:$0xff] %v8747_v16  ;;  %v4159_v63 = vmul.f32 1.442695, %v4154_v34  ;;  %v4241_v29 = vsub.f32 %v8554_v0, %v8731_v22  ;;  %v4242_v6 = vsub.f32 %v8556_v46, %v8734_v8  ;;  %v4243_v34 = vsub.f32 %v8558_v51, %v8731_v22  ;;  %v8777_v40 = vpop.f32.mrf.mxu0 }
 0x498   : > { %v8767_v58 = vpop.f32.mrf.mxu1  ;;  %v4244_v17 = vsub.f32 %v8562_v10, %v8734_v8  ;;  %v4245_v21 = vsub.f32 %v8566_v37, %v8731_v22  ;;  %v4246_v0 = vsub.f32 %v8569_v49, %v8734_v8  ;;  %v4247_v46 = vsub.f32 %v8572_v52, %v8731_v22 }
 0x499   : > { %10766 = vst [vmem:[#allocation85_spill] sm:$0xff] %v8767_v58  ;;  %6046 = vpow2.f32 %v4159_v63  ;;  %v4248_v51 = vsub.f32 %v8575_v31, %v8734_v8  ;;  %v4249_v60 = vsub.f32 %v8578_v42, %v8731_v22  ;;  %v4250_v10 = vsub.f32 %v8581_v48, %v8734_v8  ;;  %v8795_v63 = vpop.f32.mrf.mxu0 }
 0x49a   : > { %v8785_v43 = vpop.f32.mrf.mxu1  ;;  %v4251_v37 = vsub.f32 %v8584_v54, %v8731_v22  ;;  %v4252_v49 = vsub.f32 %v8587_v27, %v8734_v8  ;;  %v4253_v52 = vsub.f32 %v8590_v20, %v8731_v22  ;;  %v4254_v31 = vsub.f32 %v8593_v39, %v8734_v8 }
 0x49b   : > { %10767 = vst [vmem:[#allocation93_spill] sm:$0xff] %v8785_v43  ;;  %v4255_v42 = vsub.f32 %v8596_v53, %v8731_v22  ;;  %v4256_v48 = vsub.f32 %v8599_v38, %v8734_v8  ;;  %v4257_v54 = vsub.f32 %v8602_v7, %v8731_v22  ;;  %v4258_v27 = vsub.f32 %v8605_v61, %v8734_v8  ;;  %v8815_v19 = vpop.f32.mrf.mxu0 }
 0x49c   : > { %v8805_v9 = vpop.f32.mrf.mxu1  ;;  %v4259_v20 = vsub.f32 %v8608_v47, %v8731_v22  ;;  %v4260_v39 = vsub.f32 %v8611_v55, %v8734_v8  ;;  %v4261_v53 = vsub.f32 %v8614_v12, %v8731_v22  ;;  %v4262_v38 = vsub.f32 %v8617_v18, %v8734_v8 }
 0x49d   : > { %10768 = vst [vmem:[#allocation91_spill] sm:$0xff] %v8805_v9  ;;  %v4263_v7 = vsub.f32 %v8620_v50, %v8731_v22  ;;  %v4264_v61 = vsub.f32 %v8623_v35, %v8734_v8  ;;  %v4265_v47 = vsub.f32 %v8626_v36, %v8731_v22  ;;  %v4266_v55 = vsub.f32 %v8629_v25, %v8734_v8  ;;  %v8831_v50 = vpop.f32.mrf.mxu0 }
 0x49e   : > { %v8825_v26 = vpop.f32.mrf.mxu1  ;;  %v4267_v12 = vsub.f32 %v8632_v59, %v8731_v22  ;;  %v4268_v18 = vsub.f32 %v8637_v1, %v8734_v8  ;;  %v4401_v44 = vmul.f32 1.442695, %v4241_v29  ;;  %v4403_v23 = vmul.f32 1.442695, %v4242_v6 }
 0x49f   : > { %10769 = vst [vmem:[#allocation87_spill] sm:$0xff] %v8825_v26  ;;  %v4269_v35 = vsub.f32 %v8644_v57, %v8731_v22  ;;  %v4405_v33 = vmul.f32 1.442695, %v4243_v34  ;;  %v4407_v25 = vmul.f32 1.442695, %v4244_v17  ;;  %v8843_v6 = vpop.f32.mrf.mxu0  ;;  %v4060_v36 = vmax.f32 %v8750_v11, %v8747_v16 }
 0x4a0   : > { %v8837_v62 = vpop.f32.mrf.mxu1  ;;  %6048 = vpow2.f32 %v4401_v44  ;;  %v4409_v29 = vmul.f32 1.442695, %v4245_v21  ;;  %v4411_v56 = vmul.f32 1.442695, %v4246_v0  ;;  %v4413_v57 = vmul.f32 1.442695, %v4247_v46 }
 0x4a1   : > { %10770 = vst [vmem:[#allocation83_spill] sm:$0xff] %v8837_v62  ;;  %6050 = vpow2.f32 %v4403_v23  ;;  %v4415_v17 = vmul.f32 1.442695, %v4248_v51  ;;  %v4417_v4 = vmul.f32 1.442695, %v4249_v60  ;;  %v8849_v59 = vpop.f32.mrf.mxu0 }
 0x4a2   : > { %v8847_v34 = vpop.f32.mrf.mxu1  ;;  %6052 = vpow2.f32 %v4405_v33  ;;  %v4419_v3 = vmul.f32 1.442695, %v4250_v10  ;;  %v4421_v1 = vmul.f32 1.442695, %v4251_v37  ;;  %v4423_v44 = vmul.f32 1.442695, %v4252_v49 }
 0x4a3   : > { %10771 = vst [vmem:[#allocation89_spill] sm:$0xff] %v8847_v34  ;;  %6054 = vpow2.f32 %v4407_v25  ;;  %v4425_v21 = vmul.f32 1.442695, %v4253_v52  ;;  %v4427_v23 = vmul.f32 1.442695, %v4254_v31  ;;  %v8853_v22 = vpop.f32.mrf.mxu0 }
 0x4a4   : > { %v8851_v32 = vpop.f32.mrf.mxu1  ;;  %6056 = vpow2.f32 %v4409_v29  ;;  %v4429_v0 = vmul.f32 1.442695, %v4255_v42  ;;  %v4431_v46 = vmul.f32 1.442695, %v4256_v48  ;;  %v4433_v11 = vmul.f32 1.442695, %v4257_v54 }
 0x4a5   : > { %10772 = vst [vmem:[#allocation79_spill] sm:$0xff] %v8851_v32  ;;  %6058 = vpow2.f32 %v4411_v56  ;;  %v8855_v33 = vmul.f32 1.442695, %v4258_v27  ;;  %v8857_v51 = vmul.f32 1.442695, %v4259_v20  ;;  %v8869_v31 = vpop.f32.mrf.mxu0 }
 0x4a6   : > { %v8859_v60 = vpop.f32.mrf.mxu1  ;;  %v8861_v10 = vpop.eup %6046  ;;  %6060 = vpow2.f32 %v4413_v57  ;;  %v8863_v37 = vmul.f32 1.442695, %v4260_v39  ;;  %v8865_v49 = vmul.f32 1.442695, %v4261_v53  ;;  %v8867_v52 = vmul.f32 1.442695, %v4262_v38 }
 0x4a7   : > { %10773 = vst [vmem:[#allocation90_spill] sm:$0xff] %v8859_v60  ;;  %6062 = vpow2.f32 %v4415_v17  ;;  %v8871_v56 = vmul.f32 1.442695, %v4263_v7  ;;  %v8873_v42 = vmul.f32 1.442695, %v4264_v61  ;;  %v8885_v53 = vpop.f32.mrf.mxu0  ;;  %v10775_v7 = vmax.f32 %v8723_v28, %v8728_v45 }
 0x4a8   : > { %v8875_v48 = vmul.f32 1.442695, %v4265_v47  ;;  %v8877_v54 = vpop.f32.mrf.mxu1  ;;  %6064 = vpow2.f32 %v4417_v4  ;;  %v8879_v27 = vmul.f32 1.442695, %v4266_v55  ;;  %v8881_v20 = vmul.f32 1.442695, %v4267_v12 }
 0x4a9   : > { %10774 = vst [vmem:[#allocation72_spill] sm:$0xff] %v8877_v54  ;;  %v8883_v39 = vmul.f32 1.442695, %v4268_v18  ;;  %6066 = vpow2.f32 %v4419_v3  ;;  %v8887_v38 = vmul.f32 1.442695, %v4269_v35  ;;  %v4040_v61 = vmax.f32 %v10775_v7, %v8767_v58  ;;  %v8902_v18 = vpop.f32.mrf.mxu0 }
 0x4aa   : > { %v10776_v4 = vmax.f32 %v8739_v5, %v8725_v30  ;;  %v8897_v55 = vpop.f32.mrf.mxu1  ;;  %6068 = vpow2.f32 %v4421_v1  ;;  %v4061_v12 = vmax.f32 %v4060_v36, %v8785_v43  ;;  %v3915_v3 = vmax.f32 %v8765_v14, %v8777_v40 }
 0x4ab   : > { %10777 = vst [vmem:[#allocation70_spill] sm:$0xff] %v8897_v55  ;;  %v5152_v35 = vrot.slane %v8861_v10, %v10694_v2  ;;  %6070 = vpow2.f32 %v4423_v44  ;;  %v4041_v28 = vmax.f32 %v4040_v61, %v8805_v9  ;;  %v5156_v1 = vrot.slane %v8861_v10, %v10732_v15  ;;  %v8914_v29 = vpop.f32.mrf.mxu0 }
 0x4ac   : > { %v3935_v47 = vmax.f32 %v10776_v4, %v8756_v41  ;;  %v8908_v5 = vpop.f32.mrf.mxu1  ;;  %6072 = vpow2.f32 %v4425_v21  ;;  %v4062_v36 = vmax.f32 %v4061_v12, %v8825_v26  ;;  %v3916_v14 = vmax.f32 %v3915_v3, %v8815_v19  ;;  %v10782_v4 = vld [vmem:[#allocation86_spill] sm:$0xff] }
 0x4ad   : > { %10778 = vst [vmem:[#allocation57_spill] sm:$0xff] %v8908_v5  ;;  %v8917_v57 = vmul.f32 %v5152_v35, %v8468_v13  ;;  %v8919_v17 = vpop.eup %6048  ;;  %6074 = vpow2.f32 %v4427_v23  ;;  %v4042_v44 = vmax.f32 %v4041_v28, %v8837_v62  ;;  %v8926_v21 = vmul.f32 %v5156_v1, %v10782_v4  ;;  %v10785_v12 = vld [vmem:[#allocation46_spill] sm:$0xff]  ;;  %v8937_v28 = vpop.f32.mrf.mxu0  ;;  %v10788_v1 = vld [vmem:[#allocation53_spill] sm:$0xff] }
 0x4ae   : > { %v3936_v25 = vmax.f32 %v3935_v47, %v8795_v63  ;;  %10780 = vst [vmem:[#allocation109_spill] sm:$0xff] %v8919_v17  ;;  %v8923_v61 = vpop.f32.mrf.mxu1  ;;  %v8928_v47 = vpop.eup %6050  ;;  %6076 = vpow2.f32 %v4429_v0  ;;  %v10786_v3 = vsub.f32 %v10785_v12, %v8734_v8  ;;  %v4063_v35 = vmax.f32 %v4062_v36, %v8847_v34 }
 0x4af   : > { %10779 = vst [vmem:[#allocation111_spill] sm:$0xff] %v8917_v57  ;;  %10781 = vst [vmem:[#allocation50_spill] sm:$0xff] %v8923_v61  ;;  %v3917_v23 = vmax.f32 %v3916_v14, %v8843_v6  ;;  %6078 = vpow2.f32 %v4431_v46  ;;  %v10789_v4 = vsub.f32 %v8652_v24, %v10788_v1  ;;  %v4043_v0 = vmax.f32 %v4042_v44, %v8851_v32  ;;  %v8956_v34 = vpop.f32.mrf.mxu0 }
 0x4b0   : > { %v3937_v7 = vmax.f32 %v3936_v25, %v8831_v50  ;;  %10783 = vst [vmem:[#allocation48_spill] sm:$0xff] %v8926_v21  ;;  %10784 = vst [vmem:[#allocation45_spill] sm:$0xff] %v8928_v47  ;;  %v8933_v13 = vmul.f32 1.442695, %v10786_v3  ;;  %v8939_v25 = vpop.eup %6052  ;;  %v8948_v3 = vpop.f32.mrf.mxu1  ;;  %6080 = vpow2.f32 %v4433_v11  ;;  %v4064_v14 = vmax.f32 %v4063_v35, %v8859_v60 }
 0x4b1   : > { %10787 = vst [vmem:[#allocation43_spill] sm:$0xff] %v8939_v25  ;;  %v8944_v21 = vmul.f32 1.442695, %v10789_v4  ;;  %10790 = vst [vmem:[#allocation41_spill] sm:$0xff] %v8948_v3  ;;  %v8950_v57 = vpop.eup %6054  ;;  %v4923_v36 = vadd.f32 %v8939_v25, %v8919_v17  ;;  %v3918_v46 = vmax.f32 %v3917_v23, %v8853_v22  ;;  %6082 = vpow2.f32 %v8855_v33  ;;  %v8973_v33 = vpop.f32.mrf.mxu0 }
 0x4b2   : > { %v3938_v12 = vmax.f32 %v3937_v7, %v8849_v59  ;;  %10791 = vst [vmem:[#allocation39_spill] sm:$0xff] %v8950_v57  ;;  %v8958_v24 = vpop.eup %6056  ;;  %v4944_v44 = vadd.f32 %v8950_v57, %v8928_v47  ;;  %v4044_v7 = vmax.f32 %v4043_v0, %v8877_v54  ;;  %v8965_v1 = vpop.f32.mrf.mxu1  ;;  %6084 = vpow2.f32 %v8857_v51 }
 0x4b3   : > { %10792 = vst [vmem:[#allocation27_spill] sm:$0xff] %v8958_v24  ;;  %10793 = vst [vmem:[#allocation55_spill] sm:$0xff] %v8965_v1  ;;  %v8967_v4 = vpop.eup %6058  ;;  %v4924_v35 = vadd.f32 %v8958_v24, %v4923_v36  ;;  %v4065_v23 = vmax.f32 %v4064_v14, %v8897_v55  ;;  %v3919_v60 = vmax.f32 %v3918_v46, %v8885_v53  ;;  %6086 = vpow2.f32 %v8863_v37  ;;  %v8989_v55 = vpop.f32.mrf.mxu0 }
 0x4b4   : > { %v3939_v11 = vmax.f32 %v3938_v12, %v8869_v31  ;;  %10794 = vst [vmem:[#allocation101_spill] sm:$0xff] %v8967_v4  ;;  %v8975_v32 = vpop.eup %6060  ;;  %v4945_v0 = vadd.f32 %v8967_v4, %v4944_v44  ;;  %v4045_v12 = vmax.f32 %v4044_v7, %v8908_v5  ;;  %v8981_v62 = vpop.f32.mrf.mxu1  ;;  %6088 = vpow2.f32 %v8865_v49 }
 0x4b5   : > { %10795 = vst [vmem:[#allocation102_spill] sm:$0xff] %v8975_v32  ;;  %10796 = vst [vmem:[#allocation52_spill] sm:$0xff] %v8981_v62  ;;  %v8983_v51 = vpop.eup %6062  ;;  %v4925_v36 = vadd.f32 %v8975_v32, %v4924_v35  ;;  %v4066_v14 = vmax.f32 %v4065_v23, %v8923_v61  ;;  %v3920_v46 = vmax.f32 %v3919_v60, %v8914_v29  ;;  %6090 = vpow2.f32 %v8867_v52  ;;  %v9005_v61 = vpop.f32.mrf.mxu0 }
 0x4b6   : > { %v3940_v54 = vmax.f32 %v3939_v11, %v8902_v18  ;;  %10797 = vst [vmem:[#allocation103_spill] sm:$0xff] %v8983_v51  ;;  %v8991_v37 = vpop.eup %6064  ;;  %v4946_v44 = vadd.f32 %v8983_v51, %v4945_v0  ;;  %v4046_v7 = vmax.f32 %v4045_v12, %v8948_v3  ;;  %v8997_v5 = vpop.f32.mrf.mxu1  ;;  %6092 = vpow2.f32 %v8871_v56  ;;  %10801 = vst [vmem:[#allocation107_spill] sm:$0xff] %v9005_v61 }
 0x4b7   : > { %10798 = vst [vmem:[#allocation104_spill] sm:$0xff] %v8991_v37  ;;  %10799 = vst [vmem:[#allocation105_spill] sm:$0xff] %v8997_v5  ;;  %v8999_v49 = vpop.eup %6066  ;;  %v4926_v60 = vadd.f32 %v8991_v37, %v4925_v36  ;;  %v4067_v35 = vmax.f32 %v4066_v14, %v8965_v1  ;;  %v3921_v23 = vmax.f32 %v3920_v46, %v8956_v34  ;;  %6094 = vpow2.f32 %v8873_v42  ;;  %v9021_v1 = vpop.f32.mrf.mxu0 }
 0x4b8   : > { %v3941_v11 = vmax.f32 %v3940_v54, %v8937_v28  ;;  %10800 = vst [vmem:[#allocation106_spill] sm:$0xff] %v8999_v49  ;;  %v9007_v52 = vpop.eup %6068  ;;  %v4947_v54 = vadd.f32 %v8999_v49, %v4946_v44  ;;  %v4047_v0 = vmax.f32 %v4046_v7, %v8981_v62  ;;  %v9013_v3 = vpop.f32.mrf.mxu1  ;;  %6096 = vpow2.f32 %v8875_v48  ;;  %10805 = vst [vmem:[#allocation114_spill] sm:$0xff] %v9021_v1 }
 0x4b9   : > { %10802 = vst [vmem:[#allocation108_spill] sm:$0xff] %v9007_v52  ;;  %10803 = vst [vmem:[#allocation110_spill] sm:$0xff] %v9013_v3  ;;  %v9015_v56 = vpop.eup %6070  ;;  %v4927_v36 = vadd.f32 %v9007_v52, %v4926_v60  ;;  %v4068_v14 = vmax.f32 %v4067_v35, %v8997_v5  ;;  %v3922_v46 = vmax.f32 %v3921_v23, %v8989_v55  ;;  %6098 = vpow2.f32 %v8879_v27  ;;  %v10809_v60 = vld [vmem:[#allocation58_spill] sm:$0xff]  ;;  %v9039_v26 = vpop.f32.mrf.mxu0 }
 0x4ba   : > { %v3942_v12 = vmax.f32 %v3941_v11, %v8973_v33  ;;  %10804 = vst [vmem:[#allocation113_spill] sm:$0xff] %v9015_v56  ;;  %v9023_v42 = vpop.eup %6072  ;;  %v4948_v44 = vadd.f32 %v9015_v56, %v4947_v54  ;;  %v4048_v7 = vmax.f32 %v4047_v0, %v9013_v3  ;;  %v9029_v62 = vpop.f32.mrf.mxu1  ;;  %6100 = vpow2.f32 %v8881_v20  ;;  %10811 = vst [vmem:[#allocation20_spill] sm:$0xff] %v9039_v26 }
 0x4bb   : > { %10806 = vst [vmem:[#allocation35_spill] sm:$0xff] %v9023_v42  ;;  %10807 = vst [vmem:[#allocation33_spill] sm:$0xff] %v9029_v62  ;;  %v9031_v48 = vpop.eup %6074  ;;  %v10810_v35 = vsub.f32 %v10809_v60, %v8734_v8  ;;  %v4928_v5 = vadd.f32 %v9023_v42, %v4927_v36  ;;  %v3923_v27 = vmax.f32 %v3922_v46, %v9021_v1  ;;  %6102 = vpow2.f32 %v8883_v39 }
 0x4bc   : > { %v3943_v11 = vmax.f32 %v3942_v12, %v9005_v61  ;;  %10808 = vst [vmem:[#allocation21_spill] sm:$0xff] %v9031_v48  ;;  %v9041_v54 = vpop.eup %6076  ;;  %v4949_v0 = vadd.f32 %v9031_v48, %v4948_v44  ;;  %v4069_v12 = vmax.f32 %v4068_v14, %v9029_v62  ;;  %v9046_v3 = vpop.f32.mrf.mxu1  ;;  %6104 = vpow2.f32 %v8887_v38 }
 0x4bd   : > { %v4463_v23 = vmul.f32 1.442695, %v10810_v35  ;;  %10812 = vst [vmem:[#allocation25_spill] sm:$0xff] %v9041_v54  ;;  %10813 = vst [vmem:[#allocation95_spill] sm:$0xff] %v9046_v3  ;;  %v9049_v8 = vpop.eup %6078  ;;  %v4929_v36 = vadd.f32 %v9041_v54, %v4928_v5  ;;  %v3924_v46 = vrot.slane %v3923_v27, 4  ;;  %v4049_v60 = vmax.f32 %v4048_v7, %v9046_v3  ;;  %v9054_v35 = vpop.f32.mrf.mxu0 }
 0x4be   : > { %v3944_v20 = vmax.f32 %v3943_v11, %v9039_v26  ;;  %10814 = vst [vmem:[#allocation97_spill] sm:$0xff] %v9054_v35  ;;  %v9056_v39 = vpop.eup %6080  ;;  %6106 = vpow2.f32 %v8933_v13  ;;  %v4950_v14 = vadd.f32 %v9049_v8, %v4949_v0  ;;  %v9060_v62 = vpop.f32.mrf.mxu1 }
 0x4bf   : > { %10815 = vst [vmem:[#allocation99_spill] sm:$0xff] %v9060_v62  ;;  %v9062_v11 = vpop.eup %6082  ;;  %6108 = vpow2.f32 %v8944_v21  ;;  %v4930_v38 = vadd.f32 %v9056_v39, %v4929_v36  ;;  %v3925_v5 = vmax.f32 %v3923_v27, %v3924_v46  ;;  %v4050_v9 = vrot.slane %v4049_v60, 4  ;;  %v9066_v7 = vpop.f32.mrf.mxu0 }
 0x4c0   : > { %v3945_v44 = vrot.slane %v3944_v20, 4  ;;  %10816 = vst [vmem:[#allocation82_spill] sm:$0xff] %v9066_v7  ;;  %v9068_v3 = vpop.eup %6084  ;;  %6110 = vpow2.f32 %v4463_v23  ;;  %v4951_v13 = vadd.f32 %v9062_v11, %v4950_v14  ;;  %v4070_v0 = vmax.f32 %v4069_v12, %v9060_v62 }
 0x4c1   : > { %v9072_v58 = vpop.eup %6086  ;;  %v4931_v16 = vadd.f32 %v9068_v3, %v4930_v38  ;;  %v3926_v45 = vrot.slane %v3925_v5, 2  ;;  %v4051_v21 = vmax.f32 %v4049_v60, %v4050_v9  ;;  %v9075_v17 = vpop.f32.mrf.mxu0 }
 0x4c2   : > { %v3946_v43 = vmax.f32 %v3944_v20, %v3945_v44  ;;  %10817 = vst [vmem:[#allocation24_spill] sm:$0xff] %v9075_v17  ;;  %v9077_v27 = vpop.eup %6088  ;;  %v4952_v36 = vadd.f32 %v9072_v58, %v4951_v13  ;;  %v4071_v47 = vrot.slane %v4070_v0, 4 }
 0x4c3   : > { %v9080_v23 = vpop.eup %6090  ;;  %v4932_v20 = vadd.f32 %v9077_v27, %v4931_v16  ;;  %v3927_v14 = vmax.f32 %v3925_v5, %v3926_v45  ;;  %v4052_v12 = vrot.slane %v4051_v21, 2  ;;  %v9083_v44 = vpop.f32.mrf.mxu0 }
 0x4c4   : > { %v3947_v46 = vrot.slane %v3946_v43, 2  ;;  %10818 = vst [vmem:[#allocation36_spill] sm:$0xff] %v9083_v44  ;;  %v9085_v62 = vpop.eup %6092  ;;  %v4953_v9 = vadd.f32 %v9080_v23, %v4952_v36  ;;  %v4072_v38 = vmax.f32 %v4070_v0, %v4071_v47 }
 0x4c5   : > { %v9088_v25 = vpop.eup %6094  ;;  %v4933_v13 = vadd.f32 %v9085_v62, %v4932_v20  ;;  %v3928_v57 = vrot.slane %v3927_v14, 1  ;;  %v4053_v24 = vmax.f32 %v4051_v21, %v4052_v12  ;;  %v9091_v4 = vpop.f32.mrf.mxu0 }
 0x4c6   : > { %v3948_v60 = vmax.f32 %v3946_v43, %v3947_v46  ;;  %10819 = vst [vmem:[#allocation81_spill] sm:$0xff] %v9091_v4  ;;  %v9093_v32 = vpop.eup %6096  ;;  %v4954_v45 = vadd.f32 %v9088_v25, %v4953_v9  ;;  %v4073_v5 = vrot.slane %v4072_v38, 2 }
 0x4c7   : > { %v9096_v51 = vpop.eup %6098  ;;  %v4934_v36 = vadd.f32 %v9093_v32, %v4933_v13  ;;  %v4054_v43 = vrot.slane %v4053_v24, 1  ;;  %v9099_v47 = vpop.f32.mrf.mxu0  ;;  %v3929_v20 = vmax.f32 %v3927_v14, %v3928_v57  ;;  %v10822_v13 = vld [vmem:[#allocation37_spill] sm:$0xff] }
 0x4c8   : > { %v3949_v16 = vrot.slane %v3948_v60, 1  ;;  %10820 = vst [vmem:[#allocation78_spill] sm:$0xff] %v9099_v47  ;;  %v6101_v0 = vpop.eup %6100  ;;  %v4955_v46 = vadd.f32 %v9096_v51, %v4954_v45  ;;  %v4074_v12 = vmax.f32 %v4072_v38, %v4073_v5  ;;  %v2858_v1 = vrot.slane %v10822_v13, %v10732_v15  ;;  %v10824_v38 = vld [vmem:[#allocation47_spill] sm:$0xff] }
 0x4c9   : > { %v6103_v37 = vpop.eup %6102  ;;  %v4935_v49 = vadd.f32 %v6101_v0, %v4934_v36  ;;  %v9102_v52 = vpop.f32.mrf.mxu0  ;;  %v4055_v42 = vmax.f32 %v4053_v24, %v4054_v43  ;;  %v3993_v45 = vmax.f32 %v9054_v35, %v9075_v17  ;;  %v4014_v24 = vmax.f32 %v9066_v7, %v9083_v44  ;;  %v10851_v44 = vld [vmem:[#allocation35_spill] sm:$0xff] }
 0x4ca   : > { %v3950_v21 = vmax.f32 %v3948_v60, %v3949_v16  ;;  %10821 = vst [vmem:[#allocation77_spill] sm:$0xff] %v9102_v52  ;;  %v6105_v9 = vpop.eup %6104  ;;  %v4956_v56 = vadd.f32 %v6103_v37, %v4955_v46  ;;  %v4075_v48 = vrot.slane %v4074_v12, 1  ;;  %v2892_v17 = vmul.f32 0.0, %v2858_v1 }
 0x4cb   : > { %v6107_v54 = vpop.eup %6106  ;;  %v4936_v61 = vadd.f32 %v6105_v9, %v4935_v49  ;;  %v9108_v57 = vpop.f32.mrf.mxu0  ;;  %v3994_v43 = vmax.f32 %v3993_v45, %v9091_v4 }
 0x4cc   : > { %v4085_v26 = vcombine.low %v3929_v20, %v3950_v21  ;;  %10823 = vst [vmem:[#allocation74_spill] sm:$0xff] %v9108_v57  ;;  %v6109_v14 = vpop.eup %6108  ;;  %v4957_v60 = vadd.f32 %v6107_v54, %v4956_v56  ;;  %v4076_v5 = vmax.f32 %v4074_v12, %v4075_v48  ;;  %v3901_v56 = vld [vmem:[#allocation5] sm:$0x3] }
 0x4cd   : > { %v6111_v36 = vpop.eup %6110  ;;  %v4937_v46 = vadd.f32 %v6109_v14, %v4936_v61  ;;  %v9114_v20 = vpop.f32.mrf.mxu0  ;;  %v3995_v61 = vmax.f32 %v3994_v43, %v9102_v52 }
 0x4ce   : > { %v4092_v16 = vrot.slane %v4085_v26, %v10824_v38  ;;  %10825 = vst [vmem:[#allocation29_spill] sm:$0xff] %v9114_v20  ;;  %v4958_v49 = vadd.f32 %v6111_v36, %v4957_v60  ;;  %4664 = vmatprep.subr.mxu1 %v6111_v36  ;;  %v4130_v13 = vcombine.low %v4055_v42, %v4076_v5  ;;  %v10827_v60 = vld [vmem:[#allocation44_spill] sm:$0xff]  ;;  %v3906_v5 = vld [vmem:[#allocation6 + $0x2] sm:$0x3] }
 0x4cf   : > { %v4938_v35 = vrot.slane %v4937_v46, 4  ;;  %4665 = vmatpush1.msra.mxu1 %v6109_v14  ;;  %v4015_v26 = vmax.f32 %v4014_v24, %v9099_v47  ;;  %v9119_v48 = vpop.f32.mrf.mxu0  ;;  %v9125_v36 = vadd.f32 %v2892_v17, %v10827_v60  ;;  %v9129_v14 = vmax.f32 %v3995_v61, %v9114_v20  ;;  %v10833_v60 = vld [vmem:[#allocation61_spill] sm:$0xff]  ;;  %v10842_v20 = vld [vmem:[#allocation94_spill] sm:$0xff] }
 0x4d0   : > { %v4099_v21 = vrot.slane %v4092_v16, %v10824_v38  ;;  %10826 = vst [vmem:[#allocation31_spill] sm:$0xff] %v9119_v48  ;;  %v4959_v12 = vrot.slane %v4958_v49, 4  ;;  %4666 = vmatprep.subr.mxu1 %v6107_v54  ;;  %v9122_v4 = vrot.slane %v4130_v13, %v10824_v38 }
 0x4d1   : > { %10828 = vst [vmem:[#allocation19_spill] sm:$0xff] %v9125_v36  ;;  %v4939_v42 = vadd.f32 %v4938_v35, %v4937_v46  ;;  %4667 = vmatpush1.msra.mxu1 %v6105_v9  ;;  %v4016_v1 = vmax.f32 %v4015_v26, %v9108_v57  ;;  %v9131_v16 = vpop.f32.mrf.mxu0  ;;  %v9142_v35 = vmul.f32 %v8861_v10, %v3906_v5  ;;  %v10831_v26 = vld [vmem:[#allocation54_spill] sm:$0xff]  ;;  %v10834_v5 = vld [vmem:[#allocation63_spill] sm:$0xff] }
 0x4d2   : > { %v4149_v45 = vmax.f32 %v3901_v56, %v4099_v21  ;;  %10829 = vst [vmem:[#allocation18_spill] sm:$0xff] %v9131_v16  ;;  %v4960_v24 = vadd.f32 %v4959_v12, %v4958_v49  ;;  %4668 = vmatprep.subr.mxu1 %v6103_v37 }
 0x4d3   : > { %v4940_v9 = vrot.slane %v4939_v42, 2  ;;  %4669 = vmatpush1.msra.mxu1 %v6101_v0  ;;  %v9147_v37 = vmax.f32 %v4016_v1, %v9119_v48  ;;  %v9149_v49 = vpop.f32.mrf.mxu0  ;;  %v10832_v0 = vld [vmem:[#allocation59_spill] sm:$0xff] }
 0x4d4   : > { %v4153_v54 = vsub.f32 %v3901_v56, %v4149_v45  ;;  %v9134_v43 = vrot.slane %v4149_v45, %v10694_v2  ;;  %v9137_v21 = vrot.slane %v4149_v45, %v10732_v15  ;;  %5205 = vst.msk [vmem:[#allocation5] sm:$0x3] %vm6885_vm2, %v4149_v45  ;;  %v4961_v13 = vrot.slane %v4960_v24, 2  ;;  %4670 = vmatprep.subr.mxu1 %v9096_v51 }
 0x4d5   : > { %v4941_v12 = vadd.f32 %v4940_v9, %v4939_v42  ;;  %4671 = vmatpush1.msra.mxu1 %v9093_v32  ;;  %v9163_v51 = vpop.f32.mrf.mxu0  ;;  %v10837_v32 = vld [vmem:[#allocation67_spill] sm:$0xff] }
 0x4d6   : > { %v4157_v56 = vmul.f32 1.442695, %v4153_v54  ;;  %v4209_v61 = vsub.f32 %v10831_v26, %v9134_v43  ;;  %v4210_v45 = vsub.f32 %v10832_v0, %v9137_v21  ;;  %v4211_v1 = vsub.f32 %v10833_v60, %v9134_v43  ;;  %10835 = vst [vmem:[#allocation23_spill] sm:$0xff] %v9163_v51  ;;  %4672 = vmatprep.subr.mxu1 %v9088_v25  ;;  %v10836_v26 = vld [vmem:[#allocation65_spill] sm:$0xff] }
 0x4d7   : > { %v4212_v46 = vsub.f32 %v10834_v5, %v9137_v21  ;;  %v4962_v54 = vadd.f32 %v4961_v13, %v4960_v24  ;;  %v4213_v42 = vsub.f32 %v10836_v26, %v9134_v43  ;;  %v4214_v9 = vsub.f32 %v10837_v32, %v9137_v21  ;;  %4673 = vmatpush1.msra.mxu1 %v9085_v62  ;;  %v10838_v0 = vld [vmem:[#allocation69_spill] sm:$0xff]  ;;  %v10840_v24 = vld [vmem:[#allocation80_spill] sm:$0xff]  ;;  %v9177_v25 = vpop.f32.mrf.mxu0 }
 0x4d8   : > { %6112 = vpow2.f32 %v4157_v56  ;;  %v4942_v10 = vrot.slane %v4941_v12, 1  ;;  %v4215_v60 = vsub.f32 %v10838_v0, %v9134_v43  ;;  %v10839_v5 = vld [vmem:[#allocation73_spill] sm:$0xff]  ;;  %v4217_v13 = vsub.f32 %v10840_v24, %v9134_v43  ;;  %4674 = vmatprep.subr.mxu1 %v9080_v23  ;;  %v10841_v26 = vld [vmem:[#allocation88_spill] sm:$0xff] }
 0x4d9   : > { %v4216_v48 = vsub.f32 %v10839_v5, %v9137_v21  ;;  %v4963_v56 = vrot.slane %v4962_v54, 1  ;;  %v4218_v32 = vsub.f32 %v10841_v26, %v9137_v21  ;;  %v4219_v62 = vsub.f32 %v10842_v20, %v9134_v43  ;;  %4675 = vmatpush1.msra.mxu1 %v9077_v27  ;;  %v10843_v5 = vld [vmem:[#allocation75_spill] sm:$0xff]  ;;  %v9193_v47 = vpop.f32.mrf.mxu0 }
 0x4da   : > { %v4220_v0 = vsub.f32 %v8725_v30, %v9137_v21  ;;  %v4943_v57 = vadd.f32 %v4942_v10, %v4941_v12  ;;  %v4221_v24 = vsub.f32 %v10843_v5, %v9134_v43  ;;  %v4222_v52 = vsub.f32 %v8756_v41, %v9137_v21  ;;  %10844 = vst [vmem:[#allocation22_spill] sm:$0xff] %v9193_v47 }
 0x4db   : > { %v4223_v23 = vsub.f32 %v8777_v40, %v9134_v43  ;;  %v4964_v26 = vadd.f32 %v4963_v56, %v4962_v54  ;;  %4676 = vmatprep.subr.mxu1 %v9072_v58  ;;  %v4224_v30 = vsub.f32 %v8795_v63, %v9137_v21  ;;  %v4225_v27 = vsub.f32 %v8815_v19, %v9134_v43  ;;  %v9211_v10 = vpop.f32.mrf.mxu0  ;;  %v10847_v54 = vld [vmem:[#allocation25_spill] sm:$0xff] }
 0x4dc   : > { %v4226_v20 = vsub.f32 %v8831_v50, %v9137_v21  ;;  %4677 = vmatpush1.msra.mxu1 %v9068_v3  ;;  %v4227_v41 = vsub.f32 %v8843_v6, %v9134_v43  ;;  %v4228_v40 = vsub.f32 %v8849_v59, %v9137_v21  ;;  %v4229_v58 = vsub.f32 %v8853_v22, %v9134_v43 }
 0x4dd   : > { %v4230_v63 = vsub.f32 %v8869_v31, %v9137_v21  ;;  %v5072_v19 = vcombine.low %v4943_v57, %v4964_v26  ;;  %4678 = vmatprep.subr.mxu1 %v9062_v11  ;;  %v4231_v50 = vsub.f32 %v8885_v53, %v9134_v43  ;;  %v4232_v6 = vsub.f32 %v8902_v18, %v9137_v21  ;;  %v9229_v11 = vpop.f32.mrf.mxu0 }
 0x4de   : > { %v4233_v59 = vsub.f32 %v8914_v29, %v9134_v43  ;;  %4679 = vmatpush1.msra.mxu1 %v9056_v39  ;;  %v4234_v22 = vsub.f32 %v8937_v28, %v9137_v21  ;;  %v4235_v31 = vsub.f32 %v8956_v34, %v9134_v43  ;;  %v4236_v3 = vsub.f32 %v8973_v33, %v9137_v21  ;;  %v10845_v29 = vld [vmem:[#allocation107_spill] sm:$0xff]  ;;  %v10846_v28 = vld [vmem:[#allocation114_spill] sm:$0xff]  ;;  %v9237_v34 = vld [vmem:[#allocation5 + $0x6] sm:$0x3] }
 0x4df   : > { %v5079_v18 = vrot.slane %v5072_v19, %v10824_v38  ;;  %4680 = vmatprep.subr.mxu1 %v9049_v8  ;;  %v4238_v39 = vsub.f32 %v10845_v29, %v9137_v21  ;;  %v4239_v57 = vsub.f32 %v10846_v28, %v9134_v43  ;;  %v4337_v12 = vmul.f32 1.442695, %v4209_v61  ;;  %v10849_v29 = vld [vmem:[#allocation21_spill] sm:$0xff]  ;;  %v10850_v28 = vld [vmem:[#allocation20_spill] sm:$0xff] }
 0x4e0   : > { %4681 = vmatpush1.msra.mxu1 %v10847_v54  ;;  %v4339_v33 = vmul.f32 1.442695, %v4210_v45  ;;  %v4341_v56 = vmul.f32 1.442695, %v4211_v1  ;;  %v4343_v5 = vmul.f32 1.442695, %v4212_v46  ;;  %v10848_v26 = vrot.slane %v9122_v4, %v10824_v38  ;;  %v9254_v4 = vpop.f32.mrf.mxu0 }
 0x4e1   : > { %v5086_v8 = vrot.slane %v5079_v18, %v10824_v38  ;;  %4682 = vmatprep.subr.mxu1 %v10849_v29  ;;  %v4240_v61 = vsub.f32 %v10850_v28, %v9137_v21  ;;  %6114 = vpow2.f32 %v4337_v12  ;;  %v4345_v53 = vmul.f32 1.442695, %v4213_v42  ;;  %v10852_v54 = vld [vmem:[#allocation113_spill] sm:$0xff]  ;;  %v10860_v28 = vld [vmem:[#allocation27_spill] sm:$0xff] }
 0x4e2   : > { %v9244_v19 = vmax.f32 %v9237_v34, %v10848_v26  ;;  %4683 = vmatpush1.msra.mxu1 %v10851_v44  ;;  %6116 = vpow2.f32 %v4339_v33  ;;  %v4347_v45 = vmul.f32 1.442695, %v4214_v9  ;;  %v4349_v46 = vmul.f32 1.442695, %v4215_v60 }
 0x4e3   : > { %v4351_v1 = vmul.f32 1.442695, %v4216_v48  ;;  %v5122_v18 = vadd.f32 %v5086_v8, %v9142_v35  ;;  %4684 = vmatprep.subr.mxu1 %v10852_v54  ;;  %6118 = vpow2.f32 %v4341_v56  ;;  %v4353_v21 = vmul.f32 1.442695, %v4217_v13  ;;  %v10853_v48 = vld [vmem:[#allocation108_spill] sm:$0xff]  ;;  %v10854_v8 = vld [vmem:[#allocation106_spill] sm:$0xff] }
 0x4e4   : > { %5208 = vst.msk [vmem:[#allocation5 + $0x6] sm:$0x3] %vm6885_vm2, %v9244_v19  ;;  %v4355_v12 = vmul.f32 1.442695, %v4218_v32  ;;  %6120 = vpow2.f32 %v4343_v5  ;;  %v4357_v44 = vmul.f32 1.442695, %v4219_v62  ;;  %4685 = vmatpush1.msra.mxu1 %v10853_v48 }
 0x4e5   : > { %v9258_v42 = vpop.eup %6112  ;;  %v4359_v9 = vmul.f32 1.442695, %v4220_v0  ;;  %v4361_v60 = vmul.f32 1.442695, %v4221_v24  ;;  %5126 = vst.msk [vmem:[#allocation6 + $0x2] sm:$0x3] %vm6885_vm2, %v5122_v18  ;;  %6122 = vpow2.f32 %v4345_v53  ;;  %4686 = vmatprep.subr.mxu1 %v10854_v8  ;;  %v9269_v0 = vpop.f32.mrf.mxu0 }
 0x4e6   : > { %v4363_v33 = vmul.f32 1.442695, %v4222_v52  ;;  %v4365_v26 = vmul.f32 1.442695, %v4223_v23  ;;  %v4367_v35 = vmul.f32 1.442695, %v4224_v30  ;;  %6124 = vpow2.f32 %v4347_v45 }
 0x4e7   : > { %v4369_v13 = vmul.f32 1.442695, %v4225_v27  ;;  %v9264_v32 = vmul.f32 1.442695, %v4226_v20  ;;  %v9266_v56 = vmul.f32 1.442695, %v4227_v41  ;;  %6126 = vpow2.f32 %v4349_v46 }
 0x4e8   : > { %v10855_v62 = vld [vmem:[#allocation104_spill] sm:$0xff]  ;;  %v9271_v24 = vmul.f32 1.442695, %v4228_v40  ;;  %v9273_v5 = vmul.f32 1.442695, %v4229_v58  ;;  %v10856_v23 = vld [vmem:[#allocation103_spill] sm:$0xff]  ;;  %6128 = vpow2.f32 %v4351_v1  ;;  %v4156_v45 = vsub.f32 %v9237_v34, %v9244_v19 }
 0x4e9   : > { %4687 = vmatpush1.msra.mxu1 %v10855_v62  ;;  %v9275_v52 = vmul.f32 1.442695, %v4230_v63  ;;  %v9278_v30 = vmul.f32 1.442695, %v4231_v50  ;;  %v9280_v27 = vmul.f32 1.442695, %v4232_v6  ;;  %6130 = vpow2.f32 %v4353_v21 }
 0x4ea   : > { %4688 = vmatprep.subr.mxu1 %v10856_v23  ;;  %v9282_v20 = vmul.f32 1.442695, %v4233_v59  ;;  %v10857_v41 = vld [vmem:[#allocation102_spill] sm:$0xff]  ;;  %v9285_v53 = vmul.f32 1.442695, %v4234_v22  ;;  %v10858_v63 = vld [vmem:[#allocation101_spill] sm:$0xff]  ;;  %6132 = vpow2.f32 %v4355_v12  ;;  %v10859_v50 = vsub.f32 %v8989_v55, %v9134_v43  ;;  %v9302_v22 = vpop.f32.mrf.mxu0 }
 0x4eb   : > { %4689 = vmatpush1.msra.mxu1 %v10857_v41  ;;  %v9287_v40 = vmul.f32 1.442695, %v4235_v31  ;;  %v9289_v58 = vmul.f32 1.442695, %v4236_v3  ;;  %v9297_v6 = vmul.f32 1.442695, %v4238_v39  ;;  %6134 = vpow2.f32 %v4357_v44 }
 0x4ec   : > { %4690 = vmatprep.subr.mxu1 %v10858_v63  ;;  %v9295_v29 = vmul.f32 1.442695, %v10859_v50  ;;  %v9299_v59 = vmul.f32 1.442695, %v4239_v57  ;;  %10861 = vst [vmem:[#allocation112_spill] sm:$0xff] %v9302_v22  ;;  %v9310_v55 = vrot.slane %v9244_v19, %v10694_v2  ;;  %v10862_v43 = vld [vmem:[#allocation39_spill] sm:$0xff]  ;;  %6136 = vpow2.f32 %v4359_v9  ;;  %v9343_v41 = vpop.f32.mrf.mxu0 }
 0x4ed   : > { %4691 = vmatpush1.msra.mxu1 %v10860_v28  ;;  %v3905_v31 = vld [vmem:[#allocation6] sm:$0x3]  ;;  %v9304_v3 = vmul.f32 1.442695, %v4240_v61  ;;  %v9318_v57 = vrot.slane %v9244_v19, %v10732_v15  ;;  %v10864_v46 = vld [vmem:[#allocation43_spill] sm:$0xff]  ;;  %6138 = vpow2.f32 %v4361_v60  ;;  %v10865_v1 = vld [vmem:[#allocation60_spill] sm:$0xff]  ;;  %v10867_v21 = vmax.f32 %v9129_v14, %v9131_v16 }
 0x4ee   : > { %4692 = vmatprep.subr.mxu1 %v10862_v43  ;;  %v9314_v39 = vmul.f32 %v9258_v42, %v3905_v31  ;;  %v9323_v34 = vmul.f32 1.442695, %v4156_v45  ;;  %v10866_v54 = vld [vmem:[#allocation45_spill] sm:$0xff]  ;;  %v9334_v19 = vpop.eup %6114  ;;  %6140 = vpow2.f32 %v4363_v33  ;;  %v10869_v44 = vld [vmem:[#allocation62_spill] sm:$0xff]  ;;  %v10870_v60 = vld [vmem:[#allocation64_spill] sm:$0xff]  ;;  %10873 = vst [vmem:[#allocation46_spill] sm:$0xff] %v9343_v41  ;;  %v9380_v16 = vpop.f32.mrf.mxu0 }
 0x4ef   : > { %4693 = vmatpush1.msra.mxu1 %v10864_v46  ;;  %v9332_v12 = vmax.f32 %v10867_v21, %v9163_v51  ;;  %10868 = vst [vmem:[#allocation86_spill] sm:$0xff] %v9334_v19  ;;  %v10871_v8 = vld [vmem:[#allocation66_spill] sm:$0xff]  ;;  %v10872_v23 = vld [vmem:[#allocation109_spill] sm:$0xff]  ;;  %v9345_v63 = vpop.eup %6116  ;;  %6142 = vpow2.f32 %v4365_v26  ;;  %v10875_v14 = vld [vmem:[#allocation68_spill] sm:$0xff]  ;;  %v10883_v62 = vmov 0.0  }
 0x4f0   : > { %10863 = vst [vmem:[#allocation56_spill] sm:$0xff] %v9314_v39  ;;  %4694 = vmatprep.subr.mxu1 %v10866_v54  ;;  %10874 = vst [vmem:[#allocation53_spill] sm:$0xff] %v9345_v63  ;;  %v10876_v33 = vld [vmem:[#allocation71_spill] sm:$0xff]  ;;  %v10877_v31 = vld [vmem:[#allocation76_spill] sm:$0xff]  ;;  %v9354_v46 = vpop.eup %6118  ;;  %6144 = vpow2.f32 %v4367_v35  ;;  %v9414_v38 = vpop.f32.mrf.mxu0 }
 0x4f1   : > { %4695 = vmatpush1.msra.mxu1 %v10872_v23  ;;  %v10878_v43 = vld [vmem:[#allocation30_spill] sm:$0xff]  ;;  %10879 = vst [vmem:[#allocation58_spill] sm:$0xff] %v9354_v46  ;;  %v10880_v54 = vld [vmem:[#allocation84_spill] sm:$0xff]  ;;  %v9363_v28 = vpop.eup %6120  ;;  %6146 = vpow2.f32 %v4369_v13  ;;  %v10888_v26 = vld [vmem:[#allocation85_spill] sm:$0xff] }
 0x4f2   : > { %4729 = vmatmul.mubr.f32.vlgmr.msra.gmra.mxu1 %v10878_v43  ;;  %v10881_v23 = vld [vmem:[#allocation92_spill] sm:$0xff]  ;;  %10884 = vst [vmem:[#allocation37_spill] sm:$0xff] %v9363_v28  ;;  %v4881_v43 = vadd.f32 %v9354_v46, %v9334_v19  ;;  %v10885_v45 = vld [vmem:[#allocation98_spill] sm:$0xff]  ;;  %v9371_v9 = vpop.eup %6122  ;;  %6148 = vpow2.f32 %v9264_v32  ;;  %v4902_v50 = vadd.f32 %v9363_v28, %v9345_v63  ;;  %v10889_v13 = vld [vmem:[#allocation93_spill] sm:$0xff]  ;;  %v9448_v22 = vpop.f32.mrf.mxu0 }
 0x4f3   : > { %v10882_v61 = vld [vmem:[#allocation96_spill] sm:$0xff]  ;;  %4870 = vmatprep.mubr.f32.mxu1 %v10883_v62  ;;  %10887 = vst [vmem:[#allocation44_spill] sm:$0xff] %v9371_v9  ;;  %10890 = vst [vmem:[#allocation54_spill] sm:$0xff] %v9380_v16  ;;  %v9382_v7 = vpop.eup %6124  ;;  %6150 = vpow2.f32 %v9266_v56  ;;  %v10892_v35 = vld [vmem:[#allocation91_spill] sm:$0xff] }
 0x4f4   : > { %v10886_v48 = vld [vmem:[#allocation100_spill] sm:$0xff]  ;;  %10891 = vst [vmem:[#allocation59_spill] sm:$0xff] %v9382_v7  ;;  %v4882_v21 = vadd.f32 %v9371_v9, %v4881_v43  ;;  %v10893_v62 = vld [vmem:[#allocation87_spill] sm:$0xff]  ;;  %v9390_v63 = vpop.eup %6126  ;;  %6152 = vpow2.f32 %v9271_v24  ;;  %v4903_v51 = vadd.f32 %v9382_v7, %v4902_v50  ;;  %v10896_v28 = vld [vmem:[#allocation89_spill] sm:$0xff] }
 0x4f5   : > { %10894 = vst [vmem:[#allocation61_spill] sm:$0xff] %v9390_v63  ;;  %v10895_v18 = vld [vmem:[#allocation83_spill] sm:$0xff]  ;;  %v9398_v17 = vpop.eup %6128  ;;  %6154 = vpow2.f32 %v9273_v5  ;;  %v10899_v9 = vld [vmem:[#allocation90_spill] sm:$0xff]  ;;  %v10901_v56 = vld [vmem:[#allocation72_spill] sm:$0xff] }
 0x4f6   : > { %10897 = vst [vmem:[#allocation63_spill] sm:$0xff] %v9398_v17  ;;  %v4883_v43 = vadd.f32 %v9390_v63, %v4882_v21  ;;  %v10898_v19 = vld [vmem:[#allocation79_spill] sm:$0xff]  ;;  %v9406_v39 = vpop.eup %6130  ;;  %6156 = vpow2.f32 %v9275_v52  ;;  %v4904_v50 = vadd.f32 %v9398_v17, %v4903_v51  ;;  %v10902_v7 = vld [vmem:[#allocation70_spill] sm:$0xff]  ;;  %10903 = vst [vmem:[#allocation67_spill] sm:$0xff] %v9414_v38  ;;  %v10921_v38 = vsub.f32 %v10865_v1, %v9310_v55 }
 0x4f7   : > { %10900 = vst [vmem:[#allocation65_spill] sm:$0xff] %v9406_v39  ;;  %v9416_v21 = vpop.eup %6132  ;;  %6158 = vpow2.f32 %v9278_v30  ;;  %v10905_v32 = vld [vmem:[#allocation57_spill] sm:$0xff]  ;;  %v10906_v52 = vld [vmem:[#allocation50_spill] sm:$0xff]  ;;  %v10909_v16 = vld [vmem:[#allocation55_spill] sm:$0xff] }
 0x4f8   : > { %10904 = vst [vmem:[#allocation69_spill] sm:$0xff] %v9416_v21  ;;  %v4884_v24 = vadd.f32 %v9406_v39, %v4883_v43  ;;  %v9424_v17 = vpop.eup %6134  ;;  %6160 = vpow2.f32 %v9280_v27  ;;  %v4905_v5 = vadd.f32 %v9416_v21, %v4904_v50  ;;  %v10908_v46 = vld [vmem:[#allocation41_spill] sm:$0xff]  ;;  %v10911_v51 = vld [vmem:[#allocation52_spill] sm:$0xff]  ;;  %v10914_v30 = vld [vmem:[#allocation110_spill] sm:$0xff] }
 0x4f9   : > { %10907 = vst [vmem:[#allocation73_spill] sm:$0xff] %v9424_v17  ;;  %v9432_v41 = vpop.eup %6136  ;;  %6162 = vpow2.f32 %v9282_v20  ;;  %v10912_v39 = vld [vmem:[#allocation105_spill] sm:$0xff]  ;;  %10916 = vst [vmem:[#allocation94_spill] sm:$0xff] %v9448_v22  ;;  %v10918_v63 = vld [vmem:[#allocation95_spill] sm:$0xff]  ;;  %v4529_v22 = vmul.f32 1.442695, %v10921_v38 }
 0x4fa   : > { %10910 = vst [vmem:[#allocation80_spill] sm:$0xff] %v9432_v41  ;;  %v4885_v43 = vadd.f32 %v9424_v17, %v4884_v24  ;;  %v9440_v36 = vpop.eup %6138  ;;  %6164 = vpow2.f32 %v9285_v53  ;;  %v4906_v50 = vadd.f32 %v9432_v41, %v4905_v5  ;;  %v10915_v21 = vld [vmem:[#allocation33_spill] sm:$0xff]  ;;  %v10919_v53 = vld [vmem:[#allocation99_spill] sm:$0xff]  ;;  %v10924_v17 = vsub.f32 %v10870_v60, %v9310_v55  ;;  %v9488_v60 = vpop.f32.mrf.mxu0 }
 0x4fb   : > { %10913 = vst [vmem:[#allocation88_spill] sm:$0xff] %v9440_v36  ;;  %v9450_v24 = vpop.eup %6140  ;;  %6166 = vpow2.f32 %v9287_v40  ;;  %v10922_v40 = vsub.f32 %v10869_v44, %v9318_v57  ;;  %v10927_v44 = vsub.f32 %v10875_v14, %v9310_v55  ;;  %10929 = vst [vmem:[#allocation21_spill] sm:$0xff] %v9488_v60  ;;  %v10932_v14 = vsub.f32 %v10880_v54, %v9318_v57 }
 0x4fc   : > { %10917 = vst [vmem:[#allocation75_spill] sm:$0xff] %v9450_v24  ;;  %v4886_v27 = vadd.f32 %v9440_v36, %v4885_v43  ;;  %v9458_v41 = vpop.eup %6142  ;;  %6168 = vpow2.f32 %v9289_v58  ;;  %v4907_v20 = vadd.f32 %v9450_v24, %v4906_v50  ;;  %v4533_v58 = vmul.f32 1.442695, %v10924_v17 }
 0x4fd   : > { %10920 = vst [vmem:[#allocation107_spill] sm:$0xff] %v9458_v41  ;;  %v4531_v43 = vmul.f32 1.442695, %v10922_v40  ;;  %v9468_v36 = vpop.eup %6144  ;;  %6170 = vpow2.f32 %v9295_v29  ;;  %v10925_v50 = vsub.f32 %v10871_v8, %v9318_v57  ;;  %v4537_v29 = vmul.f32 1.442695, %v10927_v44 }
 0x4fe   : > { %10923 = vst [vmem:[#allocation114_spill] sm:$0xff] %v9468_v36  ;;  %v4887_v5 = vadd.f32 %v9458_v41, %v4886_v27  ;;  %v9478_v1 = vpop.eup %6146  ;;  %6172 = vpow2.f32 %v9297_v6  ;;  %v4908_v38 = vadd.f32 %v9468_v36, %v4907_v20  ;;  %v10928_v27 = vsub.f32 %v10876_v33, %v9318_v57 }
 0x4ff   : > { %v4535_v24 = vmul.f32 1.442695, %v10925_v50  ;;  %10926 = vst [vmem:[#allocation25_spill] sm:$0xff] %v9478_v1  ;;  %v9490_v17 = vpop.eup %6148  ;;  %6174 = vpow2.f32 %v9299_v59  ;;  %v10931_v6 = vsub.f32 %v10877_v31, %v9310_v55  ;;  %v4543_v50 = vmul.f32 1.442695, %v10932_v14 }
 0x500   : > { %v4539_v40 = vmul.f32 1.442695, %v10928_v27  ;;  %10930 = vst [vmem:[#allocation20_spill] sm:$0xff] %v9490_v17  ;;  %v4888_v8 = vadd.f32 %v9478_v1, %v4887_v5  ;;  %v9500_v44 = vpop.eup %6150  ;;  %6176 = vpow2.f32 %v9304_v3  ;;  %v4909_v33 = vadd.f32 %v9490_v17, %v4908_v38 }
 0x501   : > { %v4541_v20 = vmul.f32 1.442695, %v10931_v6  ;;  %v10933_v27 = vsub.f32 %v10881_v23, %v9310_v55  ;;  %v10934_v5 = vsub.f32 %v10882_v61, %v9318_v57  ;;  %v9510_v31 = vpop.eup %6152  ;;  %6178 = vpow2.f32 %v9323_v34 }
 0x502   : > { %v4889_v6 = vadd.f32 %v9500_v44, %v4888_v8  ;;  %v10935_v54 = vsub.f32 %v10885_v45, %v9310_v55  ;;  %v10936_v38 = vsub.f32 %v10886_v48, %v9318_v57  ;;  %v9520_v23 = vpop.eup %6154  ;;  %6180 = vpow2.f32 %v4529_v22  ;;  %v9531_v45 = vpop.f32.mrf.mxu0 }
 0x503   : > { %v4545_v59 = vmul.f32 1.442695, %v10933_v27  ;;  %v4547_v41 = vmul.f32 1.442695, %v10934_v5  ;;  %v4910_v27 = vadd.f32 %v9510_v31, %v4909_v33  ;;  %v10937_v61 = vsub.f32 %v10888_v26, %v9310_v55  ;;  %10939 = vst [vmem:[#allocation35_spill] sm:$0xff] %v9531_v45 }
 0x504   : > { %v4549_v3 = vmul.f32 1.442695, %v10935_v54  ;;  %v4551_v14 = vmul.f32 1.442695, %v10936_v38  ;;  %v10938_v34 = vsub.f32 %v10889_v13, %v9318_v57  ;;  %v9533_v54 = vpop.eup %6156  ;;  %v4890_v48 = vadd.f32 %v9520_v23, %v4889_v6 }
 0x505   : > { %v4553_v5 = vmul.f32 1.442695, %v10937_v61  ;;  %6182 = vpow2.f32 %v4531_v43  ;;  %v10940_v33 = vsub.f32 %v10892_v35, %v9310_v55  ;;  %v10941_v26 = vsub.f32 %v10893_v62, %v9318_v57  ;;  %v9546_v13 = vpop.eup %6158 }
 0x506   : > { %v9529_v8 = vmul.f32 1.442695, %v10938_v34  ;;  %v4911_v61 = vadd.f32 %v9533_v54, %v4910_v27  ;;  %6184 = vpow2.f32 %v4533_v58  ;;  %v10942_v34 = vsub.f32 %v10895_v18, %v9310_v55 }
 0x507   : > { %v9539_v22 = vmul.f32 1.442695, %v10940_v33  ;;  %v9544_v38 = vmul.f32 1.442695, %v10941_v26  ;;  %v10943_v35 = vsub.f32 %v10896_v28, %v9318_v57  ;;  %v9559_v33 = vpop.eup %6160  ;;  %v4891_v62 = vadd.f32 %v9546_v13, %v4890_v48 }
 0x508   : > { %v9552_v6 = vmul.f32 1.442695, %v10942_v34  ;;  %6186 = vpow2.f32 %v4535_v24  ;;  %v10944_v26 = vsub.f32 %v10898_v19, %v9310_v55  ;;  %v10945_v18 = vsub.f32 %v10899_v9, %v9318_v57  ;;  %v9572_v34 = vpop.eup %6162 }
 0x509   : > { %v9557_v43 = vmul.f32 1.442695, %v10943_v35  ;;  %v4912_v28 = vadd.f32 %v9559_v33, %v4911_v61  ;;  %6188 = vpow2.f32 %v4537_v29  ;;  %v10946_v35 = vsub.f32 %v10901_v56, %v9310_v55  ;;  %v9587_v9 = vpop.eup %6164 }
 0x50a   : > { %v9565_v27 = vmul.f32 1.442695, %v10944_v26  ;;  %v9570_v58 = vmul.f32 1.442695, %v10945_v18  ;;  %v10947_v19 = vsub.f32 %v10902_v7, %v9318_v57  ;;  %v9585_v26 = vpop.f32.mrf.mxu0  ;;  %v4892_v18 = vadd.f32 %v9572_v34, %v4891_v62  ;;  %v9600_v7 = vpop.eup %6166 }
 0x50b   : > { %v9578_v48 = vmul.f32 1.442695, %v10946_v35  ;;  %10948 = vst [vmem:[#allocation113_spill] sm:$0xff] %v9585_v26  ;;  %6190 = vpow2.f32 %v4539_v40  ;;  %v10949_v29 = vsub.f32 %v10905_v32, %v9310_v55  ;;  %v10950_v56 = vsub.f32 %v10906_v52, %v9318_v57 }
 0x50c   : > { %v9583_v24 = vmul.f32 1.442695, %v10947_v19  ;;  %v4913_v19 = vadd.f32 %v9587_v9, %v4912_v28  ;;  %6192 = vpow2.f32 %v4541_v20  ;;  %v10951_v36 = vsub.f32 %v10908_v46, %v9310_v55 }
 0x50d   : > { %v9593_v61 = vmul.f32 1.442695, %v10949_v29  ;;  %v9598_v35 = vmul.f32 1.442695, %v10950_v56  ;;  %v10952_v32 = vsub.f32 %v10909_v16, %v9318_v57  ;;  %v6169_v29 = vpop.eup %6168  ;;  %v4893_v52 = vadd.f32 %v9600_v7, %v4892_v18 }
 0x50e   : > { %v9606_v62 = vmul.f32 1.442695, %v10951_v36  ;;  %6194 = vpow2.f32 %v4543_v50  ;;  %v10953_v56 = vsub.f32 %v10911_v51, %v9310_v55  ;;  %v10954_v20 = vsub.f32 %v10912_v39, %v9318_v57  ;;  %v6171_v36 = vpop.eup %6170  ;;  %v9634_v51 = vpop.f32.mrf.mxu0 }
 0x50f   : > { %v9611_v40 = vmul.f32 1.442695, %v10952_v32  ;;  %v4914_v28 = vadd.f32 %v6169_v29, %v4913_v19  ;;  %6196 = vpow2.f32 %v4545_v59  ;;  %v10955_v16 = vsub.f32 %v10914_v30, %v9310_v55  ;;  %10957 = vst [vmem:[#allocation108_spill] sm:$0xff] %v9634_v51 }
 0x510   : > { %v9617_v1 = vmul.f32 1.442695, %v10953_v56  ;;  %v9622_v46 = vmul.f32 1.442695, %v10954_v20  ;;  %v10956_v50 = vsub.f32 %v10915_v21, %v9318_v57  ;;  %v6173_v56 = vpop.eup %6172  ;;  %v4894_v17 = vadd.f32 %v6171_v36, %v4893_v52 }
 0x511   : > { %v9627_v32 = vmul.f32 1.442695, %v10955_v16  ;;  %6198 = vpow2.f32 %v4547_v41  ;;  %v10958_v39 = vsub.f32 %v10918_v63, %v9310_v55  ;;  %v10959_v30 = vmax.f32 %v9147_v37, %v9149_v49  ;;  %v6175_v20 = vpop.eup %6174 }
 0x512   : > { %v9632_v18 = vmul.f32 1.442695, %v10956_v50  ;;  %v4915_v16 = vadd.f32 %v6173_v56, %v4914_v28  ;;  %6200 = vpow2.f32 %v4549_v3  ;;  %v3999_v21 = vmax.f32 %v9332_v12, %v9193_v47  ;;  %v6177_v41 = vpop.eup %6176  ;;  %v9655_v28 = vpop.f32.mrf.mxu0  ;;  %v10961_v12 = vld [vmem:[#allocation38_spill] sm:$0xff] }
 0x513   : > { %v9639_v19 = vmul.f32 1.442695, %v10958_v39  ;;  %v4019_v59 = vmax.f32 %v10959_v30, %v9177_v25  ;;  %v5144_v52 = vrot.slane %v9258_v42, %v10694_v2  ;;  %v4895_v50 = vadd.f32 %v6175_v20, %v4894_v17  ;;  %v9652_v39 = vpop.eup %6178  ;;  %4593 = vmatprep.subr.mxu0 %v6177_v41  ;;  %10960 = vst [vmem:[#allocation106_spill] sm:$0xff] %v9655_v28 }
 0x514   : > { %6202 = vpow2.f32 %v4551_v14  ;;  %v5148_v63 = vrot.slane %v9258_v42, %v10732_v15  ;;  %v4916_v37 = vadd.f32 %v6177_v41, %v4915_v16  ;;  %v4000_v3 = vmax.f32 %v3999_v21, %v9229_v11  ;;  %v9660_v47 = vpop.eup %6180  ;;  %4594 = vmatpush1.msra.mxu0 %v6175_v20  ;;  %v10965_v20 = vld [vmem:[#allocation19_spill] sm:$0xff] }
 0x515   : > { %v4020_v55 = vmax.f32 %v4019_v59, %v9211_v10  ;;  %6204 = vpow2.f32 %v4553_v5  ;;  %v9658_v30 = vmul.f32 %v5144_v52, %v10961_v12  ;;  %v4896_v17 = vrot.slane %v4895_v50, 4  ;;  %v9669_v59 = vpop.eup %6182  ;;  %4595 = vmatprep.subr.mxu0 %v6173_v56  ;;  %v10971_v52 = vld [vmem:[#allocation94_spill] sm:$0xff] }
 0x516   : > { %6206 = vpow2.f32 %v9529_v8  ;;  %v10963_v42 = vsub.f32 %v10919_v53, %v9318_v57  ;;  %v4917_v16 = vrot.slane %v4916_v37, 4  ;;  %v4001_v21 = vmax.f32 %v4000_v3, %v9269_v0  ;;  %v9675_v8 = vpop.eup %6184  ;;  %v10964_v57 = vld [vmem:[#allocation112_spill] sm:$0xff]  ;;  %4596 = vmatpush1.msra.mxu0 %v6171_v36  ;;  %v10967_v3 = vld [vmem:[#allocation46_spill] sm:$0xff] }
 0x517   : > { %10962 = vst [vmem:[#allocation104_spill] sm:$0xff] %v9658_v30  ;;  %v4021_v5 = vmax.f32 %v4020_v55, %v9254_v4  ;;  %6208 = vpow2.f32 %v9539_v22  ;;  %v4897_v41 = vadd.f32 %v4896_v17, %v4895_v50  ;;  %v9680_v55 = vmul.f32 %v5148_v63, %v10965_v20  ;;  %v9682_v12 = vpop.eup %6186  ;;  %4597 = vmatprep.subr.mxu0 %v6169_v29  ;;  %v9688_v50 = vpop.f32.mrf.mxu0  ;;  %v10969_v63 = vld [vmem:[#allocation54_spill] sm:$0xff] }
 0x518   : > { %v9666_v14 = vmul.f32 1.442695, %v10963_v42  ;;  %6210 = vpow2.f32 %v9544_v38  ;;  %v4918_v22 = vadd.f32 %v4917_v16, %v4916_v37  ;;  %v5007_v56 = vadd.f32 %v9675_v8, %v9660_v47  ;;  %10968 = vst [vmem:[#allocation102_spill] sm:$0xff] %v9688_v50  ;;  %v9690_v38 = vpop.eup %6188  ;;  %4598 = vmatpush1.msra.mxu0 %v9600_v7  ;;  %v10970_v16 = vld [vmem:[#allocation67_spill] sm:$0xff] }
 0x519   : > { %v4022_v53 = vmax.f32 %v4021_v5, %v10964_v57  ;;  %10966 = vst [vmem:[#allocation103_spill] sm:$0xff] %v9680_v55  ;;  %6212 = vpow2.f32 %v9552_v6  ;;  %v4002_v42 = vmax.f32 %v4001_v21, %v10967_v3  ;;  %v4898_v17 = vrot.slane %v4897_v41, 2  ;;  %v9697_v6 = vpop.eup %6190  ;;  %4599 = vmatprep.subr.mxu0 %v9587_v9  ;;  %v10991_v55 = vld [vmem:[#allocation65_spill] sm:$0xff] }
 0x51a   : > { %6214 = vpow2.f32 %v9557_v43  ;;  %v5028_v36 = vadd.f32 %v9682_v12, %v9669_v59  ;;  %v4919_v5 = vrot.slane %v4918_v22, 2  ;;  %v5008_v29 = vadd.f32 %v9690_v38, %v5007_v56  ;;  %v9703_v20 = vpop.eup %6192  ;;  %4600 = vmatpush1.msra.mxu0 %v9572_v34 }
 0x51b   : > { %v4023_v37 = vmax.f32 %v4022_v53, %v10969_v63  ;;  %6216 = vpow2.f32 %v9565_v27  ;;  %v4003_v21 = vmax.f32 %v4002_v42, %v10970_v16  ;;  %v4899_v43 = vadd.f32 %v4898_v17, %v4897_v41  ;;  %v9709_v30 = vpop.eup %6194  ;;  %4601 = vmatprep.subr.mxu0 %v9559_v33  ;;  %v9715_v41 = vpop.f32.mrf.mxu0 }
 0x51c   : > { %6218 = vpow2.f32 %v9570_v58  ;;  %v5029_v53 = vadd.f32 %v9697_v6, %v5028_v36  ;;  %v4920_v27 = vadd.f32 %v4919_v5, %v4918_v22  ;;  %v5009_v56 = vadd.f32 %v9703_v20, %v5008_v29  ;;  %10972 = vst [vmem:[#allocation101_spill] sm:$0xff] %v9715_v41  ;;  %v9717_v58 = vpop.eup %6196  ;;  %4602 = vmatpush1.msra.mxu0 %v9546_v13 }
 0x51d   : > { %v4024_v7 = vmax.f32 %v4023_v37, %v10971_v52  ;;  %6220 = vpow2.f32 %v9578_v48  ;;  %v4004_v9 = vmax.f32 %v4003_v21, %v9488_v60  ;;  %v4900_v42 = vrot.slane %v4899_v43, 1  ;;  %4603 = vmatprep.subr.mxu0 %v9533_v54 }
 0x51e   : > { %6222 = vpow2.f32 %v9583_v24  ;;  %v5030_v34 = vadd.f32 %v9709_v30, %v5029_v53  ;;  %v9723_v48 = vpop.eup %6198  ;;  %v4921_v22 = vrot.slane %v4920_v27, 1  ;;  %v5010_v33 = vadd.f32 %v9717_v58, %v5009_v56  ;;  %4604 = vmatpush1.msra.mxu0 %v9520_v23 }
 0x51f   : > { %v4025_v17 = vmax.f32 %v4024_v7, %v9531_v45  ;;  %6224 = vpow2.f32 %v9593_v61  ;;  %v4005_v36 = vmax.f32 %v4004_v9, %v9585_v26  ;;  %v9729_v37 = vpop.eup %6200  ;;  %v4901_v24 = vadd.f32 %v4900_v42, %v4899_v43  ;;  %4605 = vmatprep.subr.mxu0 %v9510_v31  ;;  %v9741_v43 = vpop.f32.mrf.mxu0  ;;  %v10974_v7 = vld [vmem:[#allocation40_spill] sm:$0xff]  ;;  %v10997_v45 = vld [vmem:[#allocation58_spill] sm:$0xff] }
 0x520   : > { %6226 = vpow2.f32 %v9598_v35  ;;  %v5031_v5 = vadd.f32 %v9723_v48, %v5030_v34  ;;  %v4922_v61 = vadd.f32 %v4921_v22, %v4920_v27  ;;  %v5011_v54 = vadd.f32 %v9729_v37, %v5010_v33  ;;  %10973 = vst [vmem:[#allocation27_spill] sm:$0xff] %v9741_v43  ;;  %4606 = vmatpush1.msra.mxu0 %v9500_v44 }
 0x521   : > { %v4026_v13 = vmax.f32 %v4025_v17, %v9634_v51  ;;  %v9735_v29 = vpop.eup %6202  ;;  %6228 = vpow2.f32 %v9606_v62  ;;  %v4006_v21 = vmax.f32 %v4005_v36, %v9655_v28  ;;  %v10975_v62 = vrot.slane %v9652_v39, %v10694_v2  ;;  %v10978_v17 = vld [vmem:[#allocation25_spill] sm:$0xff]  ;;  %v10979_v36 = vld [vmem:[#allocation47_spill] sm:$0xff] }
 0x522   : > { %v9743_v35 = vpop.eup %6204  ;;  %6230 = vpow2.f32 %v9611_v40  ;;  %v5032_v23 = vadd.f32 %v9735_v29, %v5031_v5  ;;  %v5057_v56 = vcombine.low %v4901_v24, %v4922_v61  ;;  %v10977_v40 = vld [vmem:[#allocation20_spill] sm:$0xff]  ;;  %v5172_v33 = vrot.slane %v9652_v39, %v10732_v15  ;;  %v10996_v51 = vld [vmem:[#allocation37_spill] sm:$0xff] }
 0x523   : > { %v4027_v53 = vmax.f32 %v4026_v13, %v9688_v50  ;;  %v9753_v27 = vmul.f32 %v10975_v62, %v10974_v7  ;;  %v9755_v31 = vpop.eup %6206  ;;  %6232 = vpow2.f32 %v9617_v1  ;;  %v5012_v9 = vadd.f32 %v9743_v35, %v5011_v54  ;;  %4607 = vmatprep.subr.mxu0 %v10977_v40  ;;  %v10980_v13 = vld [vmem:[#allocation114_spill] sm:$0xff] }
 0x524   : > { %v4007_v42 = vmax.f32 %v4006_v21, %v9715_v41  ;;  %v9761_v44 = vpop.eup %6208  ;;  %6234 = vpow2.f32 %v9622_v46  ;;  %v5033_v34 = vadd.f32 %v9755_v31, %v5032_v23  ;;  %4608 = vmatpush1.msra.mxu0 %v10978_v17  ;;  %v5064_v24 = vrot.slane %v5057_v56, %v10979_v36  ;;  %v10981_v21 = vld [vmem:[#allocation107_spill] sm:$0xff]  ;;  %v10985_v17 = vld [vmem:[#allocation88_spill] sm:$0xff] }
 0x525   : > { %10976 = vst [vmem:[#allocation39_spill] sm:$0xff] %v9753_v27  ;;  %v4028_v22 = vmax.f32 %v4027_v53, %v9741_v43  ;;  %v9769_v1 = vpop.eup %6210  ;;  %6236 = vpow2.f32 %v9627_v32  ;;  %v5013_v5 = vadd.f32 %v9761_v44, %v5012_v9  ;;  %4609 = vmatprep.subr.mxu0 %v10980_v13  ;;  %v10982_v53 = vld [vmem:[#allocation42_spill] sm:$0xff]  ;;  %v10984_v9 = vld [vmem:[#allocation75_spill] sm:$0xff] }
 0x526   : > { %v4008_v46 = vrot.slane %v4007_v42, 4  ;;  %v9775_v61 = vpop.eup %6212  ;;  %6238 = vpow2.f32 %v9632_v18  ;;  %v5034_v54 = vadd.f32 %v9769_v1, %v5033_v34  ;;  %4610 = vmatpush1.msra.mxu0 %v10981_v21  ;;  %v9781_v7 = vmul.f32 %v5172_v33, %v10982_v53  ;;  %v10986_v21 = vld [vmem:[#allocation56_spill] sm:$0xff]  ;;  %v10992_v27 = vld [vmem:[#allocation63_spill] sm:$0xff] }
 0x527   : > { %v4029_v23 = vrot.slane %v4028_v22, 4  ;;  %v9783_v62 = vpop.eup %6214  ;;  %v5071_v32 = vrot.slane %v5064_v24, %v10979_v36  ;;  %6240 = vpow2.f32 %v9639_v19  ;;  %v5014_v56 = vadd.f32 %v9775_v61, %v5013_v5  ;;  %4611 = vmatprep.subr.mxu0 %v10984_v9  ;;  %v10987_v5 = vld [vmem:[#allocation80_spill] sm:$0xff] }
 0x528   : > { %10983 = vst [vmem:[#allocation43_spill] sm:$0xff] %v9781_v7  ;;  %v4009_v40 = vmax.f32 %v4007_v42, %v4008_v46  ;;  %v9789_v18 = vpop.eup %6216  ;;  %6242 = vpow2.f32 %v9666_v14  ;;  %v5035_v34 = vadd.f32 %v9783_v62, %v5034_v54  ;;  %4612 = vmatpush1.msra.mxu0 %v10985_v17  ;;  %v10988_v14 = vld [vmem:[#allocation73_spill] sm:$0xff] }
 0x529   : > { %v4030_v33 = vmax.f32 %v4028_v22, %v4029_v23  ;;  %v9794_v13 = vpop.eup %6218  ;;  %v5121_v24 = vadd.f32 %v5071_v32, %v10986_v21  ;;  %v5015_v19 = vadd.f32 %v9789_v18, %v5014_v56  ;;  %4613 = vmatprep.subr.mxu0 %v10987_v5  ;;  %v10990_v32 = vld [vmem:[#allocation69_spill] sm:$0xff] }
 0x52a   : > { %v4010_v53 = vrot.slane %v4009_v40, 2  ;;  %v9799_v9 = vpop.eup %6220  ;;  %v5036_v42 = vadd.f32 %v9794_v13, %v5035_v34  ;;  %4614 = vmatpush1.msra.mxu0 %v10988_v14 }
 0x52b   : > { %v4031_v46 = vrot.slane %v4030_v33, 2  ;;  %v9803_v54 = vpop.eup %6222  ;;  %5125 = vst.msk [vmem:[#allocation6] sm:$0x3] %vm6885_vm2, %v5121_v24  ;;  %v5016_v22 = vadd.f32 %v9799_v9, %v5015_v19  ;;  %4615 = vmatprep.subr.mxu0 %v10990_v32  ;;  %v10993_v19 = vld [vmem:[#allocation61_spill] sm:$0xff]  ;;  %v10994_v32 = vld [vmem:[#allocation59_spill] sm:$0xff] }
 0x52c   : > { %v4011_v23 = vmax.f32 %v4009_v40, %v4010_v53  ;;  %v9809_v56 = vpop.eup %6224  ;;  %v5037_v21 = vadd.f32 %v9803_v54, %v5036_v42  ;;  %4616 = vmatpush1.msra.mxu0 %v10991_v55  ;;  %v10995_v55 = vld [vmem:[#allocation44_spill] sm:$0xff] }
 0x52d   : > { %v4032_v5 = vmax.f32 %v4030_v33, %v4031_v46  ;;  %v6227_v34 = vpop.eup %6226  ;;  %v5017_v14 = vadd.f32 %v9809_v56, %v5016_v22  ;;  %4617 = vmatprep.subr.mxu0 %v10992_v27 }
 0x52e   : > { %v4012_v7 = vrot.slane %v4011_v23, 1  ;;  %v6229_v43 = vpop.eup %6228  ;;  %v5038_v24 = vadd.f32 %v6227_v34, %v5037_v21  ;;  %4618 = vmatpush1.msra.mxu0 %v10993_v19 }
 0x52f   : > { %v4033_v41 = vrot.slane %v4032_v5, 1  ;;  %v6231_v40 = vpop.eup %6230  ;;  %v5018_v53 = vadd.f32 %v6229_v43, %v5017_v14  ;;  %4619 = vmatprep.subr.mxu0 %v10994_v32  ;;  %v10998_v14 = vld [vmem:[#allocation53_spill] sm:$0xff] }
 0x530   : > { %v6233_v50 = vpop.eup %6232  ;;  %v5039_v42 = vadd.f32 %v6231_v40, %v5038_v24  ;;  %v4013_v33 = vmax.f32 %v4011_v23, %v4012_v7  ;;  %4620 = vmatpush1.msra.mxu0 %v10995_v55  ;;  %v11000_v24 = vld [vmem:[#allocation28_spill] sm:$0xff] }
 0x531   : > { %v4034_v46 = vmax.f32 %v4032_v5, %v4033_v41  ;;  %v6235_v28 = vpop.eup %6234  ;;  %v5019_v22 = vadd.f32 %v6233_v50, %v5018_v53  ;;  %4621 = vmatprep.subr.mxu0 %v10996_v51  ;;  %v10999_v41 = vld [vmem:[#allocation86_spill] sm:$0xff] }
 0x532   : > { %v6237_v27 = vpop.eup %6236  ;;  %v5040_v26 = vadd.f32 %v6235_v28, %v5039_v42  ;;  %4622 = vmatpush1.msra.mxu0 %v10997_v45  ;;  %v11001_v42 = vmov 0.0  }
 0x533   : > { %v4115_v21 = vcombine.low %v4013_v33, %v4034_v46  ;;  %v6239_v19 = vpop.eup %6238  ;;  %v5020_v60 = vadd.f32 %v6237_v27, %v5019_v22  ;;  %4623 = vmatprep.subr.mxu0 %v10998_v14  ;;  %v3903_v33 = vld [vmem:[#allocation5 + $0x4] sm:$0x3] }
 0x534   : > { %v6241_v32 = vpop.eup %6240  ;;  %v5041_v52 = vadd.f32 %v6239_v19, %v5040_v26  ;;  %4624 = vmatpush1.msra.mxu0 %v10999_v41 }
 0x535   : > { %v4122_v7 = vrot.slane %v4115_v21, %v10979_v36  ;;  %v6243_v23 = vpop.eup %6242  ;;  %v5021_v5 = vadd.f32 %v6241_v32, %v5020_v60  ;;  %4658 = vmatmul.mubr.f32.vlgmr.msra.gmra.mxu0 %v11000_v24 }
 0x536   : > { %v5042_v51 = vadd.f32 %v6243_v23, %v5041_v52  ;;  %4806 = vmatprep.subr.mxu1 %v6243_v23  ;;  %4799 = vmatprep.mubr.f32.mxu0 %v11001_v42 }
 0x537   : > { %v4129_v53 = vrot.slane %v4122_v7, %v10979_v36  ;;  %v5022_v45 = vrot.slane %v5021_v5, 4  ;;  %4807 = vmatpush1.msra.mxu1 %v6241_v32 }
 0x538   : > { %v5043_v46 = vrot.slane %v5042_v51, 4  ;;  %4808 = vmatprep.subr.mxu1 %v6239_v19 }
 0x539   : > { %v4151_v26 = vmax.f32 %v3903_v33, %v4129_v53  ;;  %v5023_v55 = vadd.f32 %v5022_v45, %v5021_v5  ;;  %4809 = vmatpush1.msra.mxu1 %v6237_v27  ;;  %v11004_v5 = vld [vmem:[#allocation24_spill] sm:$0xff]  ;;  %v3908_v45 = vld [vmem:[#allocation6 + $0x6] sm:$0x3] }
 0x53a   : > { %v5044_v22 = vadd.f32 %v5043_v46, %v5042_v51  ;;  %4810 = vmatprep.subr.mxu1 %v6235_v28  ;;  %v4880_v46 = vmul.f32 %v9652_v39, %v3908_v45  ;;  %v11010_v39 = vld [vmem:[#allocation29_spill] sm:$0xff] }
 0x53b   : > { %v4155_v21 = vsub.f32 %v3903_v33, %v4151_v26  ;;  %5207 = vst.msk [vmem:[#allocation5 + $0x4] sm:$0x3] %vm6885_vm2, %v4151_v26  ;;  %v5024_v60 = vrot.slane %v5023_v55, 2  ;;  %4811 = vmatpush1.msra.mxu1 %v6233_v50  ;;  %v9829_v19 = vrot.slane %v4151_v26, %v10694_v2  ;;  %v9833_v28 = vrot.slane %v4151_v26, %v10732_v15 }
 0x53c   : > { %v5045_v52 = vrot.slane %v5044_v22, 2  ;;  %4812 = vmatprep.subr.mxu1 %v6231_v40 }
 0x53d   : > { %v5025_v14 = vadd.f32 %v5024_v60, %v5023_v55  ;;  %4813 = vmatpush1.msra.mxu1 %v6229_v43  ;;  %v4161_v32 = vmul.f32 1.442695, %v4155_v21  ;;  %v11002_v43 = vld [vmem:[#allocation97_spill] sm:$0xff]  ;;  %v4275_v24 = vsub.f32 %v11004_v5, %v9829_v19  ;;  %v4286_v5 = vsub.f32 %v9177_v25, %v9833_v28 }
 0x53e   : > { %v5046_v7 = vadd.f32 %v5045_v52, %v5044_v22  ;;  %4814 = vmatprep.subr.mxu1 %v6227_v34  ;;  %v4273_v34 = vsub.f32 %v11002_v43, %v9829_v19  ;;  %v11008_v55 = vld [vmem:[#allocation77_spill] sm:$0xff]  ;;  %v4289_v25 = vsub.f32 %v9229_v11, %v9829_v19 }
 0x53f   : > { %v5026_v41 = vrot.slane %v5025_v14, 1  ;;  %4815 = vmatpush1.msra.mxu1 %v9809_v56  ;;  %6244 = vpow2.f32 %v4161_v32  ;;  %v11003_v56 = vld [vmem:[#allocation82_spill] sm:$0xff]  ;;  %v4279_v22 = vsub.f32 %v11008_v55, %v9829_v19  ;;  %v4281_v32 = vsub.f32 %v11010_v39, %v9829_v19 }
 0x540   : > { %v5047_v27 = vrot.slane %v5046_v7, 1  ;;  %4816 = vmatprep.subr.mxu1 %v9803_v54  ;;  %v4274_v23 = vsub.f32 %v11003_v56, %v9833_v28  ;;  %v11005_v54 = vld [vmem:[#allocation36_spill] sm:$0xff]  ;;  %v4465_v21 = vmul.f32 1.442695, %v4273_v34  ;;  %v4284_v34 = vsub.f32 %v9149_v49, %v9833_v28  ;;  %v11014_v49 = vld [vmem:[#allocation22_spill] sm:$0xff] }
 0x541   : > { %v5027_v50 = vadd.f32 %v5026_v41, %v5025_v14  ;;  %4817 = vmatpush1.msra.mxu1 %v9799_v9  ;;  %v4276_v51 = vsub.f32 %v11005_v54, %v9833_v28  ;;  %v11011_v41 = vld [vmem:[#allocation31_spill] sm:$0xff]  ;;  %v11017_v55 = vld [vmem:[#allocation34_spill] sm:$0xff] }
 0x542   : > { %v5048_v40 = vadd.f32 %v5047_v27, %v5046_v7  ;;  %4818 = vmatprep.subr.mxu1 %v9794_v13  ;;  %v11006_v13 = vld [vmem:[#allocation81_spill] sm:$0xff]  ;;  %v4467_v52 = vmul.f32 1.442695, %v4274_v23  ;;  %6246 = vpow2.f32 %v4465_v21 }
 0x543   : > { %4819 = vmatpush1.msra.mxu1 %v9789_v18  ;;  %v4277_v9 = vsub.f32 %v11006_v13, %v9829_v19  ;;  %v11007_v18 = vld [vmem:[#allocation78_spill] sm:$0xff]  ;;  %v4471_v14 = vmul.f32 1.442695, %v4276_v51  ;;  %v4290_v13 = vsub.f32 %v9254_v4, %v9833_v28 }
 0x544   : > { %v5102_v53 = vcombine.low %v5027_v50, %v5048_v40  ;;  %4820 = vmatprep.subr.mxu1 %v9783_v62  ;;  %v4278_v33 = vsub.f32 %v11007_v18, %v9833_v28  ;;  %v11009_v62 = vld [vmem:[#allocation74_spill] sm:$0xff]  ;;  %6248 = vpow2.f32 %v4467_v52 }
 0x545   : > { %4821 = vmatpush1.msra.mxu1 %v9775_v61  ;;  %v4280_v60 = vsub.f32 %v11009_v62, %v9833_v28  ;;  %v4469_v61 = vmul.f32 1.442695, %v4275_v24  ;;  %v11012_v40 = vld [vmem:[#allocation18_spill] sm:$0xff] }
 0x546   : > { %v5109_v26 = vrot.slane %v5102_v53, %v10979_v36  ;;  %4822 = vmatprep.subr.mxu1 %v9769_v1  ;;  %v4473_v1 = vmul.f32 1.442695, %v4277_v9  ;;  %v4475_v27 = vmul.f32 1.442695, %v4278_v33  ;;  %v4283_v43 = vsub.f32 %v11012_v40, %v9829_v19  ;;  %v11016_v33 = vld [vmem:[#allocation51_spill] sm:$0xff] }
 0x547   : > { %4823 = vmatpush1.msra.mxu1 %v9761_v44  ;;  %v4282_v44 = vsub.f32 %v11011_v41, %v9833_v28  ;;  %6250 = vpow2.f32 %v4469_v61  ;;  %v4479_v56 = vmul.f32 1.442695, %v4280_v60  ;;  %v4288_v53 = vsub.f32 %v9211_v10, %v9833_v28  ;;  %v11019_v60 = vld [vmem:[#allocation21_spill] sm:$0xff] }
 0x548   : > { %v5116_v7 = vrot.slane %v5109_v26, %v10979_v36  ;;  %4824 = vmatprep.subr.mxu1 %v9755_v31  ;;  %v4477_v31 = vmul.f32 1.442695, %v4279_v22  ;;  %6252 = vpow2.f32 %v4471_v14  ;;  %v4485_v54 = vmul.f32 1.442695, %v4283_v43 }
 0x549   : > { %4825 = vmatpush1.msra.mxu1 %v9743_v35  ;;  %v11013_v35 = vld [vmem:[#allocation23_spill] sm:$0xff]  ;;  %6254 = vpow2.f32 %v4473_v1  ;;  %v4483_v24 = vmul.f32 1.442695, %v4282_v44  ;;  %v4291_v10 = vsub.f32 %v9269_v0, %v9829_v19  ;;  %v4293_v0 = vsub.f32 %v10967_v3, %v9829_v19  ;;  %v11021_v44 = vld [vmem:[#allocation113_spill] sm:$0xff] }
 0x54a   : > { %v5124_v50 = vadd.f32 %v5116_v7, %v4880_v46  ;;  %4826 = vmatprep.subr.mxu1 %v9735_v29  ;;  %v4285_v23 = vsub.f32 %v11013_v35, %v9829_v19  ;;  %v4481_v29 = vmul.f32 1.442695, %v4281_v32  ;;  %6256 = vpow2.f32 %v4475_v27  ;;  %v11020_v7 = vld [vmem:[#allocation35_spill] sm:$0xff] }
 0x54b   : > { %4827 = vmatpush1.msra.mxu1 %v9729_v37  ;;  %v4287_v37 = vsub.f32 %v11014_v49, %v9829_v19  ;;  %6258 = vpow2.f32 %v4477_v31  ;;  %v4501_v26 = vmul.f32 1.442695, %v4291_v10  ;;  %v4297_v52 = vsub.f32 %v11019_v60, %v9829_v19  ;;  %v11022_v31 = vld [vmem:[#allocation108_spill] sm:$0xff] }
 0x54c   : > { %5128 = vst.msk [vmem:[#allocation6 + $0x6] sm:$0x3] %vm6885_vm2, %v5124_v50  ;;  %4828 = vmatprep.subr.mxu1 %v9723_v48  ;;  %v9885_v51 = vpop.eup %6244  ;;  %6260 = vpow2.f32 %v4479_v56  ;;  %v4487_v48 = vmul.f32 1.442695, %v4284_v34  ;;  %v4505_v61 = vmul.f32 1.442695, %v4293_v0  ;;  %v4298_v39 = vsub.f32 %v11020_v7, %v9833_v28 }
 0x54d   : > { %4829 = vmatpush1.msra.mxu1 %v9717_v58  ;;  %6262 = vpow2.f32 %v4481_v29  ;;  %v4489_v58 = vmul.f32 1.442695, %v4285_v23  ;;  %v4493_v9 = vmul.f32 1.442695, %v4287_v37  ;;  %v5160_v11 = vrot.slane %v9885_v51, %v10694_v2  ;;  %v11023_v29 = vld [vmem:[#allocation106_spill] sm:$0xff] }
 0x54e   : > { %4830 = vmatprep.subr.mxu1 %v9709_v30  ;;  %6264 = vpow2.f32 %v4483_v24  ;;  %v4491_v30 = vmul.f32 1.442695, %v4286_v5  ;;  %v5164_v4 = vrot.slane %v9885_v51, %v10732_v15  ;;  %v4299_v27 = vsub.f32 %v11021_v44, %v9829_v19 }
 0x54f   : > { %4831 = vmatpush1.msra.mxu1 %v9703_v20  ;;  %6266 = vpow2.f32 %v4485_v54  ;;  %v4495_v20 = vmul.f32 1.442695, %v4288_v53  ;;  %v9912_v18 = vpop.eup %6246  ;;  %v4300_v34 = vsub.f32 %v11022_v31, %v9833_v28  ;;  %v4301_v5 = vsub.f32 %v11023_v29, %v9829_v19  ;;  %v11024_v54 = vld [vmem:[#allocation102_spill] sm:$0xff] }
 0x550   : > { %4832 = vmatprep.subr.mxu1 %v9697_v6  ;;  %v4292_v6 = vsub.f32 %v10964_v57, %v9833_v28  ;;  %6268 = vpow2.f32 %v4487_v48  ;;  %v4294_v57 = vsub.f32 %v10969_v63, %v9833_v28  ;;  %v9918_v46 = vmul.f32 %v5164_v4, %v11016_v33  ;;  %v11018_v63 = vld [vmem:[#allocation94_spill] sm:$0xff] }
 0x551   : > { %4833 = vmatpush1.msra.mxu1 %v9690_v38  ;;  %6270 = vpow2.f32 %v4489_v58  ;;  %v4497_v38 = vmul.f32 1.442695, %v4289_v25  ;;  %v9920_v3 = vpop.eup %6248  ;;  %v4296_v21 = vsub.f32 %v11018_v63, %v9833_v28  ;;  %v4513_v24 = vmul.f32 1.442695, %v4297_v52 }
 0x552   : > { %4834 = vmatprep.subr.mxu1 %v9682_v12  ;;  %v11015_v12 = vld [vmem:[#allocation49_spill] sm:$0xff]  ;;  %6272 = vpow2.f32 %v4491_v30  ;;  %v4503_v62 = vmul.f32 1.442695, %v4292_v6  ;;  %v4507_v32 = vmul.f32 1.442695, %v4294_v57  ;;  %v4302_v53 = vsub.f32 %v11024_v54, %v9833_v28  ;;  %v11026_v6 = vld [vmem:[#allocation27_spill] sm:$0xff] }
 0x553   : > { %4835 = vmatpush1.msra.mxu1 %v9675_v8  ;;  %v9910_v45 = vmul.f32 %v5160_v11, %v11015_v12  ;;  %v4499_v8 = vmul.f32 1.442695, %v4290_v13  ;;  %6274 = vpow2.f32 %v4493_v9  ;;  %v4511_v56 = vmul.f32 1.442695, %v4296_v21  ;;  %v11025_v13 = vld [vmem:[#allocation101_spill] sm:$0xff] }
 0x554   : > { %4836 = vmatprep.subr.mxu1 %v9669_v59  ;;  %v4295_v59 = vsub.f32 %v10970_v16, %v9829_v19  ;;  %v9925_v22 = vpop.eup %6250  ;;  %6276 = vpow2.f32 %v4495_v20  ;;  %v4515_v48 = vmul.f32 1.442695, %v4298_v39  ;;  %v4303_v30 = vsub.f32 %v11025_v13, %v9829_v19 }
 0x555   : > { %4837 = vmatpush1.msra.mxu1 %v9660_v47  ;;  %v9929_v47 = vpop.eup %6252  ;;  %6278 = vpow2.f32 %v4497_v38  ;;  %v4965_v16 = vadd.f32 %v9925_v22, %v9912_v18  ;;  %v4517_v10 = vmul.f32 1.442695, %v4299_v27  ;;  %v4304_v20 = vsub.f32 %v11026_v6, %v9833_v28 }
 0x556   : > { %4871 = vmatmul.mubr.f32.vlgmr.msra.gmra.mxu1 %v11017_v55  ;;  %v9935_v14 = vpop.eup %6254  ;;  %6280 = vpow2.f32 %v4499_v8  ;;  %v4986_v1 = vadd.f32 %v9929_v47, %v9920_v3  ;;  %v4509_v50 = vmul.f32 1.442695, %v4295_v59  ;;  %v4519_v4 = vmul.f32 1.442695, %v4300_v34 }
 0x557   : > { %v9941_v41 = vpop.eup %6256  ;;  %6282 = vpow2.f32 %v4501_v26  ;;  %v4966_v40 = vadd.f32 %v9935_v14, %v4965_v16  ;;  %v4521_v12 = vmul.f32 1.442695, %v4301_v5  ;;  %v4523_v8 = vmul.f32 1.442695, %v4302_v53 }
 0x558   : > { %v9946_v43 = vpop.eup %6258  ;;  %6284 = vpow2.f32 %v4503_v62  ;;  %v4987_v35 = vadd.f32 %v9941_v41, %v4986_v1  ;;  %v4525_v28 = vmul.f32 1.442695, %v4303_v30  ;;  %v4527_v63 = vmul.f32 1.442695, %v4304_v20 }
 0x559   : > { %v9951_v23 = vpop.eup %6260  ;;  %6286 = vpow2.f32 %v4505_v61  ;;  %v4967_v49 = vadd.f32 %v9946_v43, %v4966_v40 }
 0x55a   : > { %v9956_v37 = vpop.eup %6262  ;;  %6288 = vpow2.f32 %v4507_v32  ;;  %v4988_v25 = vadd.f32 %v9951_v23, %v4987_v35 }
 0x55b   : > { %v9961_v58 = vpop.eup %6264  ;;  %6290 = vpow2.f32 %v4509_v50  ;;  %v4968_v9 = vadd.f32 %v9956_v37, %v4967_v49 }
 0x55c   : > { %v9966_v11 = vpop.eup %6266  ;;  %6292 = vpow2.f32 %v4511_v56  ;;  %v4989_v0 = vadd.f32 %v9961_v58, %v4988_v25 }
 0x55d   : > { %v9971_v38 = vpop.eup %6268  ;;  %6294 = vpow2.f32 %v4513_v24  ;;  %v4969_v57 = vadd.f32 %v9966_v11, %v4968_v9 }
 0x55e   : > { %v9974_v19 = vpop.eup %6270  ;;  %6296 = vpow2.f32 %v4515_v48  ;;  %v4990_v33 = vadd.f32 %v9971_v38, %v4989_v0 }
 0x55f   : > { %v9977_v59 = vpop.eup %6272  ;;  %6298 = vpow2.f32 %v4517_v10  ;;  %v4970_v26 = vadd.f32 %v9974_v19, %v4969_v57 }
 0x560   : > { %v9980_v55 = vpop.eup %6274  ;;  %6300 = vpow2.f32 %v4519_v4  ;;  %v4991_v21 = vadd.f32 %v9977_v59, %v4990_v33 }
 0x561   : > { %v9983_v62 = vpop.eup %6276  ;;  %6302 = vpow2.f32 %v4521_v12  ;;  %v4971_v60 = vadd.f32 %v9980_v55, %v4970_v26 }
 0x562   : > { %v9986_v52 = vpop.eup %6278  ;;  %6304 = vpow2.f32 %v4523_v8  ;;  %v4992_v61 = vadd.f32 %v9983_v62, %v4991_v21 }
 0x563   : > { %v6281_v16 = vpop.eup %6280  ;;  %6306 = vpow2.f32 %v4525_v28  ;;  %v4972_v7 = vadd.f32 %v9986_v52, %v4971_v60 }
 0x564   : > { %v6283_v39 = vpop.eup %6282  ;;  %6308 = vpow2.f32 %v4527_v63  ;;  %v4993_v32 = vadd.f32 %v6281_v16, %v4992_v61 }
 0x565   : > { %v6285_v1 = vpop.eup %6284  ;;  %v4973_v44 = vadd.f32 %v6283_v39, %v4972_v7 }
 0x566   : > { %v6287_v27 = vpop.eup %6286  ;;  %v4994_v50 = vadd.f32 %v6285_v1, %v4993_v32 }
 0x567   : > { %v6289_v40 = vpop.eup %6288  ;;  %v4974_v31 = vadd.f32 %v6287_v27, %v4973_v44 }
 0x568   : > { %v6291_v34 = vpop.eup %6290  ;;  %v4995_v56 = vadd.f32 %v6289_v40, %v4994_v50 }
 0x569   : > { %v6293_v35 = vpop.eup %6292  ;;  %v4975_v29 = vadd.f32 %v6291_v34, %v4974_v31 }
 0x56a   : > { %v6295_v5 = vpop.eup %6294  ;;  %v4996_v24 = vadd.f32 %v6293_v35, %v4995_v56 }
 0x56b   : > { %v6297_v49 = vpop.eup %6296  ;;  %v4976_v54 = vadd.f32 %v6295_v5, %v4975_v29  ;;  %v3907_v29 = vld [vmem:[#allocation6 + $0x4] sm:$0x3] }
 0x56c   : > { %v6299_v53 = vpop.eup %6298  ;;  %v4997_v48 = vadd.f32 %v6297_v49, %v4996_v24 }
 0x56d   : > { %v6301_v25 = vpop.eup %6300  ;;  %v4977_v13 = vadd.f32 %v6299_v53, %v4976_v54 }
 0x56e   : > { %v6303_v30 = vpop.eup %6302  ;;  %v4998_v10 = vadd.f32 %v6301_v25, %v4997_v48 }
 0x56f   : > { %v6305_v9 = vpop.eup %6304  ;;  %v4978_v6 = vadd.f32 %v6303_v30, %v4977_v13 }
 0x570   : > { %v6307_v20 = vpop.eup %6306  ;;  %v4999_v4 = vadd.f32 %v6305_v9, %v4998_v10 }
 0x571   : > { %v6309_v0 = vpop.eup %6308  ;;  %v4979_v12 = vadd.f32 %v6307_v20, %v4978_v6 }
 0x572   : > { %v5000_v57 = vadd.f32 %v6309_v0, %v4999_v4  ;;  %4735 = vmatprep.subr.mxu0 %v6309_v0 }
 0x573   : > { %v4980_v8 = vrot.slane %v4979_v12, 4  ;;  %4736 = vmatpush1.msra.mxu0 %v6307_v20 }
 0x574   : > { %v5001_v33 = vrot.slane %v5000_v57, 4  ;;  %4737 = vmatprep.subr.mxu0 %v6305_v9 }
 0x575   : > { %v4981_v28 = vadd.f32 %v4980_v8, %v4979_v12  ;;  %4738 = vmatpush1.msra.mxu0 %v6303_v30  ;;  %v11031_v30 = vld [vmem:[#allocation48_spill] sm:$0xff]  ;;  %v11032_v12 = vld [vmem:[#allocation103_spill] sm:$0xff] }
 0x576   : > { %v5002_v26 = vadd.f32 %v5001_v33, %v5000_v57  ;;  %4739 = vmatprep.subr.mxu0 %v6301_v25 }
 0x577   : > { %v4982_v63 = vrot.slane %v4981_v28, 2  ;;  %4740 = vmatpush1.msra.mxu0 %v6299_v53 }
 0x578   : > { %v5003_v21 = vrot.slane %v5002_v26, 2  ;;  %4741 = vmatprep.subr.mxu0 %v6297_v49 }
 0x579   : > { %v4983_v60 = vadd.f32 %v4982_v63, %v4981_v28  ;;  %4742 = vmatpush1.msra.mxu0 %v6295_v5  ;;  %v5209_v5 = vld [vmem:[#allocation6] sm:$0x3]  ;;  %v11033_v28 = vld [vmem:[#allocation104_spill] sm:$0xff] }
 0x57a   : > { %v5004_v61 = vadd.f32 %v5003_v21, %v5002_v26  ;;  %4743 = vmatprep.subr.mxu0 %v6293_v35  ;;  %v5210_v35 = vld [vmem:[#allocation6 + $0x2] sm:$0x3] }
 0x57b   : > { %v4984_v7 = vrot.slane %v4983_v60, 1  ;;  %4744 = vmatpush1.msra.mxu0 %v6291_v34  ;;  %v4879_v34 = vmul.f32 %v9885_v51, %v3907_v29  ;;  %v11028_v51 = vld [vmem:[#allocation111_spill] sm:$0xff] }
 0x57c   : > { %v5005_v32 = vrot.slane %v5004_v61, 1  ;;  %4745 = vmatprep.subr.mxu0 %v6289_v40 }
 0x57d   : > { %v4985_v44 = vadd.f32 %v4984_v7, %v4983_v60  ;;  %4746 = vmatpush1.msra.mxu0 %v6287_v27 }
 0x57e   : > { %v5006_v50 = vadd.f32 %v5005_v32, %v5004_v61  ;;  %4747 = vmatprep.subr.mxu0 %v6285_v1  ;;  %v5281_v32 = vld [vmem:[#allocation13] sm:$0xff] }
 0x57f   : > { %4748 = vmatpush1.msra.mxu0 %v6283_v39 }
 0x580   : > { %v5087_v31 = vcombine.low %v4985_v44, %v5006_v50  ;;  %4749 = vmatprep.subr.mxu0 %v6281_v16  ;;  %v5282_v44 = vld [vmem:[#allocation13 + $0x8] sm:$0xff] }
 0x581   : > { %4750 = vmatpush1.msra.mxu0 %v9986_v52 }
 0x582   : > { %v5094_v56 = vrot.slane %v5087_v31, %v10979_v36  ;;  %4751 = vmatprep.subr.mxu0 %v9983_v62 }
 0x583   : > { %4752 = vmatpush1.msra.mxu0 %v9980_v55 }
 0x584   : > { %v5101_v40 = vrot.slane %v5094_v56, %v10979_v36  ;;  %4753 = vmatprep.subr.mxu0 %v9977_v59  ;;  %v11027_v36 = vld [vmem:[#allocation32_spill] sm:$0xff]  ;;  %v11030_v59 = vld [vmem:[#allocation43_spill] sm:$0xff] }
 0x585   : > { %4754 = vmatpush1.msra.mxu0 %v9974_v19 }
 0x586   : > { %v5123_v39 = vadd.f32 %v5101_v40, %v4879_v34  ;;  %4755 = vmatprep.subr.mxu0 %v9971_v38 }
 0x587   : > { %4756 = vmatpush1.msra.mxu0 %v9966_v11  ;;  %v11029_v11 = vld [vmem:[#allocation39_spill] sm:$0xff] }
 0x588   : > { %5127 = vst.msk [vmem:[#allocation6 + $0x4] sm:$0x3] %vm6885_vm2, %v5123_v39  ;;  %4757 = vmatprep.subr.mxu0 %v9961_v58 }
 0x589   : > { %4758 = vmatpush1.msra.mxu0 %v9956_v37 }
 0x58a   : > { %4759 = vmatprep.subr.mxu0 %v9951_v23 }
 0x58b   : > { %4760 = vmatpush1.msra.mxu0 %v9946_v43 }
 0x58c   : > { %4761 = vmatprep.subr.mxu0 %v9941_v41  ;;  %v5286_v41 = vld [vmem:[%s10105_s5 + $0x8] sm:$0xff] }
 0x58d   : > { %4762 = vmatpush1.msra.mxu0 %v9935_v14  ;;  %v5212_v14 = vld [vmem:[#allocation6 + $0x6] sm:$0x3] }
 0x58e   : > { %4763 = vmatprep.subr.mxu0 %v9929_v47  ;;  %v5285_v47 = vld [vmem:[%s10105_s5] sm:$0xff]  ;;  %6310 = vrcp.f32 %v5212_v14 }
 0x58f   : > { %4764 = vmatpush1.msra.mxu0 %v9925_v22  ;;  %v6478_v22 = vmov 0   ;;  %v5211_v27 = vld [vmem:[#allocation6 + $0x4] sm:$0x3] }
 0x590   : > { %4765 = vmatprep.subr.mxu0 %v9920_v3  ;;  %5781 = vset.pattern.permute.xlu1 %v6478_v22  ;;  %v5288_v3 = vld [vmem:[%s10105_s5 + $0x18] sm:$0xff]  ;;  %6312 = vrcp.f32 %v5211_v27 }
 0x591   : > { %4766 = vmatpush1.msra.mxu0 %v9912_v18  ;;  %5780 = vset.pattern.permute.xlu0 %v6478_v22  ;;  %v5287_v18 = vld [vmem:[%s10105_s5 + $0x10] sm:$0xff]  ;;  %6314 = vrcp.f32 %v5210_v35 }
 0x592   : > { %4800 = vmatmul.mubr.f32.vlgmr.msra.gmra.mxu0 %v11027_v36  ;;  %5296 = vperm.xlu1 %5781, %v5286_v41   ;;  %6316 = vrcp.f32 %v5209_v5 }
 0x593   : > { %5385 = vmatprep.mubr.f32.mxu0 %v11001_v42  ;;  %5291 = vperm.xlu0 %5780, %v5285_v47  }
 0x596   : > { %5301 = vperm.xlu1 %5781, %v5287_v18  }
 0x59a   : > { %5306 = vperm.xlu1 %5781, %v5288_v3  }
 0x59b   : > { %v6311_v37 = vpop.eup %6310 }
 0x59c   : > { %v5264_v62 = vrot.slane %v6311_v37, %v10732_v15  ;;  %v5260_v52 = vrot.slane %v6311_v37, %v10694_v2 }
 0x59d   : > { %v6313_v54 = vpop.eup %6312 }
 0x59e   : > { %v6315_v48 = vpop.eup %6314  ;;  %v5256_v6 = vrot.slane %v6313_v54, %v10732_v15  ;;  %v5252_v4 = vrot.slane %v6313_v54, %v10694_v2 }
 0x59f   : > { %v6317_v20 = vpop.eup %6316  ;;  %v5248_v0 = vrot.slane %v6315_v48, %v10732_v15  ;;  %v5244_v33 = vrot.slane %v6315_v48, %v10694_v2 }
 0x5a0   : > { %v5240_v21 = vrot.slane %v6317_v20, %v10732_v15  ;;  %v5236_v60 = vrot.slane %v6317_v20, %v10694_v2  ;;  %v5283_v15 = vld [vmem:[#allocation13 + $0x10] sm:$0xff]  ;;  %v5284_v2 = vld [vmem:[#allocation13 + $0x18] sm:$0xff] }
 0x5b2   : > { %v4730_v17 = vpop.f32.mrf.mxu1 }
 0x5b3   : > { %v5191_v23 = vadd.f32 %v11028_v51, %v4730_v17 }
 0x5b4   : > { %v4732_v43 = vpop.f32.mrf.mxu1 }
 0x5b5   : > { %v5192_v10 = vadd.f32 %v11031_v30, %v4732_v43 }
 0x5b7   : > { %v5276_v63 = vmul.f32 %v5248_v0, %v5192_v10 }
 0x5f5   : > { %v4659_v24 = vpop.f32.mrf.mxu0 }
 0x5f6   : > { %v5189_v26 = vadd.f32 %v11033_v28, %v4659_v24 }
 0x5f7   : > { %v4661_v49 = vpop.f32.mrf.mxu0 }
 0x5f8   : > { %v5190_v57 = vadd.f32 %v11032_v12, %v4661_v49  ;;  %v5273_v7 = vmul.f32 %v5236_v60, %v5189_v26 }
 0x5fa   : > { %v5274_v61 = vmul.f32 %v5240_v21, %v5190_v57 }
 0x60d   : > { %v5297_v31 = vpop.permute.xlu1 %5296 }
 0x60e   : > { %v5292_v50 = vpop.permute.xlu0 %5291 }
 0x611   : > { %v5302_v17 = vpop.permute.xlu1 %5301 }
 0x615   : > { %v5307_v18 = vpop.permute.xlu1 %5306 }
 0x616   : > { %v4872_v58 = vpop.f32.mrf.mxu1 }
 0x617   : > { %v5195_v38 = vadd.f32 %v11029_v11, %v4872_v58 }
 0x618   : > { %v4874_v19 = vpop.f32.mrf.mxu1 }
 0x619   : > { %v5196_v55 = vadd.f32 %v11030_v59, %v4874_v19  ;;  %v5279_v1 = vmul.f32 %v5260_v52, %v5195_v38 }
 0x61b   : > { %v5280_v16 = vmul.f32 %v5264_v62, %v5196_v55 }
 0x61d   : > { %5345 = vmatprep.subr.mxu0 %v5280_v16 }
 0x61e   : > { %5346 = vmatpush1.msra.mxu0 %v5279_v1 }
 0x652   : > { %v4801_v53 = vpop.f32.mrf.mxu0 }
 0x653   : > { %v5193_v25 = vadd.f32 %v9910_v45, %v4801_v53 }
 0x654   : > { %v4803_v13 = vpop.f32.mrf.mxu0 }
 0x655   : > { %v5194_v9 = vadd.f32 %v9918_v46, %v4803_v13  ;;  %v5277_v45 = vmul.f32 %v5252_v4, %v5193_v25  ;;  %v5275_v46 = vmul.f32 %v5244_v33, %v5191_v23 }
 0x657   : > { %v5278_v8 = vmul.f32 %v5256_v6, %v5194_v9 }
 0x659   : > { %5347 = vmatprep.subr.mxu0 %v5278_v8 }
 0x65a   : > { %5348 = vmatpush1.msra.mxu0 %v5277_v45 }
 0x65b   : > { %5349 = vmatprep.subr.mxu0 %v5276_v63 }
 0x65c   : > { %5350 = vmatpush1.msra.mxu0 %v5275_v46 }
 0x65d   : > { %5351 = vmatprep.subr.mxu0 %v5274_v61 }
 0x65e   : > { %5352 = vmatpush1.msra.mxu0 %v5273_v7 }
 0x65f   : > { %5691 = vmatmul.mubr.msk.f32.vlgmr.msra.gmra.mxu0 %vm339_vm0, %v5281_v32 }
 0x660   : > { %5391 = vmatprep.mubr.f32.mxu0 %v11001_v42 }
 0x663   : > { %5692 = vmatmul.mubr.msk.f32.gmra.mxu0 %vm339_vm0, %v5282_v44 }
 0x664   : > { %5397 = vmatprep.mubr.f32.mxu0 %v11001_v42 }
 0x667   : > { %5693 = vmatmul.mubr.msk.f32.gmra.mxu0 %vm339_vm0, %v5283_v15 }
 0x668   : > { %5403 = vmatprep.mubr.f32.mxu0 %v11001_v42 }
 0x66b   : > { %5694 = vmatmul.mubr.msk.f32.gmra.mxu0 %vm339_vm0, %v5284_v2 }
 0x71f   : > { %v5387_v56 = vpop.f32.mrf.mxu0 }
 0x720   : > { %v5388_v29 = vadd.f32 %v5387_v56, %v5292_v50 }
 0x721   : > { %v5389_v34 = vpop.f32.mrf.mxu0 }
 0x722   : > { %5410 = vst [vmem:[%s313_s15] sm:$0xff] %v5388_v29  ;;  %v5390_v40 = vadd.f32 %v5389_v34, %v5292_v50 }
 0x723   : > { %v5393_v39 = vpop.f32.mrf.mxu0 }
 0x724   : > { %5411 = vst [vmem:[%s313_s15 + $0x8] sm:$0xff] %v5390_v40  ;;  %v5394_v36 = vadd.f32 %v5393_v39, %v5297_v31 }
 0x725   : > { %v5395_v51 = vpop.f32.mrf.mxu0 }
 0x726   : > { %5412 = vst [vmem:[%s313_s15 + $0x10] sm:$0xff] %v5394_v36  ;;  %v5396_v42 = vadd.f32 %v5395_v51, %v5297_v31 }
 0x727   : > { %v5399_v23 = vpop.f32.mrf.mxu0 }
 0x728   : > { %5413 = vst [vmem:[%s313_s15 + $0x18] sm:$0xff] %v5396_v42  ;;  %v5400_v41 = vadd.f32 %v5399_v23, %v5302_v17 }
 0x729   : > { %v5401_v47 = vpop.f32.mrf.mxu0 }
 0x72a   : > { %5414 = vst [vmem:[%s313_s15 + $0x20] sm:$0xff] %v5400_v41  ;;  %v5402_v22 = vadd.f32 %v5401_v47, %v5302_v17 }
 0x72b   : > { %v5405_v3 = vpop.f32.mrf.mxu0 }
 0x72c   : > { %5415 = vst [vmem:[%s313_s15 + $0x28] sm:$0xff] %v5402_v22  ;;  %v5406_v14 = vadd.f32 %v5405_v3, %v5307_v18 }
 0x72d   : > { %v5407_v43 = vpop.f32.mrf.mxu0 }
 0x72e   : > { %5416 = vst [vmem:[%s313_s15 + $0x30] sm:$0xff] %v5406_v14  ;;  %v5408_v37 = vadd.f32 %v5407_v43, %v5307_v18 }
 0x730   : > { %5417 = vst [vmem:[%s313_s15 + $0x38] sm:$0xff] %v5408_v37 }
 0x731   : > { %6411 = shalt.err (!%p6408_p13)
}
 0x732   : > { %s6412_s8 = scalar_lea.hbm %s10057_s14, 1024  ;;  %s6416_s27 = scalar_lea.hbm %s10106_s6, 2048 }
 0x733   : > { %p6413_p5 = scmp.ne.s32.totalorder %s10057_s14, %s6412_s8  ;;  %p6417_p8 = scmp.lt.s32.totalorder %s10057_s14, %s10106_s6 }
 0x734   : > { %p6418_p3 = scmp.lt.s32.totalorder %s6416_s27, %s6412_s8 }
 0x735   : > { %p6414_p0 = pnand %p6413_p5, %p11034_p1 }
 0x736   : > { %p6419_p11 = por %p6418_p3, %p6417_p8 }
 0x737   : > { %p6415_p4 = pneg %p6414_p0 }
 0x739   : > { %p6420_p10 = pnand %p6419_p11, %p6415_p4 }
 0x73b   : > { %6423 = shalt.err (!%p6420_p10)
}
 0x73c   : > { %s6480_s17 = smov 256   ;;  %s6481_s12 = smov 16  }
 0x73d   : > { %5713 = dma.vmem_to_hbm [thread:$0]  (%p11034_p1), %s10052_s16, 1024, %s10057_s14, %s5419_s20, %s6480_s17, %s6480_s17, %s6481_s12  }
 0x73e PF: > { %s5447_s25 = sand.u32 1, %s6454_s21   ;;  %p11035_p2 = scmp.ne.s32.totalorder %s10419_s28, 0 }
 0x73f   : > { %p11036_p6 = scmp.ge.s32.totalorder %s6466_s24, 2  ;;  %s5448_s18 = scalar_lea.sflag [#allocation10], %s5447_s25 }
 0x741   : > { %p5727_p12 = pnand %p11036_p6, %p11035_p2 }
 0x743   : > { %p5728_p7 = pneg %p5727_p12 }
 0x745   : > { %6449 = dma.done.wait (%p5728_p7), %s5448_s18, 1024  }
 0x746   : > { %6451 = vsyncadd (%p5728_p7), %s5448_s18, 4294966272  ;;  %p20_p9 = scmp.ge.s32.totalorder %s6589_s19, 4   ;;  %s11037_s21 = smov %s6458_s22 }
 0x747   : > { %s11038_s22 = smov %s6462_s23  ;;  %s11039_s23 = smov %s6605_s7 }
 0x748   : > { %s11040_s24 = smov %s6589_s19  ;;  %22 = sbr.rel (!%p20_p9) target bundleno = 6 (0x6), region = 102 }
 0x74d   :  { %5453 = vsyncpa [#allocation9], 1 }
 0x74e   :  { %5455 = vsyncpa [#allocation9 + $0x1], 1 }
 0x74f   :  { %5456 = vsyncpa [#allocation12], 1 }
 0x750   :  { %5457 = vsyncpa [#allocation10], 1 }
 0x751   :  { %5459 = vsyncpa [#allocation10 + $0x1], 1 }

</bundles_post_ra>
